<compile_context>
chip_gen: v7x
topology: tpu7x:2x2x1
jax: 0.10.0
libtpu: 0.0.40
codegen_flags: <defaults>
</compile_context>

<pallas_src>
import functools

import jax
import jax.numpy as jnp
import numpy as np
from jax import lax
from jax.experimental import pallas as pl
from jax.experimental.pallas import tpu as pltpu


def _round_up(x, m):
    return (x + m - 1) // m * m


def _pad_gate_cols(w, H, Hp):
    """(rows, 3H) -> (rows, 3Hp): gate g's H columns placed at [g*Hp, g*Hp+H)."""
    rows = w.shape[0]
    out = jnp.zeros((rows, 3 * Hp), jnp.float32)
    for g in range(3):
        out = out.at[:, g * Hp:g * Hp + H].set(w[:, g * H:(g + 1) * H])
    return out


def _encoder_gru_kernel(x_ref, wih_cat_ref, bih_cat_ref,
                        whh_f_ref, bhh_f_ref, whh_b_ref, bhh_b_ref,
                        h0_ref,
                        out_ref, hid_ref,
                        gi_f_scr, gi_b_scr, outb_scr, *, hidden_pad):
    T, Bp, Ep = x_ref.shape
    Hp = hidden_pad
    G = 3 * Hp

    # ---- Hoisted input projection: one large MXU matmul covering every
    # timestep and both directions (biases folded in).  This removes half of
    # the matmuls from the latency-bound serial recurrence below.
    x2 = x_ref[...].reshape(T * Bp, Ep)
    gi = jnp.dot(x2, wih_cat_ref[...], preferred_element_type=jnp.float32)
    gi = gi + bih_cat_ref[...]
    gi = gi.reshape(T, Bp, 2 * G)
    gi_f_scr[...] = gi[:, :, :G]      # lane-aligned split (G is a mult. of 128)
    gi_b_scr[...] = gi[:, :, G:]

    whh_f = whh_f_ref[...]
    bhh_f = bhh_f_ref[...]
    whh_b = whh_b_ref[...]
    bhh_b = bhh_b_ref[...]

    def cell(gi_t, h_prev, whh_t, bhh):
        # PyTorch GRU gate order [r, z, n].  Hp is a multiple of 128, so every
        # gate slice lands on a lane-tile boundary (no cross-lane relayouts).
        gh = jnp.dot(h_prev, whh_t, preferred_element_type=jnp.float32) + bhh
        r = jax.nn.sigmoid(gi_t[:, 0:Hp] + gh[:, 0:Hp])
        z = jax.nn.sigmoid(gi_t[:, Hp:2 * Hp] + gh[:, Hp:2 * Hp])
        n = jnp.tanh(gi_t[:, 2 * Hp:3 * Hp] + r * gh[:, 2 * Hp:3 * Hp])
        return (1.0 - z) * n + z * h_prev

    def body(t, carry):
        h_f, h_b = carry
        tb = T - 1 - t
        # Fused fwd/bwd step: two independent recurrent matmuls back-to-back
        # so they overlap in the MXU pipeline; one loop instead of two.
        h_f = cell(gi_f_scr[t], h_f, whh_f, bhh_f)
        h_b = cell(gi_b_scr[tb], h_b, whh_b, bhh_b)
        out_ref[t] = h_f              # lane-dense (Bp, Hp) unmasked store
        outb_scr[tb] = h_b
        return (h_f, h_b)

    unroll = True if T <= 32 else 4
    h_f, h_b = lax.fori_loop(0, T, body, (h0_ref[0], h0_ref[1]), unroll=unroll)
    hid_ref[0] = h_f
    hid_ref[1] = h_b
    # Single vectorized combine of the two directions (no per-step RMW).
    out_ref[...] = out_ref[...] + outb_scr[...]


def encoder_rnn_forward(sequence, params, hidden=None):
    """Pallas-backed equivalent of EncoderRNN.forward.

    sequence: int32 (T, B) of token indices.
    Returns (encoder_outputs (T, B, H), hidden (2, B, H)).
    """
    emb = params["embedding"]                    # (V, E), row 1 == 0 (padding_idx)
    T, B = sequence.shape
    H = params["hidden_size"]
    E = emb.shape[1]
    Hp = _round_up(H, 128)                       # lane-dense hidden
    Ep = _round_up(E, 128)                       # lane-dense embedding
    Bp = _round_up(B, 8)                         # sublane-dense batch

    # Embedding gather (plain-JAX glue) + padding to TPU tile sizes.  Padded
    # rows/columns are exact zeros and stay zero through the recurrence.
    x = jnp.take(emb, sequence, axis=0).astype(jnp.float32)          # (T, B, E)
    x_pad = jnp.zeros((T, Bp, Ep), jnp.float32).at[:, :B, :E].set(x)

    # Concatenated, gate-block-padded input weights: (Ep, 6*Hp).
    wih_cat = jnp.zeros((Ep, 6 * Hp), jnp.float32)
    wih_cat = wih_cat.at[:E, :3 * Hp].set(_pad_gate_cols(params["wih_f_t"], H, Hp))
    wih_cat = wih_cat.at[:E, 3 * Hp:].set(_pad_gate_cols(params["wih_b_t"], H, Hp))
    bih_cat = jnp.concatenate(
        [_pad_gate_cols(params["bih_f"], H, Hp),
         _pad_gate_cols(params["bih_b"], H, Hp)], axis=1)            # (1, 6*Hp)

    whh_f = jnp.zeros((Hp, 3 * Hp), jnp.float32).at[:H].set(
        _pad_gate_cols(params["whh_f_t"], H, Hp))
    whh_b = jnp.zeros((Hp, 3 * Hp), jnp.float32).at[:H].set(
        _pad_gate_cols(params["whh_b_t"], H, Hp))
    bhh_f = _pad_gate_cols(params["bhh_f"], H, Hp)
    bhh_b = _pad_gate_cols(params["bhh_b"], H, Hp)

    if hidden is None:
        h0 = jnp.zeros((2, Bp, Hp), jnp.float32)
    else:
        h0 = jnp.zeros((2, Bp, Hp), jnp.float32).at[:, :B, :H].set(hidden)

    kernel = functools.partial(_encoder_gru_kernel, hidden_pad=Hp)
    vmem = lambda: pl.BlockSpec(memory_space=pltpu.MemorySpace.VMEM)

    f32 = 4
    bytes_accessed = f32 * int(x_pad.size + wih_cat.size + bih_cat.size
                               + 2 * whh_f.size + 2 * bhh_f.size + h0.size
                               + T * Bp * Hp + 2 * Bp * Hp)
    flops = int(2 * T * Bp * 6 * Hp * Ep          # hoisted input projection
                + 2 * 2 * T * Bp * 3 * Hp * Hp    # recurrent matmuls (2 dirs)
                + 2 * 20 * T * Bp * Hp)           # gate elementwise (approx)
    cost = pl.CostEstimate(flops=flops,
                           transcendentals=int(2 * 3 * T * Bp * Hp),
                           bytes_accessed=bytes_accessed)

    out_pad, hid_pad = pl.pallas_call(
        kernel,
        out_shape=(jax.ShapeDtypeStruct((T, Bp, Hp), jnp.float32),
                   jax.ShapeDtypeStruct((2, Bp, Hp), jnp.float32)),
        in_specs=[vmem() for _ in range(8)],
        out_specs=(vmem(), vmem()),
        scratch_shapes=[pltpu.VMEM((T, Bp, 3 * Hp), jnp.float32),   # gi fwd
                        pltpu.VMEM((T, Bp, 3 * Hp), jnp.float32),   # gi bwd
                        pltpu.VMEM((T, Bp, Hp), jnp.float32)],      # bwd outs
        input_output_aliases={7: 1},   # h0 buffer reused for hidden output
        compiler_params=pltpu.CompilerParams(vmem_limit_bytes=32 * 1024 * 1024),
        cost_estimate=cost,
    )(x_pad, wih_cat, bih_cat, whh_f, bhh_f, whh_b, bhh_b, h0)

    return out_pad[:, :B, :H], hid_pad[:, :B, :H]


def _gru_cell_ref(x_t, h_prev, wih_t, whh_t, bih, bhh, H):
    gi = jnp.dot(x_t, wih_t, preferred_element_type=jnp.float32) + bih
    gh = jnp.dot(h_prev, whh_t, preferred_element_type=jnp.float32) + bhh
    i_r, i_z, i_n = gi[:, 0:H], gi[:, H:2 * H], gi[:, 2 * H:3 * H]
    h_r, h_z, h_n = gh[:, 0:H], gh[:, H:2 * H], gh[:, 2 * H:3 * H]
    r = jax.nn.sigmoid(i_r + h_r)
    z = jax.nn.sigmoid(i_z + h_z)
    n = jnp.tanh(i_n + r * h_n)
    return (1.0 - z) * n + z * h_prev


def reference_forward(sequence, params, hidden=None):
    """Pure-JAX reference with identical semantics (for verification)."""
    emb = params["embedding"]
    T, B = sequence.shape
    H = params["hidden_size"]
    x = jnp.take(emb, sequence, axis=0).astype(jnp.float32)
    if hidden is None:
        hidden = jnp.zeros((2, B, H), jnp.float32)

    def scan_f(h, x_t):
        h_new = _gru_cell_ref(x_t, h, params["wih_f_t"], params["whh_f_t"],
                              params["bih_f"], params["bhh_f"], H)
        return h_new, h_new

    def scan_b(h, x_t):
        h_new = _gru_cell_ref(x_t, h, params["wih_b_t"], params["whh_b_t"],
                              params["bih_b"], params["bhh_b"], H)
        return h_new, h_new

    h_f, out_f = lax.scan(scan_f, hidden[0], x)
    h_b, out_b = lax.scan(scan_b, hidden[1], x[::-1])
    out_b = out_b[::-1]
    return out_f + out_b, jnp.stack([h_f, h_b])


def init_params(key, input_size, embedding_size, hidden_size):
    """Deterministic parameter init mirroring nn.Embedding / nn.GRU shapes."""
    ks = jax.random.split(key, 9)
    emb = jax.random.normal(ks[0], (input_size, embedding_size), jnp.float32)
    emb = emb.at[1].set(0.0)                     # padding_idx=1
    bound = 1.0 / np.sqrt(hidden_size)

    def u(k, shape):
        return jax.random.uniform(k, shape, jnp.float32, -bound, bound)

    H3 = 3 * hidden_size
    wih_f = u(ks[1], (H3, embedding_size))
    whh_f = u(ks[2], (H3, hidden_size))
    bih_f = u(ks[3], (H3,))
    bhh_f = u(ks[4], (H3,))
    wih_b = u(ks[5], (H3, embedding_size))
    whh_b = u(ks[6], (H3, hidden_size))
    bih_b = u(ks[7], (H3,))
    bhh_b = u(ks[8], (H3,))

    return dict(
        embedding=emb,
        wih_f_t=wih_f.T, whh_f_t=whh_f.T,
        bih_f=bih_f[None, :], bhh_f=bhh_f[None, :],
        wih_b_t=wih_b.T, whh_b_t=whh_b.T,
        bih_b=bih_b[None, :], bhh_b=bhh_b[None, :],
        hidden_size=hidden_size,
    )


if __name__ == "__main__":
    VOCAB = 50          # input_size
    EMBED = 16          # embedding_size
    HIDDEN = 32         # hidden_size
    T, B = 8, 2         # seq_len, batch

    key = jax.random.PRNGKey(0)
    k_param, k_seq = jax.random.split(key)
    params = init_params(k_param, VOCAB, EMBED, HIDDEN)

    sequence = jax.random.randint(k_seq, (T, B), 0, VOCAB, dtype=jnp.int32)
    sequence = sequence.at[-1, 0].set(1)         # include a padding token

    out, hid = encoder_rnn_forward(sequence, params)
    out, hid = jax.block_until_ready((out, hid))

    ref_out, ref_hid = reference_forward(sequence, params)
    np.testing.assert_allclose(np.asarray(out), np.asarray(ref_out),
                               rtol=1e-5, atol=1e-5)
    np.testing.assert_allclose(np.asarray(hid), np.asarray(ref_hid),
                               rtol=1e-5, atol=1e-5)

    assert out.shape == (T, B, HIDDEN)
    assert hid.shape == (2, B, HIDDEN)
    print("KERNEL_OK")
</pallas_src>

<mosaic_0001>
module attributes {stable_mosaic.version = 11 : i64} {
  func.func @_encoder_gru_kernel(%arg0: memref<8x8x128xf32, #tpu.memory_space<vmem>>, %arg1: memref<128x768xf32, #tpu.memory_space<vmem>>, %arg2: memref<1x768xf32, #tpu.memory_space<vmem>>, %arg3: memref<128x384xf32, #tpu.memory_space<vmem>>, %arg4: memref<1x384xf32, #tpu.memory_space<vmem>>, %arg5: memref<128x384xf32, #tpu.memory_space<vmem>>, %arg6: memref<1x384xf32, #tpu.memory_space<vmem>>, %arg7: memref<2x8x128xf32, #tpu.memory_space<vmem>>, %arg8: memref<8x8x128xf32, #tpu.memory_space<vmem>>, %arg9: memref<2x8x128xf32, #tpu.memory_space<vmem>>, %arg10: memref<8x8x384xf32, #tpu.memory_space<vmem>>, %arg11: memref<8x8x384xf32, #tpu.memory_space<vmem>>, %arg12: memref<8x8x128xf32, #tpu.memory_space<vmem>>) attributes {dimension_semantics = [], scalar_prefetch = 0 : i64, scratch_operands = 3 : i64, tpu.core_type = #tpu.core_type<tc>} {
    %c0 = arith.constant 0 : index
    %c0_0 = arith.constant 0 : index
    %c0_1 = arith.constant 0 : index
    %0 = vector.load %arg0[%c0, %c0_0, %c0_1] : memref<8x8x128xf32, #tpu.memory_space<vmem>>, vector<8x8x128xf32>
    %1 = vector.shape_cast %0 : vector<8x8x128xf32> to vector<64x128xf32>
    %c0_2 = arith.constant 0 : index
    %c0_3 = arith.constant 0 : index
    %2 = vector.load %arg1[%c0_2, %c0_3] : memref<128x768xf32, #tpu.memory_space<vmem>>, vector<128x768xf32>
    %cst = arith.constant dense<0.000000e+00> : vector<64x768xf32>
    %3 = tpu.matmul %1, %2, %cst {dimension_numbers = #tpu.dot_dimension_numbers<[1], [0], [0], [1], [0, 0, 1, 1], [], []>} : vector<64x128xf32>, vector<128x768xf32>, vector<64x768xf32> -> vector<64x768xf32>
    %c0_4 = arith.constant 0 : index
    %c0_5 = arith.constant 0 : index
    %4 = vector.load %arg2[%c0_4, %c0_5] : memref<1x768xf32, #tpu.memory_space<vmem>>, vector<1x768xf32>
    %5 = vector.broadcast %4 : vector<1x768xf32> to vector<64x768xf32>
    %6 = arith.addf %3, %5 : vector<64x768xf32>
    %7 = vector.shape_cast %6 : vector<64x768xf32> to vector<8x8x768xf32>
    %8 = vector.extract_strided_slice %7 {offsets = [0, 0, 0], sizes = [8, 8, 384], strides = [1, 1, 1]} : vector<8x8x768xf32> to vector<8x8x384xf32>
    %c0_6 = arith.constant 0 : index
    %c0_7 = arith.constant 0 : index
    %c0_8 = arith.constant 0 : index
    %9 = vector.load %arg10[%c0_6, %c0_7, %c0_8] : memref<8x8x384xf32, #tpu.memory_space<vmem>>, vector<8x8x384xf32>
    tpu.vector_store %arg10[%c0_6, %c0_7, %c0_8], %8 {strides = array<i32>} : memref<8x8x384xf32, #tpu.memory_space<vmem>>, vector<8x8x384xf32>,
    %10 = vector.extract_strided_slice %7 {offsets = [0, 0, 384], sizes = [8, 8, 384], strides = [1, 1, 1]} : vector<8x8x768xf32> to vector<8x8x384xf32>
    %c0_9 = arith.constant 0 : index
    %c0_10 = arith.constant 0 : index
    %c0_11 = arith.constant 0 : index
    %11 = vector.load %arg11[%c0_9, %c0_10, %c0_11] : memref<8x8x384xf32, #tpu.memory_space<vmem>>, vector<8x8x384xf32>
    tpu.vector_store %arg11[%c0_9, %c0_10, %c0_11], %10 {strides = array<i32>} : memref<8x8x384xf32, #tpu.memory_space<vmem>>, vector<8x8x384xf32>,
    %c0_12 = arith.constant 0 : index
    %c0_13 = arith.constant 0 : index
    %12 = vector.load %arg3[%c0_12, %c0_13] : memref<128x384xf32, #tpu.memory_space<vmem>>, vector<128x384xf32>
    %c0_14 = arith.constant 0 : index
    %c0_15 = arith.constant 0 : index
    %13 = vector.load %arg4[%c0_14, %c0_15] : memref<1x384xf32, #tpu.memory_space<vmem>>, vector<1x384xf32>
    %c0_16 = arith.constant 0 : index
    %c0_17 = arith.constant 0 : index
    %14 = vector.load %arg5[%c0_16, %c0_17] : memref<128x384xf32, #tpu.memory_space<vmem>>, vector<128x384xf32>
    %c0_18 = arith.constant 0 : index
    %c0_19 = arith.constant 0 : index
    %15 = vector.load %arg6[%c0_18, %c0_19] : memref<1x384xf32, #tpu.memory_space<vmem>>, vector<1x384xf32>
    %c0_20 = arith.constant 0 : index
    %c0_21 = arith.constant 0 : index
    %c0_22 = arith.constant 0 : index
    %16 = vector.load %arg7[%c0_20, %c0_21, %c0_22] : memref<2x8x128xf32, #tpu.memory_space<vmem>>, vector<1x8x128xf32>
    %17 = vector.shape_cast %16 : vector<1x8x128xf32> to vector<8x128xf32>
    %c1 = arith.constant 1 : index
    %c0_23 = arith.constant 0 : index
    %c0_24 = arith.constant 0 : index
    %18 = vector.load %arg7[%c1, %c0_23, %c0_24] : memref<2x8x128xf32, #tpu.memory_space<vmem>>, vector<1x8x128xf32>
    %19 = vector.shape_cast %18 : vector<1x8x128xf32> to vector<8x128xf32>
    %c0_i32 = arith.constant 0 : i32
    %c7_i32 = arith.constant 7 : i32
    %20 = arith.subi %c7_i32, %c0_i32 : i32
    %21 = arith.index_cast %c0_i32 : i32 to index
    %c0_25 = arith.constant 0 : index
    %c0_26 = arith.constant 0 : index
    %22 = vector.load %arg10[%21, %c0_25, %c0_26] : memref<8x8x384xf32, #tpu.memory_space<vmem>>, vector<1x8x384xf32>
    %23 = vector.shape_cast %22 : vector<1x8x384xf32> to vector<8x384xf32>
    %cst_27 = arith.constant dense<0.000000e+00> : vector<8x384xf32>
    %24 = tpu.matmul %17, %12, %cst_27 {dimension_numbers = #tpu.dot_dimension_numbers<[1], [0], [0], [1], [0, 0, 1, 1], [], []>} : vector<8x128xf32>, vector<128x384xf32>, vector<8x384xf32> -> vector<8x384xf32>
    %25 = vector.broadcast %13 : vector<1x384xf32> to vector<8x384xf32>
    %26 = arith.addf %24, %25 : vector<8x384xf32>
    %27 = vector.extract_strided_slice %23 {offsets = [0, 0], sizes = [8, 128], strides = [1, 1]} : vector<8x384xf32> to vector<8x128xf32>
    %28 = vector.extract_strided_slice %26 {offsets = [0, 0], sizes = [8, 128], strides = [1, 1]} : vector<8x384xf32> to vector<8x128xf32>
    %29 = arith.addf %27, %28 : vector<8x128xf32>
    %30 = arith.negf %29 : vector<8x128xf32>
    %31 = math.exp %30 : vector<8x128xf32>
    %cst_28 = arith.constant 1.000000e+00 : f32
    %32 = vector.broadcast %cst_28 : f32 to vector<8x128xf32>
    %33 = arith.addf %32, %31 : vector<8x128xf32>
    %34 = arith.divf %32, %33 : vector<8x128xf32>
    %35 = vector.extract_strided_slice %23 {offsets = [0, 128], sizes = [8, 128], strides = [1, 1]} : vector<8x384xf32> to vector<8x128xf32>
    %36 = vector.extract_strided_slice %26 {offsets = [0, 128], sizes = [8, 128], strides = [1, 1]} : vector<8x384xf32> to vector<8x128xf32>
    %37 = arith.addf %35, %36 : vector<8x128xf32>
    %38 = arith.negf %37 : vector<8x128xf32>
    %39 = math.exp %38 : vector<8x128xf32>
    %cst_29 = arith.constant 1.000000e+00 : f32
    %40 = vector.broadcast %cst_29 : f32 to vector<8x128xf32>
    %41 = arith.addf %40, %39 : vector<8x128xf32>
    %42 = arith.divf %40, %41 : vector<8x128xf32>
    %43 = vector.extract_strided_slice %23 {offsets = [0, 256], sizes = [8, 128], strides = [1, 1]} : vector<8x384xf32> to vector<8x128xf32>
    %44 = vector.extract_strided_slice %26 {offsets = [0, 256], sizes = [8, 128], strides = [1, 1]} : vector<8x384xf32> to vector<8x128xf32>
    %45 = arith.mulf %34, %44 : vector<8x128xf32>
    %46 = arith.addf %43, %45 : vector<8x128xf32>
    %47 = math.tanh %46 : vector<8x128xf32>
    %cst_30 = arith.constant 1.000000e+00 : f32
    %48 = vector.broadcast %cst_30 : f32 to vector<8x128xf32>
    %49 = arith.subf %48, %42 : vector<8x128xf32>
    %50 = arith.mulf %49, %47 : vector<8x128xf32>
    %51 = arith.mulf %42, %17 : vector<8x128xf32>
    %52 = arith.addf %50, %51 : vector<8x128xf32>
    %53 = arith.index_cast %20 : i32 to index
    %c0_31 = arith.constant 0 : index
    %c0_32 = arith.constant 0 : index
    %54 = vector.load %arg11[%53, %c0_31, %c0_32] : memref<8x8x384xf32, #tpu.memory_space<vmem>>, vector<1x8x384xf32>
    %55 = vector.shape_cast %54 : vector<1x8x384xf32> to vector<8x384xf32>
    %cst_33 = arith.constant dense<0.000000e+00> : vector<8x384xf32>
    %56 = tpu.matmul %19, %14, %cst_33 {dimension_numbers = #tpu.dot_dimension_numbers<[1], [0], [0], [1], [0, 0, 1, 1], [], []>} : vector<8x128xf32>, vector<128x384xf32>, vector<8x384xf32> -> vector<8x384xf32>
    %57 = vector.broadcast %15 : vector<1x384xf32> to vector<8x384xf32>
    %58 = arith.addf %56, %57 : vector<8x384xf32>
    %59 = vector.extract_strided_slice %55 {offsets = [0, 0], sizes = [8, 128], strides = [1, 1]} : vector<8x384xf32> to vector<8x128xf32>
    %60 = vector.extract_strided_slice %58 {offsets = [0, 0], sizes = [8, 128], strides = [1, 1]} : vector<8x384xf32> to vector<8x128xf32>
    %61 = arith.addf %59, %60 : vector<8x128xf32>
    %62 = arith.negf %61 : vector<8x128xf32>
    %63 = math.exp %62 : vector<8x128xf32>
    %cst_34 = arith.constant 1.000000e+00 : f32
    %64 = vector.broadcast %cst_34 : f32 to vector<8x128xf32>
    %65 = arith.addf %64, %63 : vector<8x128xf32>
    %66 = arith.divf %64, %65 : vector<8x128xf32>
    %67 = vector.extract_strided_slice %55 {offsets = [0, 128], sizes = [8, 128], strides = [1, 1]} : vector<8x384xf32> to vector<8x128xf32>
    %68 = vector.extract_strided_slice %58 {offsets = [0, 128], sizes = [8, 128], strides = [1, 1]} : vector<8x384xf32> to vector<8x128xf32>
    %69 = arith.addf %67, %68 : vector<8x128xf32>
    %70 = arith.negf %69 : vector<8x128xf32>
    %71 = math.exp %70 : vector<8x128xf32>
    %cst_35 = arith.constant 1.000000e+00 : f32
    %72 = vector.broadcast %cst_35 : f32 to vector<8x128xf32>
    %73 = arith.addf %72, %71 : vector<8x128xf32>
    %74 = arith.divf %72, %73 : vector<8x128xf32>
    %75 = vector.extract_strided_slice %55 {offsets = [0, 256], sizes = [8, 128], strides = [1, 1]} : vector<8x384xf32> to vector<8x128xf32>
    %76 = vector.extract_strided_slice %58 {offsets = [0, 256], sizes = [8, 128], strides = [1, 1]} : vector<8x384xf32> to vector<8x128xf32>
    %77 = arith.mulf %66, %76 : vector<8x128xf32>
    %78 = arith.addf %75, %77 : vector<8x128xf32>
    %79 = math.tanh %78 : vector<8x128xf32>
    %cst_36 = arith.constant 1.000000e+00 : f32
    %80 = vector.broadcast %cst_36 : f32 to vector<8x128xf32>
    %81 = arith.subf %80, %74 : vector<8x128xf32>
    %82 = arith.mulf %81, %79 : vector<8x128xf32>
    %83 = arith.mulf %74, %19 : vector<8x128xf32>
    %84 = arith.addf %82, %83 : vector<8x128xf32>
    %85 = arith.index_cast %c0_i32 : i32 to index
    %c0_37 = arith.constant 0 : index
    %c0_38 = arith.constant 0 : index
    %86 = vector.load %arg8[%85, %c0_37, %c0_38] : memref<8x8x128xf32, #tpu.memory_space<vmem>>, vector<1x8x128xf32>
    %87 = vector.shape_cast %86 : vector<1x8x128xf32> to vector<8x128xf32>
    %88 = vector.shape_cast %52 : vector<8x128xf32> to vector<1x8x128xf32>
    tpu.vector_store %arg8[%85, %c0_37, %c0_38], %88 {strides = array<i32>} : memref<8x8x128xf32, #tpu.memory_space<vmem>>, vector<1x8x128xf32>,
    %89 = arith.index_cast %20 : i32 to index
    %c0_39 = arith.constant 0 : index
    %c0_40 = arith.constant 0 : index
    %90 = vector.load %arg12[%89, %c0_39, %c0_40] : memref<8x8x128xf32, #tpu.memory_space<vmem>>, vector<1x8x128xf32>
    %91 = vector.shape_cast %90 : vector<1x8x128xf32> to vector<8x128xf32>
    %92 = vector.shape_cast %84 : vector<8x128xf32> to vector<1x8x128xf32>
    tpu.vector_store %arg12[%89, %c0_39, %c0_40], %92 {strides = array<i32>} : memref<8x8x128xf32, #tpu.memory_space<vmem>>, vector<1x8x128xf32>,
    %c1_i32 = arith.constant 1 : i32
    %c7_i32_41 = arith.constant 7 : i32
    %93 = arith.subi %c7_i32_41, %c1_i32 : i32
    %94 = arith.index_cast %c1_i32 : i32 to index
    %c0_42 = arith.constant 0 : index
    %c0_43 = arith.constant 0 : index
    %95 = vector.load %arg10[%94, %c0_42, %c0_43] : memref<8x8x384xf32, #tpu.memory_space<vmem>>, vector<1x8x384xf32>
    %96 = vector.shape_cast %95 : vector<1x8x384xf32> to vector<8x384xf32>
    %cst_44 = arith.constant dense<0.000000e+00> : vector<8x384xf32>
    %97 = tpu.matmul %52, %12, %cst_44 {dimension_numbers = #tpu.dot_dimension_numbers<[1], [0], [0], [1], [0, 0, 1, 1], [], []>} : vector<8x128xf32>, vector<128x384xf32>, vector<8x384xf32> -> vector<8x384xf32>
    %98 = vector.broadcast %13 : vector<1x384xf32> to vector<8x384xf32>
    %99 = arith.addf %97, %98 : vector<8x384xf32>
    %100 = vector.extract_strided_slice %96 {offsets = [0, 0], sizes = [8, 128], strides = [1, 1]} : vector<8x384xf32> to vector<8x128xf32>
    %101 = vector.extract_strided_slice %99 {offsets = [0, 0], sizes = [8, 128], strides = [1, 1]} : vector<8x384xf32> to vector<8x128xf32>
    %102 = arith.addf %100, %101 : vector<8x128xf32>
    %103 = arith.negf %102 : vector<8x128xf32>
    %104 = math.exp %103 : vector<8x128xf32>
    %cst_45 = arith.constant 1.000000e+00 : f32
    %105 = vector.broadcast %cst_45 : f32 to vector<8x128xf32>
    %106 = arith.addf %105, %104 : vector<8x128xf32>
    %107 = arith.divf %105, %106 : vector<8x128xf32>
    %108 = vector.extract_strided_slice %96 {offsets = [0, 128], sizes = [8, 128], strides = [1, 1]} : vector<8x384xf32> to vector<8x128xf32>
    %109 = vector.extract_strided_slice %99 {offsets = [0, 128], sizes = [8, 128], strides = [1, 1]} : vector<8x384xf32> to vector<8x128xf32>
    %110 = arith.addf %108, %109 : vector<8x128xf32>
    %111 = arith.negf %110 : vector<8x128xf32>
    %112 = math.exp %111 : vector<8x128xf32>
    %cst_46 = arith.constant 1.000000e+00 : f32
    %113 = vector.broadcast %cst_46 : f32 to vector<8x128xf32>
    %114 = arith.addf %113, %112 : vector<8x128xf32>
    %115 = arith.divf %113, %114 : vector<8x128xf32>
    %116 = vector.extract_strided_slice %96 {offsets = [0, 256], sizes = [8, 128], strides = [1, 1]} : vector<8x384xf32> to vector<8x128xf32>
    %117 = vector.extract_strided_slice %99 {offsets = [0, 256], sizes = [8, 128], strides = [1, 1]} : vector<8x384xf32> to vector<8x128xf32>
    %118 = arith.mulf %107, %117 : vector<8x128xf32>
    %119 = arith.addf %116, %118 : vector<8x128xf32>
    %120 = math.tanh %119 : vector<8x128xf32>
    %cst_47 = arith.constant 1.000000e+00 : f32
    %121 = vector.broadcast %cst_47 : f32 to vector<8x128xf32>
    %122 = arith.subf %121, %115 : vector<8x128xf32>
    %123 = arith.mulf %122, %120 : vector<8x128xf32>
    %124 = arith.mulf %115, %52 : vector<8x128xf32>
    %125 = arith.addf %123, %124 : vector<8x128xf32>
    %126 = arith.index_cast %93 : i32 to index
    %c0_48 = arith.constant 0 : index
    %c0_49 = arith.constant 0 : index
    %127 = vector.load %arg11[%126, %c0_48, %c0_49] : memref<8x8x384xf32, #tpu.memory_space<vmem>>, vector<1x8x384xf32>
    %128 = vector.shape_cast %127 : vector<1x8x384xf32> to vector<8x384xf32>
    %cst_50 = arith.constant dense<0.000000e+00> : vector<8x384xf32>
    %129 = tpu.matmul %84, %14, %cst_50 {dimension_numbers = #tpu.dot_dimension_numbers<[1], [0], [0], [1], [0, 0, 1, 1], [], []>} : vector<8x128xf32>, vector<128x384xf32>, vector<8x384xf32> -> vector<8x384xf32>
    %130 = vector.broadcast %15 : vector<1x384xf32> to vector<8x384xf32>
    %131 = arith.addf %129, %130 : vector<8x384xf32>
    %132 = vector.extract_strided_slice %128 {offsets = [0, 0], sizes = [8, 128], strides = [1, 1]} : vector<8x384xf32> to vector<8x128xf32>
    %133 = vector.extract_strided_slice %131 {offsets = [0, 0], sizes = [8, 128], strides = [1, 1]} : vector<8x384xf32> to vector<8x128xf32>
    %134 = arith.addf %132, %133 : vector<8x128xf32>
    %135 = arith.negf %134 : vector<8x128xf32>
    %136 = math.exp %135 : vector<8x128xf32>
    %cst_51 = arith.constant 1.000000e+00 : f32
    %137 = vector.broadcast %cst_51 : f32 to vector<8x128xf32>
    %138 = arith.addf %137, %136 : vector<8x128xf32>
    %139 = arith.divf %137, %138 : vector<8x128xf32>
    %140 = vector.extract_strided_slice %128 {offsets = [0, 128], sizes = [8, 128], strides = [1, 1]} : vector<8x384xf32> to vector<8x128xf32>
    %141 = vector.extract_strided_slice %131 {offsets = [0, 128], sizes = [8, 128], strides = [1, 1]} : vector<8x384xf32> to vector<8x128xf32>
    %142 = arith.addf %140, %141 : vector<8x128xf32>
    %143 = arith.negf %142 : vector<8x128xf32>
    %144 = math.exp %143 : vector<8x128xf32>
    %cst_52 = arith.constant 1.000000e+00 : f32
    %145 = vector.broadcast %cst_52 : f32 to vector<8x128xf32>
    %146 = arith.addf %145, %144 : vector<8x128xf32>
    %147 = arith.divf %145, %146 : vector<8x128xf32>
    %148 = vector.extract_strided_slice %128 {offsets = [0, 256], sizes = [8, 128], strides = [1, 1]} : vector<8x384xf32> to vector<8x128xf32>
    %149 = vector.extract_strided_slice %131 {offsets = [0, 256], sizes = [8, 128], strides = [1, 1]} : vector<8x384xf32> to vector<8x128xf32>
    %150 = arith.mulf %139, %149 : vector<8x128xf32>
    %151 = arith.addf %148, %150 : vector<8x128xf32>
    %152 = math.tanh %151 : vector<8x128xf32>
    %cst_53 = arith.constant 1.000000e+00 : f32
    %153 = vector.broadcast %cst_53 : f32 to vector<8x128xf32>
    %154 = arith.subf %153, %147 : vector<8x128xf32>
    %155 = arith.mulf %154, %152 : vector<8x128xf32>
    %156 = arith.mulf %147, %84 : vector<8x128xf32>
    %157 = arith.addf %155, %156 : vector<8x128xf32>
    %158 = arith.index_cast %c1_i32 : i32 to index
    %c0_54 = arith.constant 0 : index
    %c0_55 = arith.constant 0 : index
    %159 = vector.load %arg8[%158, %c0_54, %c0_55] : memref<8x8x128xf32, #tpu.memory_space<vmem>>, vector<1x8x128xf32>
    %160 = vector.shape_cast %159 : vector<1x8x128xf32> to vector<8x128xf32>
    %161 = vector.shape_cast %125 : vector<8x128xf32> to vector<1x8x128xf32>
    tpu.vector_store %arg8[%158, %c0_54, %c0_55], %161 {strides = array<i32>} : memref<8x8x128xf32, #tpu.memory_space<vmem>>, vector<1x8x128xf32>,
    %162 = arith.index_cast %93 : i32 to index
    %c0_56 = arith.constant 0 : index
    %c0_57 = arith.constant 0 : index
    %163 = vector.load %arg12[%162, %c0_56, %c0_57] : memref<8x8x128xf32, #tpu.memory_space<vmem>>, vector<1x8x128xf32>
    %164 = vector.shape_cast %163 : vector<1x8x128xf32> to vector<8x128xf32>
    %165 = vector.shape_cast %157 : vector<8x128xf32> to vector<1x8x128xf32>
    tpu.vector_store %arg12[%162, %c0_56, %c0_57], %165 {strides = array<i32>} : memref<8x8x128xf32, #tpu.memory_space<vmem>>, vector<1x8x128xf32>,
    %c2_i32 = arith.constant 2 : i32
    %c7_i32_58 = arith.constant 7 : i32
    %166 = arith.subi %c7_i32_58, %c2_i32 : i32
    %167 = arith.index_cast %c2_i32 : i32 to index
    %c0_59 = arith.constant 0 : index
    %c0_60 = arith.constant 0 : index
    %168 = vector.load %arg10[%167, %c0_59, %c0_60] : memref<8x8x384xf32, #tpu.memory_space<vmem>>, vector<1x8x384xf32>
    %169 = vector.shape_cast %168 : vector<1x8x384xf32> to vector<8x384xf32>
    %cst_61 = arith.constant dense<0.000000e+00> : vector<8x384xf32>
    %170 = tpu.matmul %125, %12, %cst_61 {dimension_numbers = #tpu.dot_dimension_numbers<[1], [0], [0], [1], [0, 0, 1, 1], [], []>} : vector<8x128xf32>, vector<128x384xf32>, vector<8x384xf32> -> vector<8x384xf32>
    %171 = vector.broadcast %13 : vector<1x384xf32> to vector<8x384xf32>
    %172 = arith.addf %170, %171 : vector<8x384xf32>
    %173 = vector.extract_strided_slice %169 {offsets = [0, 0], sizes = [8, 128], strides = [1, 1]} : vector<8x384xf32> to vector<8x128xf32>
    %174 = vector.extract_strided_slice %172 {offsets = [0, 0], sizes = [8, 128], strides = [1, 1]} : vector<8x384xf32> to vector<8x128xf32>
    %175 = arith.addf %173, %174 : vector<8x128xf32>
    %176 = arith.negf %175 : vector<8x128xf32>
    %177 = math.exp %176 : vector<8x128xf32>
    %cst_62 = arith.constant 1.000000e+00 : f32
    %178 = vector.broadcast %cst_62 : f32 to vector<8x128xf32>
    %179 = arith.addf %178, %177 : vector<8x128xf32>
    %180 = arith.divf %178, %179 : vector<8x128xf32>
    %181 = vector.extract_strided_slice %169 {offsets = [0, 128], sizes = [8, 128], strides = [1, 1]} : vector<8x384xf32> to vector<8x128xf32>
    %182 = vector.extract_strided_slice %172 {offsets = [0, 128], sizes = [8, 128], strides = [1, 1]} : vector<8x384xf32> to vector<8x128xf32>
    %183 = arith.addf %181, %182 : vector<8x128xf32>
    %184 = arith.negf %183 : vector<8x128xf32>
    %185 = math.exp %184 : vector<8x128xf32>
    %cst_63 = arith.constant 1.000000e+00 : f32
    %186 = vector.broadcast %cst_63 : f32 to vector<8x128xf32>
    %187 = arith.addf %186, %185 : vector<8x128xf32>
    %188 = arith.divf %186, %187 : vector<8x128xf32>
    %189 = vector.extract_strided_slice %169 {offsets = [0, 256], sizes = [8, 128], strides = [1, 1]} : vector<8x384xf32> to vector<8x128xf32>
    %190 = vector.extract_strided_slice %172 {offsets = [0, 256], sizes = [8, 128], strides = [1, 1]} : vector<8x384xf32> to vector<8x128xf32>
    %191 = arith.mulf %180, %190 : vector<8x128xf32>
    %192 = arith.addf %189, %191 : vector<8x128xf32>
    %193 = math.tanh %192 : vector<8x128xf32>
    %cst_64 = arith.constant 1.000000e+00 : f32
    %194 = vector.broadcast %cst_64 : f32 to vector<8x128xf32>
    %195 = arith.subf %194, %188 : vector<8x128xf32>
    %196 = arith.mulf %195, %193 : vector<8x128xf32>
    %197 = arith.mulf %188, %125 : vector<8x128xf32>
    %198 = arith.addf %196, %197 : vector<8x128xf32>
    %199 = arith.index_cast %166 : i32 to index
    %c0_65 = arith.constant 0 : index
    %c0_66 = arith.constant 0 : index
    %200 = vector.load %arg11[%199, %c0_65, %c0_66] : memref<8x8x384xf32, #tpu.memory_space<vmem>>, vector<1x8x384xf32>
    %201 = vector.shape_cast %200 : vector<1x8x384xf32> to vector<8x384xf32>
    %cst_67 = arith.constant dense<0.000000e+00> : vector<8x384xf32>
    %202 = tpu.matmul %157, %14, %cst_67 {dimension_numbers = #tpu.dot_dimension_numbers<[1], [0], [0], [1], [0, 0, 1, 1], [], []>} : vector<8x128xf32>, vector<128x384xf32>, vector<8x384xf32> -> vector<8x384xf32>
    %203 = vector.broadcast %15 : vector<1x384xf32> to vector<8x384xf32>
    %204 = arith.addf %202, %203 : vector<8x384xf32>
    %205 = vector.extract_strided_slice %201 {offsets = [0, 0], sizes = [8, 128], strides = [1, 1]} : vector<8x384xf32> to vector<8x128xf32>
    %206 = vector.extract_strided_slice %204 {offsets = [0, 0], sizes = [8, 128], strides = [1, 1]} : vector<8x384xf32> to vector<8x128xf32>
    %207 = arith.addf %205, %206 : vector<8x128xf32>
    %208 = arith.negf %207 : vector<8x128xf32>
    %209 = math.exp %208 : vector<8x128xf32>
    %cst_68 = arith.constant 1.000000e+00 : f32
    %210 = vector.broadcast %cst_68 : f32 to vector<8x128xf32>
    %211 = arith.addf %210, %209 : vector<8x128xf32>
    %212 = arith.divf %210, %211 : vector<8x128xf32>
    %213 = vector.extract_strided_slice %201 {offsets = [0, 128], sizes = [8, 128], strides = [1, 1]} : vector<8x384xf32> to vector<8x128xf32>
    %214 = vector.extract_strided_slice %204 {offsets = [0, 128], sizes = [8, 128], strides = [1, 1]} : vector<8x384xf32> to vector<8x128xf32>
    %215 = arith.addf %213, %214 : vector<8x128xf32>
    %216 = arith.negf %215 : vector<8x128xf32>
    %217 = math.exp %216 : vector<8x128xf32>
    %cst_69 = arith.constant 1.000000e+00 : f32
    %218 = vector.broadcast %cst_69 : f32 to vector<8x128xf32>
    %219 = arith.addf %218, %217 : vector<8x128xf32>
    %220 = arith.divf %218, %219 : vector<8x128xf32>
    %221 = vector.extract_strided_slice %201 {offsets = [0, 256], sizes = [8, 128], strides = [1, 1]} : vector<8x384xf32> to vector<8x128xf32>
    %222 = vector.extract_strided_slice %204 {offsets = [0, 256], sizes = [8, 128], strides = [1, 1]} : vector<8x384xf32> to vector<8x128xf32>
    %223 = arith.mulf %212, %222 : vector<8x128xf32>
    %224 = arith.addf %221, %223 : vector<8x128xf32>
    %225 = math.tanh %224 : vector<8x128xf32>
    %cst_70 = arith.constant 1.000000e+00 : f32
    %226 = vector.broadcast %cst_70 : f32 to vector<8x128xf32>
    %227 = arith.subf %226, %220 : vector<8x128xf32>
    %228 = arith.mulf %227, %225 : vector<8x128xf32>
    %229 = arith.mulf %220, %157 : vector<8x128xf32>
    %230 = arith.addf %228, %229 : vector<8x128xf32>
    %231 = arith.index_cast %c2_i32 : i32 to index
    %c0_71 = arith.constant 0 : index
    %c0_72 = arith.constant 0 : index
    %232 = vector.load %arg8[%231, %c0_71, %c0_72] : memref<8x8x128xf32, #tpu.memory_space<vmem>>, vector<1x8x128xf32>
    %233 = vector.shape_cast %232 : vector<1x8x128xf32> to vector<8x128xf32>
    %234 = vector.shape_cast %198 : vector<8x128xf32> to vector<1x8x128xf32>
    tpu.vector_store %arg8[%231, %c0_71, %c0_72], %234 {strides = array<i32>} : memref<8x8x128xf32, #tpu.memory_space<vmem>>, vector<1x8x128xf32>,
    %235 = arith.index_cast %166 : i32 to index
    %c0_73 = arith.constant 0 : index
    %c0_74 = arith.constant 0 : index
    %236 = vector.load %arg12[%235, %c0_73, %c0_74] : memref<8x8x128xf32, #tpu.memory_space<vmem>>, vector<1x8x128xf32>
    %237 = vector.shape_cast %236 : vector<1x8x128xf32> to vector<8x128xf32>
    %238 = vector.shape_cast %230 : vector<8x128xf32> to vector<1x8x128xf32>
    tpu.vector_store %arg12[%235, %c0_73, %c0_74], %238 {strides = array<i32>} : memref<8x8x128xf32, #tpu.memory_space<vmem>>, vector<1x8x128xf32>,
    %c3_i32 = arith.constant 3 : i32
    %c7_i32_75 = arith.constant 7 : i32
    %239 = arith.subi %c7_i32_75, %c3_i32 : i32
    %240 = arith.index_cast %c3_i32 : i32 to index
    %c0_76 = arith.constant 0 : index
    %c0_77 = arith.constant 0 : index
    %241 = vector.load %arg10[%240, %c0_76, %c0_77] : memref<8x8x384xf32, #tpu.memory_space<vmem>>, vector<1x8x384xf32>
    %242 = vector.shape_cast %241 : vector<1x8x384xf32> to vector<8x384xf32>
    %cst_78 = arith.constant dense<0.000000e+00> : vector<8x384xf32>
    %243 = tpu.matmul %198, %12, %cst_78 {dimension_numbers = #tpu.dot_dimension_numbers<[1], [0], [0], [1], [0, 0, 1, 1], [], []>} : vector<8x128xf32>, vector<128x384xf32>, vector<8x384xf32> -> vector<8x384xf32>
    %244 = vector.broadcast %13 : vector<1x384xf32> to vector<8x384xf32>
    %245 = arith.addf %243, %244 : vector<8x384xf32>
    %246 = vector.extract_strided_slice %242 {offsets = [0, 0], sizes = [8, 128], strides = [1, 1]} : vector<8x384xf32> to vector<8x128xf32>
    %247 = vector.extract_strided_slice %245 {offsets = [0, 0], sizes = [8, 128], strides = [1, 1]} : vector<8x384xf32> to vector<8x128xf32>
    %248 = arith.addf %246, %247 : vector<8x128xf32>
    %249 = arith.negf %248 : vector<8x128xf32>
    %250 = math.exp %249 : vector<8x128xf32>
    %cst_79 = arith.constant 1.000000e+00 : f32
    %251 = vector.broadcast %cst_79 : f32 to vector<8x128xf32>
    %252 = arith.addf %251, %250 : vector<8x128xf32>
    %253 = arith.divf %251, %252 : vector<8x128xf32>
    %254 = vector.extract_strided_slice %242 {offsets = [0, 128], sizes = [8, 128], strides = [1, 1]} : vector<8x384xf32> to vector<8x128xf32>
    %255 = vector.extract_strided_slice %245 {offsets = [0, 128], sizes = [8, 128], strides = [1, 1]} : vector<8x384xf32> to vector<8x128xf32>
    %256 = arith.addf %254, %255 : vector<8x128xf32>
    %257 = arith.negf %256 : vector<8x128xf32>
    %258 = math.exp %257 : vector<8x128xf32>
    %cst_80 = arith.constant 1.000000e+00 : f32
    %259 = vector.broadcast %cst_80 : f32 to vector<8x128xf32>
    %260 = arith.addf %259, %258 : vector<8x128xf32>
    %261 = arith.divf %259, %260 : vector<8x128xf32>
    %262 = vector.extract_strided_slice %242 {offsets = [0, 256], sizes = [8, 128], strides = [1, 1]} : vector<8x384xf32> to vector<8x128xf32>
    %263 = vector.extract_strided_slice %245 {offsets = [0, 256], sizes = [8, 128], strides = [1, 1]} : vector<8x384xf32> to vector<8x128xf32>
    %264 = arith.mulf %253, %263 : vector<8x128xf32>
    %265 = arith.addf %262, %264 : vector<8x128xf32>
    %266 = math.tanh %265 : vector<8x128xf32>
    %cst_81 = arith.constant 1.000000e+00 : f32
    %267 = vector.broadcast %cst_81 : f32 to vector<8x128xf32>
    %268 = arith.subf %267, %261 : vector<8x128xf32>
    %269 = arith.mulf %268, %266 : vector<8x128xf32>
    %270 = arith.mulf %261, %198 : vector<8x128xf32>
    %271 = arith.addf %269, %270 : vector<8x128xf32>
    %272 = arith.index_cast %239 : i32 to index
    %c0_82 = arith.constant 0 : index
    %c0_83 = arith.constant 0 : index
    %273 = vector.load %arg11[%272, %c0_82, %c0_83] : memref<8x8x384xf32, #tpu.memory_space<vmem>>, vector<1x8x384xf32>
    %274 = vector.shape_cast %273 : vector<1x8x384xf32> to vector<8x384xf32>
    %cst_84 = arith.constant dense<0.000000e+00> : vector<8x384xf32>
    %275 = tpu.matmul %230, %14, %cst_84 {dimension_numbers = #tpu.dot_dimension_numbers<[1], [0], [0], [1], [0, 0, 1, 1], [], []>} : vector<8x128xf32>, vector<128x384xf32>, vector<8x384xf32> -> vector<8x384xf32>
    %276 = vector.broadcast %15 : vector<1x384xf32> to vector<8x384xf32>
    %277 = arith.addf %275, %276 : vector<8x384xf32>
    %278 = vector.extract_strided_slice %274 {offsets = [0, 0], sizes = [8, 128], strides = [1, 1]} : vector<8x384xf32> to vector<8x128xf32>
    %279 = vector.extract_strided_slice %277 {offsets = [0, 0], sizes = [8, 128], strides = [1, 1]} : vector<8x384xf32> to vector<8x128xf32>
    %280 = arith.addf %278, %279 : vector<8x128xf32>
    %281 = arith.negf %280 : vector<8x128xf32>
    %282 = math.exp %281 : vector<8x128xf32>
    %cst_85 = arith.constant 1.000000e+00 : f32
    %283 = vector.broadcast %cst_85 : f32 to vector<8x128xf32>
    %284 = arith.addf %283, %282 : vector<8x128xf32>
    %285 = arith.divf %283, %284 : vector<8x128xf32>
    %286 = vector.extract_strided_slice %274 {offsets = [0, 128], sizes = [8, 128], strides = [1, 1]} : vector<8x384xf32> to vector<8x128xf32>
    %287 = vector.extract_strided_slice %277 {offsets = [0, 128], sizes = [8, 128], strides = [1, 1]} : vector<8x384xf32> to vector<8x128xf32>
    %288 = arith.addf %286, %287 : vector<8x128xf32>
    %289 = arith.negf %288 : vector<8x128xf32>
    %290 = math.exp %289 : vector<8x128xf32>
    %cst_86 = arith.constant 1.000000e+00 : f32
    %291 = vector.broadcast %cst_86 : f32 to vector<8x128xf32>
    %292 = arith.addf %291, %290 : vector<8x128xf32>
    %293 = arith.divf %291, %292 : vector<8x128xf32>
    %294 = vector.extract_strided_slice %274 {offsets = [0, 256], sizes = [8, 128], strides = [1, 1]} : vector<8x384xf32> to vector<8x128xf32>
    %295 = vector.extract_strided_slice %277 {offsets = [0, 256], sizes = [8, 128], strides = [1, 1]} : vector<8x384xf32> to vector<8x128xf32>
    %296 = arith.mulf %285, %295 : vector<8x128xf32>
    %297 = arith.addf %294, %296 : vector<8x128xf32>
    %298 = math.tanh %297 : vector<8x128xf32>
    %cst_87 = arith.constant 1.000000e+00 : f32
    %299 = vector.broadcast %cst_87 : f32 to vector<8x128xf32>
    %300 = arith.subf %299, %293 : vector<8x128xf32>
    %301 = arith.mulf %300, %298 : vector<8x128xf32>
    %302 = arith.mulf %293, %230 : vector<8x128xf32>
    %303 = arith.addf %301, %302 : vector<8x128xf32>
    %304 = arith.index_cast %c3_i32 : i32 to index
    %c0_88 = arith.constant 0 : index
    %c0_89 = arith.constant 0 : index
    %305 = vector.load %arg8[%304, %c0_88, %c0_89] : memref<8x8x128xf32, #tpu.memory_space<vmem>>, vector<1x8x128xf32>
    %306 = vector.shape_cast %305 : vector<1x8x128xf32> to vector<8x128xf32>
    %307 = vector.shape_cast %271 : vector<8x128xf32> to vector<1x8x128xf32>
    tpu.vector_store %arg8[%304, %c0_88, %c0_89], %307 {strides = array<i32>} : memref<8x8x128xf32, #tpu.memory_space<vmem>>, vector<1x8x128xf32>,
    %308 = arith.index_cast %239 : i32 to index
    %c0_90 = arith.constant 0 : index
    %c0_91 = arith.constant 0 : index
    %309 = vector.load %arg12[%308, %c0_90, %c0_91] : memref<8x8x128xf32, #tpu.memory_space<vmem>>, vector<1x8x128xf32>
    %310 = vector.shape_cast %309 : vector<1x8x128xf32> to vector<8x128xf32>
    %311 = vector.shape_cast %303 : vector<8x128xf32> to vector<1x8x128xf32>
    tpu.vector_store %arg12[%308, %c0_90, %c0_91], %311 {strides = array<i32>} : memref<8x8x128xf32, #tpu.memory_space<vmem>>, vector<1x8x128xf32>,
    %c4_i32 = arith.constant 4 : i32
    %c7_i32_92 = arith.constant 7 : i32
    %312 = arith.subi %c7_i32_92, %c4_i32 : i32
    %313 = arith.index_cast %c4_i32 : i32 to index
    %c0_93 = arith.constant 0 : index
    %c0_94 = arith.constant 0 : index
    %314 = vector.load %arg10[%313, %c0_93, %c0_94] : memref<8x8x384xf32, #tpu.memory_space<vmem>>, vector<1x8x384xf32>
    %315 = vector.shape_cast %314 : vector<1x8x384xf32> to vector<8x384xf32>
    %cst_95 = arith.constant dense<0.000000e+00> : vector<8x384xf32>
    %316 = tpu.matmul %271, %12, %cst_95 {dimension_numbers = #tpu.dot_dimension_numbers<[1], [0], [0], [1], [0, 0, 1, 1], [], []>} : vector<8x128xf32>, vector<128x384xf32>, vector<8x384xf32> -> vector<8x384xf32>
    %317 = vector.broadcast %13 : vector<1x384xf32> to vector<8x384xf32>
    %318 = arith.addf %316, %317 : vector<8x384xf32>
    %319 = vector.extract_strided_slice %315 {offsets = [0, 0], sizes = [8, 128], strides = [1, 1]} : vector<8x384xf32> to vector<8x128xf32>
    %320 = vector.extract_strided_slice %318 {offsets = [0, 0], sizes = [8, 128], strides = [1, 1]} : vector<8x384xf32> to vector<8x128xf32>
    %321 = arith.addf %319, %320 : vector<8x128xf32>
    %322 = arith.negf %321 : vector<8x128xf32>
    %323 = math.exp %322 : vector<8x128xf32>
    %cst_96 = arith.constant 1.000000e+00 : f32
    %324 = vector.broadcast %cst_96 : f32 to vector<8x128xf32>
    %325 = arith.addf %324, %323 : vector<8x128xf32>
    %326 = arith.divf %324, %325 : vector<8x128xf32>
    %327 = vector.extract_strided_slice %315 {offsets = [0, 128], sizes = [8, 128], strides = [1, 1]} : vector<8x384xf32> to vector<8x128xf32>
    %328 = vector.extract_strided_slice %318 {offsets = [0, 128], sizes = [8, 128], strides = [1, 1]} : vector<8x384xf32> to vector<8x128xf32>
    %329 = arith.addf %327, %328 : vector<8x128xf32>
    %330 = arith.negf %329 : vector<8x128xf32>
    %331 = math.exp %330 : vector<8x128xf32>
    %cst_97 = arith.constant 1.000000e+00 : f32
    %332 = vector.broadcast %cst_97 : f32 to vector<8x128xf32>
    %333 = arith.addf %332, %331 : vector<8x128xf32>
    %334 = arith.divf %332, %333 : vector<8x128xf32>
    %335 = vector.extract_strided_slice %315 {offsets = [0, 256], sizes = [8, 128], strides = [1, 1]} : vector<8x384xf32> to vector<8x128xf32>
    %336 = vector.extract_strided_slice %318 {offsets = [0, 256], sizes = [8, 128], strides = [1, 1]} : vector<8x384xf32> to vector<8x128xf32>
    %337 = arith.mulf %326, %336 : vector<8x128xf32>
    %338 = arith.addf %335, %337 : vector<8x128xf32>
    %339 = math.tanh %338 : vector<8x128xf32>
    %cst_98 = arith.constant 1.000000e+00 : f32
    %340 = vector.broadcast %cst_98 : f32 to vector<8x128xf32>
    %341 = arith.subf %340, %334 : vector<8x128xf32>
    %342 = arith.mulf %341, %339 : vector<8x128xf32>
    %343 = arith.mulf %334, %271 : vector<8x128xf32>
    %344 = arith.addf %342, %343 : vector<8x128xf32>
    %345 = arith.index_cast %312 : i32 to index
    %c0_99 = arith.constant 0 : index
    %c0_100 = arith.constant 0 : index
    %346 = vector.load %arg11[%345, %c0_99, %c0_100] : memref<8x8x384xf32, #tpu.memory_space<vmem>>, vector<1x8x384xf32>
    %347 = vector.shape_cast %346 : vector<1x8x384xf32> to vector<8x384xf32>
    %cst_101 = arith.constant dense<0.000000e+00> : vector<8x384xf32>
    %348 = tpu.matmul %303, %14, %cst_101 {dimension_numbers = #tpu.dot_dimension_numbers<[1], [0], [0], [1], [0, 0, 1, 1], [], []>} : vector<8x128xf32>, vector<128x384xf32>, vector<8x384xf32> -> vector<8x384xf32>
    %349 = vector.broadcast %15 : vector<1x384xf32> to vector<8x384xf32>
    %350 = arith.addf %348, %349 : vector<8x384xf32>
    %351 = vector.extract_strided_slice %347 {offsets = [0, 0], sizes = [8, 128], strides = [1, 1]} : vector<8x384xf32> to vector<8x128xf32>
    %352 = vector.extract_strided_slice %350 {offsets = [0, 0], sizes = [8, 128], strides = [1, 1]} : vector<8x384xf32> to vector<8x128xf32>
    %353 = arith.addf %351, %352 : vector<8x128xf32>
    %354 = arith.negf %353 : vector<8x128xf32>
    %355 = math.exp %354 : vector<8x128xf32>
    %cst_102 = arith.constant 1.000000e+00 : f32
    %356 = vector.broadcast %cst_102 : f32 to vector<8x128xf32>
    %357 = arith.addf %356, %355 : vector<8x128xf32>
    %358 = arith.divf %356, %357 : vector<8x128xf32>
    %359 = vector.extract_strided_slice %347 {offsets = [0, 128], sizes = [8, 128], strides = [1, 1]} : vector<8x384xf32> to vector<8x128xf32>
    %360 = vector.extract_strided_slice %350 {offsets = [0, 128], sizes = [8, 128], strides = [1, 1]} : vector<8x384xf32> to vector<8x128xf32>
    %361 = arith.addf %359, %360 : vector<8x128xf32>
    %362 = arith.negf %361 : vector<8x128xf32>
    %363 = math.exp %362 : vector<8x128xf32>
    %cst_103 = arith.constant 1.000000e+00 : f32
    %364 = vector.broadcast %cst_103 : f32 to vector<8x128xf32>
    %365 = arith.addf %364, %363 : vector<8x128xf32>
    %366 = arith.divf %364, %365 : vector<8x128xf32>
    %367 = vector.extract_strided_slice %347 {offsets = [0, 256], sizes = [8, 128], strides = [1, 1]} : vector<8x384xf32> to vector<8x128xf32>
    %368 = vector.extract_strided_slice %350 {offsets = [0, 256], sizes = [8, 128], strides = [1, 1]} : vector<8x384xf32> to vector<8x128xf32>
    %369 = arith.mulf %358, %368 : vector<8x128xf32>
    %370 = arith.addf %367, %369 : vector<8x128xf32>
    %371 = math.tanh %370 : vector<8x128xf32>
    %cst_104 = arith.constant 1.000000e+00 : f32
    %372 = vector.broadcast %cst_104 : f32 to vector<8x128xf32>
    %373 = arith.subf %372, %366 : vector<8x128xf32>
    %374 = arith.mulf %373, %371 : vector<8x128xf32>
    %375 = arith.mulf %366, %303 : vector<8x128xf32>
    %376 = arith.addf %374, %375 : vector<8x128xf32>
    %377 = arith.index_cast %c4_i32 : i32 to index
    %c0_105 = arith.constant 0 : index
    %c0_106 = arith.constant 0 : index
    %378 = vector.load %arg8[%377, %c0_105, %c0_106] : memref<8x8x128xf32, #tpu.memory_space<vmem>>, vector<1x8x128xf32>
    %379 = vector.shape_cast %378 : vector<1x8x128xf32> to vector<8x128xf32>
    %380 = vector.shape_cast %344 : vector<8x128xf32> to vector<1x8x128xf32>
    tpu.vector_store %arg8[%377, %c0_105, %c0_106], %380 {strides = array<i32>} : memref<8x8x128xf32, #tpu.memory_space<vmem>>, vector<1x8x128xf32>,
    %381 = arith.index_cast %312 : i32 to index
    %c0_107 = arith.constant 0 : index
    %c0_108 = arith.constant 0 : index
    %382 = vector.load %arg12[%381, %c0_107, %c0_108] : memref<8x8x128xf32, #tpu.memory_space<vmem>>, vector<1x8x128xf32>
    %383 = vector.shape_cast %382 : vector<1x8x128xf32> to vector<8x128xf32>
    %384 = vector.shape_cast %376 : vector<8x128xf32> to vector<1x8x128xf32>
    tpu.vector_store %arg12[%381, %c0_107, %c0_108], %384 {strides = array<i32>} : memref<8x8x128xf32, #tpu.memory_space<vmem>>, vector<1x8x128xf32>,
    %c5_i32 = arith.constant 5 : i32
    %c7_i32_109 = arith.constant 7 : i32
    %385 = arith.subi %c7_i32_109, %c5_i32 : i32
    %386 = arith.index_cast %c5_i32 : i32 to index
    %c0_110 = arith.constant 0 : index
    %c0_111 = arith.constant 0 : index
    %387 = vector.load %arg10[%386, %c0_110, %c0_111] : memref<8x8x384xf32, #tpu.memory_space<vmem>>, vector<1x8x384xf32>
    %388 = vector.shape_cast %387 : vector<1x8x384xf32> to vector<8x384xf32>
    %cst_112 = arith.constant dense<0.000000e+00> : vector<8x384xf32>
    %389 = tpu.matmul %344, %12, %cst_112 {dimension_numbers = #tpu.dot_dimension_numbers<[1], [0], [0], [1], [0, 0, 1, 1], [], []>} : vector<8x128xf32>, vector<128x384xf32>, vector<8x384xf32> -> vector<8x384xf32>
    %390 = vector.broadcast %13 : vector<1x384xf32> to vector<8x384xf32>
    %391 = arith.addf %389, %390 : vector<8x384xf32>
    %392 = vector.extract_strided_slice %388 {offsets = [0, 0], sizes = [8, 128], strides = [1, 1]} : vector<8x384xf32> to vector<8x128xf32>
    %393 = vector.extract_strided_slice %391 {offsets = [0, 0], sizes = [8, 128], strides = [1, 1]} : vector<8x384xf32> to vector<8x128xf32>
    %394 = arith.addf %392, %393 : vector<8x128xf32>
    %395 = arith.negf %394 : vector<8x128xf32>
    %396 = math.exp %395 : vector<8x128xf32>
    %cst_113 = arith.constant 1.000000e+00 : f32
    %397 = vector.broadcast %cst_113 : f32 to vector<8x128xf32>
    %398 = arith.addf %397, %396 : vector<8x128xf32>
    %399 = arith.divf %397, %398 : vector<8x128xf32>
    %400 = vector.extract_strided_slice %388 {offsets = [0, 128], sizes = [8, 128], strides = [1, 1]} : vector<8x384xf32> to vector<8x128xf32>
    %401 = vector.extract_strided_slice %391 {offsets = [0, 128], sizes = [8, 128], strides = [1, 1]} : vector<8x384xf32> to vector<8x128xf32>
    %402 = arith.addf %400, %401 : vector<8x128xf32>
    %403 = arith.negf %402 : vector<8x128xf32>
    %404 = math.exp %403 : vector<8x128xf32>
    %cst_114 = arith.constant 1.000000e+00 : f32
    %405 = vector.broadcast %cst_114 : f32 to vector<8x128xf32>
    %406 = arith.addf %405, %404 : vector<8x128xf32>
    %407 = arith.divf %405, %406 : vector<8x128xf32>
    %408 = vector.extract_strided_slice %388 {offsets = [0, 256], sizes = [8, 128], strides = [1, 1]} : vector<8x384xf32> to vector<8x128xf32>
    %409 = vector.extract_strided_slice %391 {offsets = [0, 256], sizes = [8, 128], strides = [1, 1]} : vector<8x384xf32> to vector<8x128xf32>
    %410 = arith.mulf %399, %409 : vector<8x128xf32>
    %411 = arith.addf %408, %410 : vector<8x128xf32>
    %412 = math.tanh %411 : vector<8x128xf32>
    %cst_115 = arith.constant 1.000000e+00 : f32
    %413 = vector.broadcast %cst_115 : f32 to vector<8x128xf32>
    %414 = arith.subf %413, %407 : vector<8x128xf32>
    %415 = arith.mulf %414, %412 : vector<8x128xf32>
    %416 = arith.mulf %407, %344 : vector<8x128xf32>
    %417 = arith.addf %415, %416 : vector<8x128xf32>
    %418 = arith.index_cast %385 : i32 to index
    %c0_116 = arith.constant 0 : index
    %c0_117 = arith.constant 0 : index
    %419 = vector.load %arg11[%418, %c0_116, %c0_117] : memref<8x8x384xf32, #tpu.memory_space<vmem>>, vector<1x8x384xf32>
    %420 = vector.shape_cast %419 : vector<1x8x384xf32> to vector<8x384xf32>
    %cst_118 = arith.constant dense<0.000000e+00> : vector<8x384xf32>
    %421 = tpu.matmul %376, %14, %cst_118 {dimension_numbers = #tpu.dot_dimension_numbers<[1], [0], [0], [1], [0, 0, 1, 1], [], []>} : vector<8x128xf32>, vector<128x384xf32>, vector<8x384xf32> -> vector<8x384xf32>
    %422 = vector.broadcast %15 : vector<1x384xf32> to vector<8x384xf32>
    %423 = arith.addf %421, %422 : vector<8x384xf32>
    %424 = vector.extract_strided_slice %420 {offsets = [0, 0], sizes = [8, 128], strides = [1, 1]} : vector<8x384xf32> to vector<8x128xf32>
    %425 = vector.extract_strided_slice %423 {offsets = [0, 0], sizes = [8, 128], strides = [1, 1]} : vector<8x384xf32> to vector<8x128xf32>
    %426 = arith.addf %424, %425 : vector<8x128xf32>
    %427 = arith.negf %426 : vector<8x128xf32>
    %428 = math.exp %427 : vector<8x128xf32>
    %cst_119 = arith.constant 1.000000e+00 : f32
    %429 = vector.broadcast %cst_119 : f32 to vector<8x128xf32>
    %430 = arith.addf %429, %428 : vector<8x128xf32>
    %431 = arith.divf %429, %430 : vector<8x128xf32>
    %432 = vector.extract_strided_slice %420 {offsets = [0, 128], sizes = [8, 128], strides = [1, 1]} : vector<8x384xf32> to vector<8x128xf32>
    %433 = vector.extract_strided_slice %423 {offsets = [0, 128], sizes = [8, 128], strides = [1, 1]} : vector<8x384xf32> to vector<8x128xf32>
    %434 = arith.addf %432, %433 : vector<8x128xf32>
    %435 = arith.negf %434 : vector<8x128xf32>
    %436 = math.exp %435 : vector<8x128xf32>
    %cst_120 = arith.constant 1.000000e+00 : f32
    %437 = vector.broadcast %cst_120 : f32 to vector<8x128xf32>
    %438 = arith.addf %437, %436 : vector<8x128xf32>
    %439 = arith.divf %437, %438 : vector<8x128xf32>
    %440 = vector.extract_strided_slice %420 {offsets = [0, 256], sizes = [8, 128], strides = [1, 1]} : vector<8x384xf32> to vector<8x128xf32>
    %441 = vector.extract_strided_slice %423 {offsets = [0, 256], sizes = [8, 128], strides = [1, 1]} : vector<8x384xf32> to vector<8x128xf32>
    %442 = arith.mulf %431, %441 : vector<8x128xf32>
    %443 = arith.addf %440, %442 : vector<8x128xf32>
    %444 = math.tanh %443 : vector<8x128xf32>
    %cst_121 = arith.constant 1.000000e+00 : f32
    %445 = vector.broadcast %cst_121 : f32 to vector<8x128xf32>
    %446 = arith.subf %445, %439 : vector<8x128xf32>
    %447 = arith.mulf %446, %444 : vector<8x128xf32>
    %448 = arith.mulf %439, %376 : vector<8x128xf32>
    %449 = arith.addf %447, %448 : vector<8x128xf32>
    %450 = arith.index_cast %c5_i32 : i32 to index
    %c0_122 = arith.constant 0 : index
    %c0_123 = arith.constant 0 : index
    %451 = vector.load %arg8[%450, %c0_122, %c0_123] : memref<8x8x128xf32, #tpu.memory_space<vmem>>, vector<1x8x128xf32>
    %452 = vector.shape_cast %451 : vector<1x8x128xf32> to vector<8x128xf32>
    %453 = vector.shape_cast %417 : vector<8x128xf32> to vector<1x8x128xf32>
    tpu.vector_store %arg8[%450, %c0_122, %c0_123], %453 {strides = array<i32>} : memref<8x8x128xf32, #tpu.memory_space<vmem>>, vector<1x8x128xf32>,
    %454 = arith.index_cast %385 : i32 to index
    %c0_124 = arith.constant 0 : index
    %c0_125 = arith.constant 0 : index
    %455 = vector.load %arg12[%454, %c0_124, %c0_125] : memref<8x8x128xf32, #tpu.memory_space<vmem>>, vector<1x8x128xf32>
    %456 = vector.shape_cast %455 : vector<1x8x128xf32> to vector<8x128xf32>
    %457 = vector.shape_cast %449 : vector<8x128xf32> to vector<1x8x128xf32>
    tpu.vector_store %arg12[%454, %c0_124, %c0_125], %457 {strides = array<i32>} : memref<8x8x128xf32, #tpu.memory_space<vmem>>, vector<1x8x128xf32>,
    %c6_i32 = arith.constant 6 : i32
    %c7_i32_126 = arith.constant 7 : i32
    %458 = arith.subi %c7_i32_126, %c6_i32 : i32
    %459 = arith.index_cast %c6_i32 : i32 to index
    %c0_127 = arith.constant 0 : index
    %c0_128 = arith.constant 0 : index
    %460 = vector.load %arg10[%459, %c0_127, %c0_128] : memref<8x8x384xf32, #tpu.memory_space<vmem>>, vector<1x8x384xf32>
    %461 = vector.shape_cast %460 : vector<1x8x384xf32> to vector<8x384xf32>
    %cst_129 = arith.constant dense<0.000000e+00> : vector<8x384xf32>
    %462 = tpu.matmul %417, %12, %cst_129 {dimension_numbers = #tpu.dot_dimension_numbers<[1], [0], [0], [1], [0, 0, 1, 1], [], []>} : vector<8x128xf32>, vector<128x384xf32>, vector<8x384xf32> -> vector<8x384xf32>
    %463 = vector.broadcast %13 : vector<1x384xf32> to vector<8x384xf32>
    %464 = arith.addf %462, %463 : vector<8x384xf32>
    %465 = vector.extract_strided_slice %461 {offsets = [0, 0], sizes = [8, 128], strides = [1, 1]} : vector<8x384xf32> to vector<8x128xf32>
    %466 = vector.extract_strided_slice %464 {offsets = [0, 0], sizes = [8, 128], strides = [1, 1]} : vector<8x384xf32> to vector<8x128xf32>
    %467 = arith.addf %465, %466 : vector<8x128xf32>
    %468 = arith.negf %467 : vector<8x128xf32>
    %469 = math.exp %468 : vector<8x128xf32>
    %cst_130 = arith.constant 1.000000e+00 : f32
    %470 = vector.broadcast %cst_130 : f32 to vector<8x128xf32>
    %471 = arith.addf %470, %469 : vector<8x128xf32>
    %472 = arith.divf %470, %471 : vector<8x128xf32>
    %473 = vector.extract_strided_slice %461 {offsets = [0, 128], sizes = [8, 128], strides = [1, 1]} : vector<8x384xf32> to vector<8x128xf32>
    %474 = vector.extract_strided_slice %464 {offsets = [0, 128], sizes = [8, 128], strides = [1, 1]} : vector<8x384xf32> to vector<8x128xf32>
    %475 = arith.addf %473, %474 : vector<8x128xf32>
    %476 = arith.negf %475 : vector<8x128xf32>
    %477 = math.exp %476 : vector<8x128xf32>
    %cst_131 = arith.constant 1.000000e+00 : f32
    %478 = vector.broadcast %cst_131 : f32 to vector<8x128xf32>
    %479 = arith.addf %478, %477 : vector<8x128xf32>
    %480 = arith.divf %478, %479 : vector<8x128xf32>
    %481 = vector.extract_strided_slice %461 {offsets = [0, 256], sizes = [8, 128], strides = [1, 1]} : vector<8x384xf32> to vector<8x128xf32>
    %482 = vector.extract_strided_slice %464 {offsets = [0, 256], sizes = [8, 128], strides = [1, 1]} : vector<8x384xf32> to vector<8x128xf32>
    %483 = arith.mulf %472, %482 : vector<8x128xf32>
    %484 = arith.addf %481, %483 : vector<8x128xf32>
    %485 = math.tanh %484 : vector<8x128xf32>
    %cst_132 = arith.constant 1.000000e+00 : f32
    %486 = vector.broadcast %cst_132 : f32 to vector<8x128xf32>
    %487 = arith.subf %486, %480 : vector<8x128xf32>
    %488 = arith.mulf %487, %485 : vector<8x128xf32>
    %489 = arith.mulf %480, %417 : vector<8x128xf32>
    %490 = arith.addf %488, %489 : vector<8x128xf32>
    %491 = arith.index_cast %458 : i32 to index
    %c0_133 = arith.constant 0 : index
    %c0_134 = arith.constant 0 : index
    %492 = vector.load %arg11[%491, %c0_133, %c0_134] : memref<8x8x384xf32, #tpu.memory_space<vmem>>, vector<1x8x384xf32>
    %493 = vector.shape_cast %492 : vector<1x8x384xf32> to vector<8x384xf32>
    %cst_135 = arith.constant dense<0.000000e+00> : vector<8x384xf32>
    %494 = tpu.matmul %449, %14, %cst_135 {dimension_numbers = #tpu.dot_dimension_numbers<[1], [0], [0], [1], [0, 0, 1, 1], [], []>} : vector<8x128xf32>, vector<128x384xf32>, vector<8x384xf32> -> vector<8x384xf32>
    %495 = vector.broadcast %15 : vector<1x384xf32> to vector<8x384xf32>
    %496 = arith.addf %494, %495 : vector<8x384xf32>
    %497 = vector.extract_strided_slice %493 {offsets = [0, 0], sizes = [8, 128], strides = [1, 1]} : vector<8x384xf32> to vector<8x128xf32>
    %498 = vector.extract_strided_slice %496 {offsets = [0, 0], sizes = [8, 128], strides = [1, 1]} : vector<8x384xf32> to vector<8x128xf32>
    %499 = arith.addf %497, %498 : vector<8x128xf32>
    %500 = arith.negf %499 : vector<8x128xf32>
    %501 = math.exp %500 : vector<8x128xf32>
    %cst_136 = arith.constant 1.000000e+00 : f32
    %502 = vector.broadcast %cst_136 : f32 to vector<8x128xf32>
    %503 = arith.addf %502, %501 : vector<8x128xf32>
    %504 = arith.divf %502, %503 : vector<8x128xf32>
    %505 = vector.extract_strided_slice %493 {offsets = [0, 128], sizes = [8, 128], strides = [1, 1]} : vector<8x384xf32> to vector<8x128xf32>
    %506 = vector.extract_strided_slice %496 {offsets = [0, 128], sizes = [8, 128], strides = [1, 1]} : vector<8x384xf32> to vector<8x128xf32>
    %507 = arith.addf %505, %506 : vector<8x128xf32>
    %508 = arith.negf %507 : vector<8x128xf32>
    %509 = math.exp %508 : vector<8x128xf32>
    %cst_137 = arith.constant 1.000000e+00 : f32
    %510 = vector.broadcast %cst_137 : f32 to vector<8x128xf32>
    %511 = arith.addf %510, %509 : vector<8x128xf32>
    %512 = arith.divf %510, %511 : vector<8x128xf32>
    %513 = vector.extract_strided_slice %493 {offsets = [0, 256], sizes = [8, 128], strides = [1, 1]} : vector<8x384xf32> to vector<8x128xf32>
    %514 = vector.extract_strided_slice %496 {offsets = [0, 256], sizes = [8, 128], strides = [1, 1]} : vector<8x384xf32> to vector<8x128xf32>
    %515 = arith.mulf %504, %514 : vector<8x128xf32>
    %516 = arith.addf %513, %515 : vector<8x128xf32>
    %517 = math.tanh %516 : vector<8x128xf32>
    %cst_138 = arith.constant 1.000000e+00 : f32
    %518 = vector.broadcast %cst_138 : f32 to vector<8x128xf32>
    %519 = arith.subf %518, %512 : vector<8x128xf32>
    %520 = arith.mulf %519, %517 : vector<8x128xf32>
    %521 = arith.mulf %512, %449 : vector<8x128xf32>
    %522 = arith.addf %520, %521 : vector<8x128xf32>
    %523 = arith.index_cast %c6_i32 : i32 to index
    %c0_139 = arith.constant 0 : index
    %c0_140 = arith.constant 0 : index
    %524 = vector.load %arg8[%523, %c0_139, %c0_140] : memref<8x8x128xf32, #tpu.memory_space<vmem>>, vector<1x8x128xf32>
    %525 = vector.shape_cast %524 : vector<1x8x128xf32> to vector<8x128xf32>
    %526 = vector.shape_cast %490 : vector<8x128xf32> to vector<1x8x128xf32>
    tpu.vector_store %arg8[%523, %c0_139, %c0_140], %526 {strides = array<i32>} : memref<8x8x128xf32, #tpu.memory_space<vmem>>, vector<1x8x128xf32>,
    %527 = arith.index_cast %458 : i32 to index
    %c0_141 = arith.constant 0 : index
    %c0_142 = arith.constant 0 : index
    %528 = vector.load %arg12[%527, %c0_141, %c0_142] : memref<8x8x128xf32, #tpu.memory_space<vmem>>, vector<1x8x128xf32>
    %529 = vector.shape_cast %528 : vector<1x8x128xf32> to vector<8x128xf32>
    %530 = vector.shape_cast %522 : vector<8x128xf32> to vector<1x8x128xf32>
    tpu.vector_store %arg12[%527, %c0_141, %c0_142], %530 {strides = array<i32>} : memref<8x8x128xf32, #tpu.memory_space<vmem>>, vector<1x8x128xf32>,
    %c7_i32_143 = arith.constant 7 : i32
    %c7_i32_144 = arith.constant 7 : i32
    %531 = arith.subi %c7_i32_144, %c7_i32_143 : i32
    %532 = arith.index_cast %c7_i32_143 : i32 to index
    %c0_145 = arith.constant 0 : index
    %c0_146 = arith.constant 0 : index
    %533 = vector.load %arg10[%532, %c0_145, %c0_146] : memref<8x8x384xf32, #tpu.memory_space<vmem>>, vector<1x8x384xf32>
    %534 = vector.shape_cast %533 : vector<1x8x384xf32> to vector<8x384xf32>
    %cst_147 = arith.constant dense<0.000000e+00> : vector<8x384xf32>
    %535 = tpu.matmul %490, %12, %cst_147 {dimension_numbers = #tpu.dot_dimension_numbers<[1], [0], [0], [1], [0, 0, 1, 1], [], []>} : vector<8x128xf32>, vector<128x384xf32>, vector<8x384xf32> -> vector<8x384xf32>
    %536 = vector.broadcast %13 : vector<1x384xf32> to vector<8x384xf32>
    %537 = arith.addf %535, %536 : vector<8x384xf32>
    %538 = vector.extract_strided_slice %534 {offsets = [0, 0], sizes = [8, 128], strides = [1, 1]} : vector<8x384xf32> to vector<8x128xf32>
    %539 = vector.extract_strided_slice %537 {offsets = [0, 0], sizes = [8, 128], strides = [1, 1]} : vector<8x384xf32> to vector<8x128xf32>
    %540 = arith.addf %538, %539 : vector<8x128xf32>
    %541 = arith.negf %540 : vector<8x128xf32>
    %542 = math.exp %541 : vector<8x128xf32>
    %cst_148 = arith.constant 1.000000e+00 : f32
    %543 = vector.broadcast %cst_148 : f32 to vector<8x128xf32>
    %544 = arith.addf %543, %542 : vector<8x128xf32>
    %545 = arith.divf %543, %544 : vector<8x128xf32>
    %546 = vector.extract_strided_slice %534 {offsets = [0, 128], sizes = [8, 128], strides = [1, 1]} : vector<8x384xf32> to vector<8x128xf32>
    %547 = vector.extract_strided_slice %537 {offsets = [0, 128], sizes = [8, 128], strides = [1, 1]} : vector<8x384xf32> to vector<8x128xf32>
    %548 = arith.addf %546, %547 : vector<8x128xf32>
    %549 = arith.negf %548 : vector<8x128xf32>
    %550 = math.exp %549 : vector<8x128xf32>
    %cst_149 = arith.constant 1.000000e+00 : f32
    %551 = vector.broadcast %cst_149 : f32 to vector<8x128xf32>
    %552 = arith.addf %551, %550 : vector<8x128xf32>
    %553 = arith.divf %551, %552 : vector<8x128xf32>
    %554 = vector.extract_strided_slice %534 {offsets = [0, 256], sizes = [8, 128], strides = [1, 1]} : vector<8x384xf32> to vector<8x128xf32>
    %555 = vector.extract_strided_slice %537 {offsets = [0, 256], sizes = [8, 128], strides = [1, 1]} : vector<8x384xf32> to vector<8x128xf32>
    %556 = arith.mulf %545, %555 : vector<8x128xf32>
    %557 = arith.addf %554, %556 : vector<8x128xf32>
    %558 = math.tanh %557 : vector<8x128xf32>
    %cst_150 = arith.constant 1.000000e+00 : f32
    %559 = vector.broadcast %cst_150 : f32 to vector<8x128xf32>
    %560 = arith.subf %559, %553 : vector<8x128xf32>
    %561 = arith.mulf %560, %558 : vector<8x128xf32>
    %562 = arith.mulf %553, %490 : vector<8x128xf32>
    %563 = arith.addf %561, %562 : vector<8x128xf32>
    %564 = arith.index_cast %531 : i32 to index
    %c0_151 = arith.constant 0 : index
    %c0_152 = arith.constant 0 : index
    %565 = vector.load %arg11[%564, %c0_151, %c0_152] : memref<8x8x384xf32, #tpu.memory_space<vmem>>, vector<1x8x384xf32>
    %566 = vector.shape_cast %565 : vector<1x8x384xf32> to vector<8x384xf32>
    %cst_153 = arith.constant dense<0.000000e+00> : vector<8x384xf32>
    %567 = tpu.matmul %522, %14, %cst_153 {dimension_numbers = #tpu.dot_dimension_numbers<[1], [0], [0], [1], [0, 0, 1, 1], [], []>} : vector<8x128xf32>, vector<128x384xf32>, vector<8x384xf32> -> vector<8x384xf32>
    %568 = vector.broadcast %15 : vector<1x384xf32> to vector<8x384xf32>
    %569 = arith.addf %567, %568 : vector<8x384xf32>
    %570 = vector.extract_strided_slice %566 {offsets = [0, 0], sizes = [8, 128], strides = [1, 1]} : vector<8x384xf32> to vector<8x128xf32>
    %571 = vector.extract_strided_slice %569 {offsets = [0, 0], sizes = [8, 128], strides = [1, 1]} : vector<8x384xf32> to vector<8x128xf32>
    %572 = arith.addf %570, %571 : vector<8x128xf32>
    %573 = arith.negf %572 : vector<8x128xf32>
    %574 = math.exp %573 : vector<8x128xf32>
    %cst_154 = arith.constant 1.000000e+00 : f32
    %575 = vector.broadcast %cst_154 : f32 to vector<8x128xf32>
    %576 = arith.addf %575, %574 : vector<8x128xf32>
    %577 = arith.divf %575, %576 : vector<8x128xf32>
    %578 = vector.extract_strided_slice %566 {offsets = [0, 128], sizes = [8, 128], strides = [1, 1]} : vector<8x384xf32> to vector<8x128xf32>
    %579 = vector.extract_strided_slice %569 {offsets = [0, 128], sizes = [8, 128], strides = [1, 1]} : vector<8x384xf32> to vector<8x128xf32>
    %580 = arith.addf %578, %579 : vector<8x128xf32>
    %581 = arith.negf %580 : vector<8x128xf32>
    %582 = math.exp %581 : vector<8x128xf32>
    %cst_155 = arith.constant 1.000000e+00 : f32
    %583 = vector.broadcast %cst_155 : f32 to vector<8x128xf32>
    %584 = arith.addf %583, %582 : vector<8x128xf32>
    %585 = arith.divf %583, %584 : vector<8x128xf32>
    %586 = vector.extract_strided_slice %566 {offsets = [0, 256], sizes = [8, 128], strides = [1, 1]} : vector<8x384xf32> to vector<8x128xf32>
    %587 = vector.extract_strided_slice %569 {offsets = [0, 256], sizes = [8, 128], strides = [1, 1]} : vector<8x384xf32> to vector<8x128xf32>
    %588 = arith.mulf %577, %587 : vector<8x128xf32>
    %589 = arith.addf %586, %588 : vector<8x128xf32>
    %590 = math.tanh %589 : vector<8x128xf32>
    %cst_156 = arith.constant 1.000000e+00 : f32
    %591 = vector.broadcast %cst_156 : f32 to vector<8x128xf32>
    %592 = arith.subf %591, %585 : vector<8x128xf32>
    %593 = arith.mulf %592, %590 : vector<8x128xf32>
    %594 = arith.mulf %585, %522 : vector<8x128xf32>
    %595 = arith.addf %593, %594 : vector<8x128xf32>
    %596 = arith.index_cast %c7_i32_143 : i32 to index
    %c0_157 = arith.constant 0 : index
    %c0_158 = arith.constant 0 : index
    %597 = vector.load %arg8[%596, %c0_157, %c0_158] : memref<8x8x128xf32, #tpu.memory_space<vmem>>, vector<1x8x128xf32>
    %598 = vector.shape_cast %597 : vector<1x8x128xf32> to vector<8x128xf32>
    %599 = vector.shape_cast %563 : vector<8x128xf32> to vector<1x8x128xf32>
    tpu.vector_store %arg8[%596, %c0_157, %c0_158], %599 {strides = array<i32>} : memref<8x8x128xf32, #tpu.memory_space<vmem>>, vector<1x8x128xf32>,
    %600 = arith.index_cast %531 : i32 to index
    %c0_159 = arith.constant 0 : index
    %c0_160 = arith.constant 0 : index
    %601 = vector.load %arg12[%600, %c0_159, %c0_160] : memref<8x8x128xf32, #tpu.memory_space<vmem>>, vector<1x8x128xf32>
    %602 = vector.shape_cast %601 : vector<1x8x128xf32> to vector<8x128xf32>
    %603 = vector.shape_cast %595 : vector<8x128xf32> to vector<1x8x128xf32>
    tpu.vector_store %arg12[%600, %c0_159, %c0_160], %603 {strides = array<i32>} : memref<8x8x128xf32, #tpu.memory_space<vmem>>, vector<1x8x128xf32>,
    %c8_i32 = arith.constant 8 : i32
    %c0_161 = arith.constant 0 : index
    %c0_162 = arith.constant 0 : index
    %c0_163 = arith.constant 0 : index
    %604 = vector.load %arg9[%c0_161, %c0_162, %c0_163] : memref<2x8x128xf32, #tpu.memory_space<vmem>>, vector<1x8x128xf32>
    %605 = vector.shape_cast %604 : vector<1x8x128xf32> to vector<8x128xf32>
    %606 = vector.shape_cast %563 : vector<8x128xf32> to vector<1x8x128xf32>
    tpu.vector_store %arg9[%c0_161, %c0_162, %c0_163], %606 {strides = array<i32>} : memref<2x8x128xf32, #tpu.memory_space<vmem>>, vector<1x8x128xf32>,
    %c1_164 = arith.constant 1 : index
    %c0_165 = arith.constant 0 : index
    %c0_166 = arith.constant 0 : index
    %607 = vector.load %arg9[%c1_164, %c0_165, %c0_166] : memref<2x8x128xf32, #tpu.memory_space<vmem>>, vector<1x8x128xf32>
    %608 = vector.shape_cast %607 : vector<1x8x128xf32> to vector<8x128xf32>
    %609 = vector.shape_cast %595 : vector<8x128xf32> to vector<1x8x128xf32>
    tpu.vector_store %arg9[%c1_164, %c0_165, %c0_166], %609 {strides = array<i32>} : memref<2x8x128xf32, #tpu.memory_space<vmem>>, vector<1x8x128xf32>,
    %c0_167 = arith.constant 0 : index
    %c0_168 = arith.constant 0 : index
    %c0_169 = arith.constant 0 : index
    %610 = vector.load %arg8[%c0_167, %c0_168, %c0_169] : memref<8x8x128xf32, #tpu.memory_space<vmem>>, vector<8x8x128xf32>
    %c0_170 = arith.constant 0 : index
    %c0_171 = arith.constant 0 : index
    %c0_172 = arith.constant 0 : index
    %611 = vector.load %arg12[%c0_170, %c0_171, %c0_172] : memref<8x8x128xf32, #tpu.memory_space<vmem>>, vector<8x8x128xf32>
    %612 = arith.addf %610, %611 : vector<8x8x128xf32>
    %c0_173 = arith.constant 0 : index
    %c0_174 = arith.constant 0 : index
    %c0_175 = arith.constant 0 : index
    %613 = vector.load %arg8[%c0_173, %c0_174, %c0_175] : memref<8x8x128xf32, #tpu.memory_space<vmem>>, vector<8x8x128xf32>
    tpu.vector_store %arg8[%c0_173, %c0_174, %c0_175], %612 {strides = array<i32>} : memref<8x8x128xf32, #tpu.memory_space<vmem>>, vector<8x8x128xf32>,
    return
  }
}

</mosaic_0001>

<bundles_post_ra>
// kernel: tpu_custom_call.1
= control target key start
LH: loop header
LB: loop body
LE: loop exit
PB: predicated region body
PF: predicated region fallthrough
CT: control target
= control target key end

     0   :  { %15 = vsyncpa [#allocation6], 0  ;;  %s6954_s0 = inlined_call_operand.hbm [shape: f32[8,8,128], index: 0, kind: input, shape index: {}]   ;;  %s6955_s1 = inlined_call_operand.hbm [shape: f32[128,768], index: 1, kind: input, shape index: {}]   ;;  %s6956_s2 = inlined_call_operand.vmem [shape: f32[1,768], index: 2, kind: input, shape index: {}]   ;;  %s6957_s3 = inlined_call_operand.hbm [shape: f32[128,384], index: 3, kind: input, shape index: {}]   ;;  %s6958_s4 = inlined_call_operand.vmem [shape: f32[1,384], index: 4, kind: input, shape index: {}]   ;;  %s6959_s5 = inlined_call_operand.hbm [shape: f32[128,384], index: 5, kind: input, shape index: {}]   ;;  %s6960_s6 = inlined_call_operand.vmem [shape: f32[1,384], index: 6, kind: input, shape index: {}]   ;;  %s6961_s7 = inlined_call_operand.hbm [shape: f32[2,8,128], index: 7, kind: input, shape index: {}, may-alias: {7,9}]   ;;  %s6962_s8 = inlined_call_operand.hbm [shape: f32[8,8,128], index: 8, kind: output, shape index: {0}]   ;;  %s6963_s9 = inlined_call_operand.hbm [shape: f32[2,8,128], index: 9, kind: output, shape index: {1}, may-alias: {7,9}]  }
   0x1   :  { %16 = vsyncpa [#allocation9], 0 }
   0x2   :  { %17 = vsyncpa [#allocation12], 0 }
   0x3   :  { %18 = vsyncpa [#allocation7], 0 }
   0x4   :  { %19 = vsyncpa [#allocation16], 0  ;;  %s5755_s30 = smov [#allocation8]   ;;  %s5591_s13 = scalar_lea.hbm %s6955_s1, 12288 }
   0x5   :  { %s37_s10 = sshll.u32 %s5755_s30, 4  ;;  %p5592_p0 = scmp.ne.s32.totalorder %s6955_s1, %s5591_s13  ;;  %s38_s10 = int_to_ptr.vmem [resolvable:$true] %s37_s10 }
   0x6   :  { %p5595_p1 = scmp.lt.u32.totalorder %s5591_s13, %s6955_s1 }
   0x8   :  { %p5597_p2 = pnand %p5595_p1, %p5592_p0 }
   0xa   :  { %5600 = shalt.err (!%p5597_p2)
}
   0xb   :  { %s5601_s18 = scalar_lea.vmem %s38_s10, 12288  ;;  %p5606_p4 = scmp.lt.s32.totalorder %s38_s10, %s38_s10 }
   0xc   :  { %p5602_p3 = scmp.ne.s32.totalorder %s38_s10, %s5601_s18  ;;  %p5607_p5 = scmp.lt.s32.totalorder %s5601_s18, %s5601_s18 }
   0xe   :  { %p5608_p6 = por %p5607_p5, %p5606_p4 }
  0x10   :  { %p5609_p7 = pnand %p5608_p6, %p5602_p3 }
  0x12   :  { %5612 = shalt.err (!%p5609_p7)
}
  0x13   :  { %s5756_s19 = smov 768   ;;  %s5757_s20 = smov 48  }
  0x14   :  { %43 = dma.hbm_to_vmem [thread:$0]  %s6955_s1, 12288, %s38_s10, [#allocation9], %s5756_s19, %s5756_s19, %s5757_s20  }
  0x15   :  { %s5758_s23 = smov [#allocation11]   ;;  %s5759_s25 = smov [#allocation5]  }
  0x16   :  { %s65_s24 = sshll.u32 %s5758_s23, 4  ;;  %s25_s26 = sshll.u32 %s5759_s25, 4  ;;  %s66_s24 = int_to_ptr.vmem [resolvable:$true] %s65_s24  ;;  %s26_s26 = int_to_ptr.vmem [resolvable:$true] %s25_s26 }
  0x17   :  { %s5613_s29 = scalar_lea.hbm %s6959_s5, 6144 }
  0x18   :  { %p5614_p8 = scmp.ne.s32.totalorder %s6959_s5, %s5613_s29  ;;  %p5617_p9 = scmp.lt.u32.totalorder %s5613_s29, %s6959_s5 }
  0x1a   :  { %p5619_p10 = pnand %p5617_p9, %p5614_p8 }
  0x1c   :  { %5622 = shalt.err (!%p5619_p10)
}
  0x1d   :  { %s5623_s1 = scalar_lea.vmem %s66_s24, 6144  ;;  %p5628_p12 = scmp.lt.s32.totalorder %s66_s24, %s66_s24 }
  0x1e   :  { %p5624_p11 = scmp.ne.s32.totalorder %s66_s24, %s5623_s1  ;;  %p5629_p13 = scmp.lt.s32.totalorder %s5623_s1, %s5623_s1 }
  0x20   :  { %p5630_p0 = por %p5629_p13, %p5628_p12 }
  0x22   :  { %p5631_p1 = pnand %p5630_p0, %p5624_p11 }
  0x24   :  { %5634 = shalt.err (!%p5631_p1)
}
  0x25   :  { %s5760_s10 = smov 384   ;;  %s5761_s14 = smov 24  }
  0x26   :  { %71 = dma.hbm_to_vmem [thread:$0]  %s6959_s5, 6144, %s66_s24, [#allocation12], %s5760_s10, %s5760_s10, %s5761_s14  }
  0x27   :  { %s5635_s19 = scalar_lea.hbm %s6954_s0, 1024 }
  0x28   :  { %p5636_p2 = scmp.ne.s32.totalorder %s6954_s0, %s5635_s19  ;;  %p5639_p3 = scmp.lt.u32.totalorder %s5635_s19, %s6954_s0 }
  0x2a   :  { %p5641_p4 = pnand %p5639_p3, %p5636_p2 }
  0x2c   :  { %5644 = shalt.err (!%p5641_p4)
}
  0x2d   :  { %s5645_s25 = scalar_lea.vmem %s26_s26, 1024  ;;  %p5650_p6 = scmp.lt.s32.totalorder %s26_s26, %s26_s26 }
  0x2e   :  { %p5646_p5 = scmp.ne.s32.totalorder %s26_s26, %s5645_s25  ;;  %p5651_p7 = scmp.lt.s32.totalorder %s5645_s25, %s5645_s25 }
  0x30   :  { %p5652_p8 = por %p5651_p7, %p5650_p6 }
  0x32   :  { %p5653_p9 = pnand %p5652_p8, %p5646_p5 }
  0x34   :  { %5656 = shalt.err (!%p5653_p9)
}
  0x35   :  { %s5762_s5 = smov 128   ;;  %s5763_s24 = smov 8  }
  0x36   :  { %31 = dma.hbm_to_vmem [thread:$0]  %s6954_s0, 1024, %s26_s26, [#allocation6], %s5762_s5, %s5762_s5, %s5763_s24  }
  0x37   :  { %s5764_s29 = smov [#allocation10]   ;;  %s5765_s11 = smov [#allocation13]  }
  0x38   :  { %s51_s30 = sshll.u32 %s5764_s29, 4  ;;  %s79_s12 = sshll.u32 %s5765_s11, 4  ;;  %s52_s30 = int_to_ptr.vmem [resolvable:$true] %s51_s30  ;;  %s80_s12 = int_to_ptr.vmem [resolvable:$true] %s79_s12 }
  0x39   :  { %s5657_s15 = scalar_lea.hbm %s6957_s3, 6144 }
  0x3a   :  { %p5658_p10 = scmp.ne.s32.totalorder %s6957_s3, %s5657_s15  ;;  %p5661_p11 = scmp.lt.u32.totalorder %s5657_s15, %s6957_s3 }
  0x3c   :  { %p5663_p12 = pnand %p5661_p11, %p5658_p10 }
  0x3e   :  { %5666 = shalt.err (!%p5663_p12)
}
  0x3f   :  { %s5667_s0 = scalar_lea.vmem %s52_s30, 6144  ;;  %p5672_p0 = scmp.lt.s32.totalorder %s52_s30, %s52_s30 }
  0x40   :  { %p5668_p13 = scmp.ne.s32.totalorder %s52_s30, %s5667_s0  ;;  %p5673_p1 = scmp.lt.s32.totalorder %s5667_s0, %s5667_s0 }
  0x42   :  { %p5674_p2 = por %p5673_p1, %p5672_p0 }
  0x44   :  { %p5675_p3 = pnand %p5674_p2, %p5668_p13 }
  0x46   :  { %5678 = shalt.err (!%p5675_p3)
}
  0x47   :  { %57 = dma.hbm_to_vmem [thread:$0]  %s6957_s3, 6144, %s52_s30, [#allocation9], %s5760_s10, %s5760_s10, %s5761_s14  }
  0x48   :  { %s5679_s23 = scalar_lea.hbm %s6961_s7, 256 }
  0x49   :  { %p5680_p4 = scmp.ne.s32.totalorder %s6961_s7, %s5679_s23  ;;  %p5683_p5 = scmp.lt.u32.totalorder %s5679_s23, %s6961_s7 }
  0x4b   :  { %p5685_p6 = pnand %p5683_p5, %p5680_p4 }
  0x4d   :  { %5688 = shalt.err (!%p5685_p6)
}
  0x4e   :  { %s5689_s11 = scalar_lea.vmem %s80_s12, 256  ;;  %p5694_p8 = scmp.lt.s32.totalorder %s80_s12, %s80_s12 }
  0x4f   :  { %p5690_p7 = scmp.ne.s32.totalorder %s80_s12, %s5689_s11  ;;  %p5695_p9 = scmp.lt.s32.totalorder %s5689_s11, %s5689_s11 }
  0x51   :  { %p5696_p10 = por %p5695_p9, %p5694_p8 }
  0x53   :  { %p5697_p11 = pnand %p5696_p10, %p5690_p7 }
  0x55   :  { %5700 = shalt.err (!%p5697_p11)
}
  0x56   :  { %85 = dma.hbm_to_vmem [thread:$0]  %s6961_s7, 256, %s80_s12, [#allocation12], %s5762_s5, %s5762_s5, %s5763_s24  }
  0x57   :  { %5745 = dma.done.wait [#allocation6], 1024  }
  0x58   :  { %5746 = vsyncadd [#allocation6], 4294966272 }
  0x59   :  { %5747 = dma.done.wait [#allocation9], 18432  }
  0x5a   :  { %5748 = vsyncadd [#allocation9], 4294948864 }
  0x5b   :  { %5749 = dma.done.wait [#allocation12], 6400  }
  0x5c   :  { %5750 = vsyncadd [#allocation12], 4294960896  ;;  %v6964_v0 = vmov 0.0   ;;  %v110_v1 = vld [vmem:[#allocation8 + $0x8] sm:$0xff]  ;;  %v116_v2 = vld [vmem:[#allocation8 + $0x38] sm:$0xff]  ;;  %vm5768_vm0 = vmmov 0  }
  0x5d   :  { %301 = vmatprep.mubr.f32.mxu0 %v6964_v0  ;;  %414 = vmatprep.mubr.f32.mxu1 %v6964_v0  ;;  %v112_v3 = vld [vmem:[#allocation8 + $0x18] sm:$0xff]  ;;  %v4375_v4 = vpack.c.bf16 %v116_v2, %v110_v1  ;;  %v118_v5 = vld [vmem:[#allocation8 + $0x48] sm:$0xff]  ;;  %v109_v6 = vld [vmem:[#allocation8] sm:$0xff]  ;;  %s5770_s1 = smov [#allocation14]  }
  0x5e   :  { %v115_v7 = vld [vmem:[#allocation8 + $0x30] sm:$0xff]  ;;  %v4407_v8 = vpack.c.bf16 %v118_v5, %v112_v3  ;;  %v117_v11 = vld [vmem:[#allocation8 + $0x40] sm:$0xff]  ;;  %v122_v12 = vld [vmem:[#allocation8 + $0x68] sm:$0xff]  ;;  %s3481_s15 = sshll.u32 %s5770_s1, 4  ;;  %s6917_s15 = int_to_ptr.vmem [resolvable:$true] %s3481_s15 }
  0x5f   :  { %v4377_v9 = vpack.c.bf16 %v115_v7, %v109_v6  ;;  %v111_v10 = vld [vmem:[#allocation8 + $0x10] sm:$0xff]  ;;  %4376 = vmatprep.subr.bf16.mxu0 %v4375_v4  ;;  %v128_v14 = vld [vmem:[#allocation8 + $0x98] sm:$0xff]  ;;  %v130_v16 = vld [vmem:[#allocation8 + $0xa8] sm:$0xff] }
  0x60   :  { %v4409_v13 = vpack.c.bf16 %v117_v11, %v111_v10  ;;  %v124_v15 = vld [vmem:[#allocation8 + $0x78] sm:$0xff]  ;;  %4408 = vmatprep.subr.bf16.mxu1 %v4407_v8  ;;  %v4379_v17 = vpack.c.bf16 %v128_v14, %v122_v12  ;;  %v121_v19 = vld [vmem:[#allocation8 + $0x60] sm:$0xff]  ;;  %v127_v20 = vld [vmem:[#allocation8 + $0x90] sm:$0xff] }
  0x61   :  { %4378 = vmatpush1.bf16.msra.mxu0 %v4377_v9  ;;  %v4411_v18 = vpack.c.bf16 %v130_v16, %v124_v15  ;;  %v123_v21 = vld [vmem:[#allocation8 + $0x70] sm:$0xff]  ;;  %v4381_v22 = vpack.c.bf16 %v127_v20, %v121_v19  ;;  %v129_v23 = vld [vmem:[#allocation8 + $0xa0] sm:$0xff]  ;;  %v134_v24 = vld [vmem:[#allocation8 + $0xc8] sm:$0xff] }
  0x62   :  { %4410 = vmatpush1.bf16.msra.mxu1 %v4409_v13  ;;  %v140_v25 = vld [vmem:[#allocation8 + $0xf8] sm:$0xff]  ;;  %4380 = vmatprep.subr.bf16.mxu0 %v4379_v17  ;;  %v4413_v26 = vpack.c.bf16 %v129_v23, %v123_v21  ;;  %v142_v29 = vld [vmem:[#allocation8 + $0x108] sm:$0xff]  ;;  %v133_v30 = vld [vmem:[#allocation8 + $0xc0] sm:$0xff] }
  0x63   :  { %4412 = vmatprep.subr.bf16.mxu1 %v4411_v18  ;;  %v4383_v27 = vpack.c.bf16 %v140_v25, %v134_v24  ;;  %v136_v28 = vld [vmem:[#allocation8 + $0xd8] sm:$0xff]  ;;  %v139_v32 = vld [vmem:[#allocation8 + $0xf0] sm:$0xff]  ;;  %v141_v34 = vld [vmem:[#allocation8 + $0x100] sm:$0xff] }
  0x64   :  { %v4415_v31 = vpack.c.bf16 %v142_v29, %v136_v28  ;;  %v135_v33 = vld [vmem:[#allocation8 + $0xd0] sm:$0xff]  ;;  %v4385_v35 = vpack.c.bf16 %v139_v32, %v133_v30  ;;  %v146_v36 = vld [vmem:[#allocation8 + $0x128] sm:$0xff]  ;;  %v152_v37 = vld [vmem:[#allocation8 + $0x158] sm:$0xff] }
  0x65   :  { %4382 = vmatpush1.bf16.msra.mxu0 %v4381_v22  ;;  %v148_v38 = vld [vmem:[#allocation8 + $0x138] sm:$0xff]  ;;  %v4417_v39 = vpack.c.bf16 %v141_v34, %v135_v33  ;;  %v4387_v40 = vpack.c.bf16 %v152_v37, %v146_v36  ;;  %v154_v41 = vld [vmem:[#allocation8 + $0x168] sm:$0xff]  ;;  %v145_v42 = vld [vmem:[#allocation8 + $0x120] sm:$0xff] }
  0x66   :  { %4414 = vmatpush1.bf16.msra.mxu1 %v4413_v26  ;;  %4384 = vmatprep.subr.bf16.mxu0 %v4383_v27  ;;  %v151_v43 = vld [vmem:[#allocation8 + $0x150] sm:$0xff]  ;;  %v4419_v44 = vpack.c.bf16 %v154_v41, %v148_v38  ;;  %v153_v46 = vld [vmem:[#allocation8 + $0x160] sm:$0xff]  ;;  %v158_v47 = vld [vmem:[#allocation8 + $0x188] sm:$0xff] }
  0x67   :  { %4416 = vmatprep.subr.bf16.mxu1 %v4415_v31  ;;  %v147_v45 = vld [vmem:[#allocation8 + $0x130] sm:$0xff]  ;;  %v164_v48 = vld [vmem:[#allocation8 + $0x1b8] sm:$0xff]  ;;  %v166_v50 = vld [vmem:[#allocation8 + $0x1c8] sm:$0xff]  ;;  %v4389_v51 = vpack.c.bf16 %v151_v43, %v145_v42 }
  0x68   :  { %v160_v49 = vld [vmem:[#allocation8 + $0x198] sm:$0xff]  ;;  %v4421_v52 = vpack.c.bf16 %v153_v46, %v147_v45  ;;  %v4391_v53 = vpack.c.bf16 %v164_v48, %v158_v47  ;;  %v157_v54 = vld [vmem:[#allocation8 + $0x180] sm:$0xff]  ;;  %v163_v55 = vld [vmem:[#allocation8 + $0x1b0] sm:$0xff]  ;;  %v6966_v48 = vmov 0.0|0.0  }
  0x69   :  { %4386 = vmatpush1.bf16.msra.mxu0 %v4385_v35  ;;  %v159_v56 = vld [vmem:[#allocation8 + $0x190] sm:$0xff]  ;;  %v4423_v57 = vpack.c.bf16 %v166_v50, %v160_v49  ;;  %v165_v58 = vld [vmem:[#allocation8 + $0x1c0] sm:$0xff]  ;;  %v170_v59 = vld [vmem:[#allocation8 + $0x1e8] sm:$0xff]  ;;  %v4393_v63 = vpack.c.bf16 %v163_v55, %v157_v54 }
  0x6a   :  { %4418 = vmatpush1.bf16.msra.mxu1 %v4417_v39  ;;  %4388 = vmatprep.subr.bf16.mxu0 %v4387_v40  ;;  %v176_v60 = vld [vmem:[#allocation8 + $0x218] sm:$0xff]  ;;  %v178_v62 = vld [vmem:[#allocation8 + $0x228] sm:$0xff]  ;;  %v4425_v1 = vpack.c.bf16 %v165_v58, %v159_v56  ;;  %v169_v3 = vld [vmem:[#allocation8 + $0x1e0] sm:$0xff] }
  0x6b   :  { %4420 = vmatprep.subr.bf16.mxu1 %v4419_v44  ;;  %v172_v61 = vld [vmem:[#allocation8 + $0x1f8] sm:$0xff]  ;;  %v4395_v2 = vpack.c.bf16 %v176_v60, %v170_v59  ;;  %v175_v4 = vld [vmem:[#allocation8 + $0x210] sm:$0xff]  ;;  %v177_v7 = vld [vmem:[#allocation8 + $0x220] sm:$0xff] }
  0x6c   :  { %v171_v5 = vld [vmem:[#allocation8 + $0x1f0] sm:$0xff]  ;;  %v4427_v6 = vpack.c.bf16 %v178_v62, %v172_v61  ;;  %v182_v8 = vld [vmem:[#allocation8 + $0x248] sm:$0xff]  ;;  %v188_v9 = vld [vmem:[#allocation8 + $0x278] sm:$0xff]  ;;  %v4397_v12 = vpack.c.bf16 %v175_v4, %v169_v3 }
  0x6d   :  { %4390 = vmatpush1.bf16.msra.mxu0 %v4389_v51  ;;  %v184_v10 = vld [vmem:[#allocation8 + $0x258] sm:$0xff]  ;;  %v190_v11 = vld [vmem:[#allocation8 + $0x288] sm:$0xff]  ;;  %v4429_v13 = vpack.c.bf16 %v177_v7, %v171_v5  ;;  %v4399_v14 = vpack.c.bf16 %v188_v9, %v182_v8  ;;  %v181_v15 = vld [vmem:[#allocation8 + $0x240] sm:$0xff] }
  0x6e   :  { %4422 = vmatpush1.bf16.msra.mxu1 %v4421_v52  ;;  %4392 = vmatprep.subr.bf16.mxu0 %v4391_v53  ;;  %v187_v16 = vld [vmem:[#allocation8 + $0x270] sm:$0xff]  ;;  %v4431_v18 = vpack.c.bf16 %v190_v11, %v184_v10  ;;  %v189_v19 = vld [vmem:[#allocation8 + $0x280] sm:$0xff]  ;;  %v194_v20 = vld [vmem:[#allocation8 + $0x2a8] sm:$0xff] }
  0x6f   :  { %4424 = vmatprep.subr.bf16.mxu1 %v4423_v57  ;;  %v183_v17 = vld [vmem:[#allocation8 + $0x250] sm:$0xff]  ;;  %v200_v21 = vld [vmem:[#allocation8 + $0x2d8] sm:$0xff]  ;;  %v202_v23 = vld [vmem:[#allocation8 + $0x2e8] sm:$0xff]  ;;  %v4401_v24 = vpack.c.bf16 %v187_v16, %v181_v15 }
  0x70   :  { %v196_v22 = vld [vmem:[#allocation8 + $0x2b8] sm:$0xff]  ;;  %v4433_v25 = vpack.c.bf16 %v189_v19, %v183_v17  ;;  %v4403_v26 = vpack.c.bf16 %v200_v21, %v194_v20  ;;  %v193_v27 = vld [vmem:[#allocation8 + $0x2a0] sm:$0xff]  ;;  %v199_v28 = vld [vmem:[#allocation8 + $0x2d0] sm:$0xff] }
  0x71   :  { %4394 = vmatpush1.bf16.msra.mxu0 %v4393_v63  ;;  %v195_v29 = vld [vmem:[#allocation8 + $0x2b0] sm:$0xff]  ;;  %v4435_v30 = vpack.c.bf16 %v202_v23, %v196_v22  ;;  %v201_v31 = vld [vmem:[#allocation8 + $0x2e0] sm:$0xff]  ;;  %v114_v32 = vld [vmem:[#allocation8 + $0x28] sm:$0xff]  ;;  %v4405_v34 = vpack.c.bf16 %v199_v28, %v193_v27 }
  0x72   :  { %4426 = vmatpush1.bf16.msra.mxu1 %v4425_v1  ;;  %4396 = vmatprep.subr.bf16.mxu0 %v4395_v2  ;;  %v120_v33 = vld [vmem:[#allocation8 + $0x58] sm:$0xff]  ;;  %v4437_v35 = vpack.c.bf16 %v201_v31, %v195_v29  ;;  %v113_v37 = vld [vmem:[#allocation8 + $0x20] sm:$0xff]  ;;  %v119_v38 = vld [vmem:[#allocation8 + $0x50] sm:$0xff] }
  0x73   :  { %4428 = vmatprep.subr.bf16.mxu1 %v4427_v6  ;;  %v4439_v36 = vpack.c.bf16 %v120_v33, %v114_v32  ;;  %v626_v39 = vld [vmem:[#allocation10 + $0x10] sm:$0xff]  ;;  %v629_v40 = vld [vmem:[#allocation10 + $0x28] sm:$0xff]  ;;  %v132_v42 = vld [vmem:[#allocation8 + $0xb8] sm:$0xff]  ;;  %v4441_v44 = vpack.c.bf16 %v119_v38, %v113_v37 }
  0x74   :  { %v126_v41 = vld [vmem:[#allocation8 + $0x88] sm:$0xff]  ;;  %v5895_v43 = vld [vmem:[#allocation5] sm:$0xff]  ;;  %v5897_v45 = vpack.c.bf16 %v629_v40, %v626_v39  ;;  %v131_v47 = vld [vmem:[#allocation8 + $0xb0] sm:$0xff] }
  0x75   :  { %4398 = vmatpush1.bf16.msra.mxu0 %v4397_v12  ;;  %v125_v46 = vld [vmem:[#allocation8 + $0x80] sm:$0xff]  ;;  %v4443_v49 = vpack.c.bf16 %v132_v42, %v126_v41  ;;  %v635_v51 = vld [vmem:[#allocation10 + $0x58] sm:$0xff]  ;;  %v138_v52 = vld [vmem:[#allocation8 + $0xe8] sm:$0xff] }
  0x76   :  { %4430 = vmatpush1.bf16.msra.mxu1 %v4429_v13  ;;  %4400 = vmatprep.subr.bf16.mxu0 %v4399_v14  ;;  %v632_v50 = vld [vmem:[#allocation10 + $0x40] sm:$0xff]  ;;  %v144_v53 = vld [vmem:[#allocation8 + $0x118] sm:$0xff]  ;;  %v5902_v54 = vld [vmem:[#allocation5 + $0x8] sm:$0xff]  ;;  %v4445_v55 = vpack.c.bf16 %v131_v47, %v125_v46 }
  0x77   :  { %4432 = vmatprep.subr.bf16.mxu1 %v4431_v18  ;;  %v5906_v56 = vpack.c.bf16 %v635_v51, %v632_v50  ;;  %v137_v57 = vld [vmem:[#allocation8 + $0xe0] sm:$0xff]  ;;  %v143_v58 = vld [vmem:[#allocation8 + $0x110] sm:$0xff]  ;;  %v4447_v59 = vpack.c.bf16 %v144_v53, %v138_v52  ;;  %v641_v61 = vld [vmem:[#allocation10 + $0x88] sm:$0xff] }
  0x78   :  { %v638_v60 = vld [vmem:[#allocation10 + $0x70] sm:$0xff]  ;;  %v150_v62 = vld [vmem:[#allocation8 + $0x148] sm:$0xff]  ;;  %v156_v63 = vld [vmem:[#allocation8 + $0x178] sm:$0xff]  ;;  %v4449_v2 = vpack.c.bf16 %v143_v58, %v137_v57 }
  0x79   :  { %4402 = vmatpush1.bf16.msra.mxu0 %v4401_v24  ;;  %v5912_v1 = vld [vmem:[#allocation5 + $0x10] sm:$0xff]  ;;  %v5916_v3 = vpack.c.bf16 %v641_v61, %v638_v60  ;;  %v149_v4 = vld [vmem:[#allocation8 + $0x140] sm:$0xff]  ;;  %v4451_v6 = vpack.c.bf16 %v156_v63, %v150_v62  ;;  %v647_v8 = vld [vmem:[#allocation10 + $0xb8] sm:$0xff] }
  0x7a   :  { %4434 = vmatpush1.bf16.msra.mxu1 %v4433_v25  ;;  %4404 = vmatprep.subr.bf16.mxu0 %v4403_v26  ;;  %v155_v5 = vld [vmem:[#allocation8 + $0x170] sm:$0xff]  ;;  %v644_v7 = vld [vmem:[#allocation10 + $0xa0] sm:$0xff]  ;;  %v162_v9 = vld [vmem:[#allocation8 + $0x1a8] sm:$0xff] }
  0x7b   :  { %4436 = vmatprep.subr.bf16.mxu1 %v4435_v30  ;;  %7014 = vst [vmem:[#allocation22_spill] sm:$0xff] %v5916_v3  ;;  %v168_v10 = vld [vmem:[#allocation8 + $0x1d8] sm:$0xff]  ;;  %v4453_v12 = vpack.c.bf16 %v155_v5, %v149_v4  ;;  %v5926_v13 = vpack.c.bf16 %v647_v8, %v644_v7  ;;  %v161_v14 = vld [vmem:[#allocation8 + $0x1a0] sm:$0xff]  ;;  %v167_v15 = vld [vmem:[#allocation8 + $0x1d0] sm:$0xff] }
  0x7c   :  { %v5922_v11 = vld [vmem:[#allocation5 + $0x18] sm:$0xff]  ;;  %v4455_v16 = vpack.c.bf16 %v168_v10, %v162_v9  ;;  %v650_v17 = vld [vmem:[#allocation10 + $0xd0] sm:$0xff]  ;;  %v653_v18 = vld [vmem:[#allocation10 + $0xe8] sm:$0xff]  ;;  %v4457_v22 = vpack.c.bf16 %v167_v15, %v161_v14 }
  0x7d   :  { %4406 = vmatpush1.bf16.msra.mxu0 %v4405_v34  ;;  %7015 = vst [vmem:[#allocation23_spill] sm:$0xff] %v5926_v13  ;;  %v174_v19 = vld [vmem:[#allocation8 + $0x208] sm:$0xff]  ;;  %v180_v20 = vld [vmem:[#allocation8 + $0x238] sm:$0xff]  ;;  %v5932_v21 = vld [vmem:[#allocation5 + $0x20] sm:$0xff]  ;;  %v5936_v23 = vpack.c.bf16 %v653_v18, %v650_v17 }
  0x7e   :  { %4438 = vmatpush1.bf16.msra.mxu1 %v4437_v35  ;;  %4440 = vmatprep.subr.bf16.mxu0 %v4439_v36  ;;  %v173_v24 = vld [vmem:[#allocation8 + $0x200] sm:$0xff]  ;;  %v179_v25 = vld [vmem:[#allocation8 + $0x230] sm:$0xff]  ;;  %v4459_v26 = vpack.c.bf16 %v180_v20, %v174_v19  ;;  %v659_v28 = vld [vmem:[#allocation10 + $0x118] sm:$0xff] }
  0x7f   :  { %4503 = vmatprep.subr.bf16.mxu1 %v6966_v48  ;;  %7016 = vst [vmem:[#allocation24_spill] sm:$0xff] %v5936_v23  ;;  %v656_v27 = vld [vmem:[#allocation10 + $0x100] sm:$0xff]  ;;  %v186_v29 = vld [vmem:[#allocation8 + $0x268] sm:$0xff]  ;;  %v192_v30 = vld [vmem:[#allocation8 + $0x298] sm:$0xff]  ;;  %v4461_v32 = vpack.c.bf16 %v179_v25, %v173_v24 }
  0x80   :  { %302 = vmatmul.mubr.f32.vlgmr.msra.gmra.mrb[0].mxu0 %v5895_v43  ;;  %v5942_v31 = vld [vmem:[#allocation5 + $0x28] sm:$0xff]  ;;  %v5946_v33 = vpack.c.bf16 %v659_v28, %v656_v27  ;;  %v185_v34 = vld [vmem:[#allocation8 + $0x260] sm:$0xff]  ;;  %v191_v35 = vld [vmem:[#allocation8 + $0x290] sm:$0xff]  ;;  %v4463_v36 = vpack.c.bf16 %v192_v30, %v186_v29 }
  0x81   :  { %415 = vmatmul.mubr.f32.vlgmr.msra.gmra.mrb[0].mxu1 %v5895_v43  ;;  %4442 = vmatpush1.bf16.msra.mxu0 %v4441_v44  ;;  %v662_v37 = vld [vmem:[#allocation10 + $0x130] sm:$0xff]  ;;  %v665_v38 = vld [vmem:[#allocation10 + $0x148] sm:$0xff]  ;;  %v204_v40 = vld [vmem:[#allocation8 + $0x2f8] sm:$0xff]  ;;  %v4465_v42 = vpack.c.bf16 %v191_v35, %v185_v34 }
  0x82   :  { %4505 = vmatpush3.bf16.msra.mxu1 %v5897_v45  ;;  %307 = vmatprep.mubr.f32.mxu0 %v6964_v0  ;;  %7017 = vst [vmem:[#allocation25_spill] sm:$0xff] %v5946_v33  ;;  %v198_v39 = vld [vmem:[#allocation8 + $0x2c8] sm:$0xff]  ;;  %v5952_v41 = vld [vmem:[#allocation5 + $0x30] sm:$0xff]  ;;  %v5956_v44 = vpack.c.bf16 %v665_v38, %v662_v37  ;;  %v197_v46 = vld [vmem:[#allocation8 + $0x2c0] sm:$0xff] }
  0x83   :  { %420 = vmatprep.mubr.f32.mxu1 %v6964_v0  ;;  %4444 = vmatprep.subr.bf16.mxu0 %v4443_v49  ;;  %v203_v47 = vld [vmem:[#allocation8 + $0x2f0] sm:$0xff]  ;;  %v4467_v49 = vpack.c.bf16 %v204_v40, %v198_v39  ;;  %v668_v50 = vld [vmem:[#allocation10 + $0x160] sm:$0xff]  ;;  %v671_v51 = vld [vmem:[#allocation10 + $0x178] sm:$0xff] }
  0x84   :  { %308 = vmatmul.mubr.f32.gmra.mrb[2].mxu0 %v5902_v54  ;;  %4506 = vmatprep.subr.bf16.mxu1 %v6966_v48  ;;  %7018 = vst [vmem:[#allocation26_spill] sm:$0xff] %v5956_v44  ;;  %v625_v52 = vld [vmem:[#allocation10 + $0x8] sm:$0xff]  ;;  %v628_v53 = vld [vmem:[#allocation10 + $0x20] sm:$0xff]  ;;  %v4469_v57 = vpack.c.bf16 %v203_v47, %v197_v46  ;;  %v5966_v60 = vpack.c.bf16 %v671_v51, %v668_v50  ;;  %v627_v62 = vld [vmem:[#allocation10 + $0x18] sm:$0xff] }
  0x85   :  { %421 = vmatmul.mubr.f32.gmra.mrb[2].mxu1 %v5902_v54  ;;  %4446 = vmatpush1.bf16.msra.mxu0 %v4445_v55  ;;  %v5962_v55 = vld [vmem:[#allocation5 + $0x38] sm:$0xff]  ;;  %v674_v58 = vld [vmem:[#allocation11 + $0x8] sm:$0xff]  ;;  %v624_v61 = vld [vmem:[#allocation10] sm:$0xff]  ;;  %v5969_v63 = vpack.c.bf16 %v628_v53, %v625_v52 }
  0x86   :  { %4508 = vmatpush3.bf16.msra.mxu1 %v5906_v56  ;;  %313 = vmatprep.mubr.f32.mxu0 %v6964_v0  ;;  %7019 = vst [vmem:[#allocation27_spill] sm:$0xff] %v5966_v60  ;;  %v676_v4 = vld [vmem:[#allocation11 + $0x18] sm:$0xff]  ;;  %v634_v7 = vld [vmem:[#allocation10 + $0x50] sm:$0xff]  ;;  %v5976_v10 = vpack.c.bf16 %v627_v62, %v624_v61  ;;  %v682_v20 = vld [vmem:[#allocation11 + $0x48] sm:$0xff] }
  0x87   :  { %426 = vmatprep.mubr.f32.mxu1 %v6964_v0  ;;  %4448 = vmatprep.subr.bf16.mxu0 %v4447_v59  ;;  %v677_v59 = vld [vmem:[#allocation11 + $0x20] sm:$0xff]  ;;  %v631_v5 = vld [vmem:[#allocation10 + $0x38] sm:$0xff]  ;;  %v683_v9 = vld [vmem:[#allocation11 + $0x50] sm:$0xff] }
  0x88   :  { %314 = vmatmul.mubr.f32.gmra.mrb[4].mxu0 %v5912_v1  ;;  %4509 = vmatprep.subr.bf16.mxu1 %v6966_v48  ;;  %v680_v8 = vld [vmem:[#allocation11 + $0x38] sm:$0xff]  ;;  %v630_v15 = vld [vmem:[#allocation10 + $0x30] sm:$0xff]  ;;  %v5987_v18 = vpack.c.bf16 %v634_v7, %v631_v5  ;;  %v640_v24 = vld [vmem:[#allocation10 + $0x80] sm:$0xff] }
  0x89   :  { %427 = vmatmul.mubr.f32.gmra.mrb[4].mxu1 %v5912_v1  ;;  %4450 = vmatpush1.bf16.msra.mxu0 %v4449_v2  ;;  %v673_v2 = vld [vmem:[#allocation11] sm:$0xff]  ;;  %v679_v17 = vld [vmem:[#allocation11 + $0x30] sm:$0xff]  ;;  %v5989_v19 = vpack.c.bf16 %v683_v9, %v680_v8  ;;  %v686_v25 = vld [vmem:[#allocation11 + $0x68] sm:$0xff] }
  0x8a   :  { %4511 = vmatpush3.bf16.msra.mxu1 %v5916_v3  ;;  %319 = vmatprep.mubr.f32.mxu0 %v6964_v0  ;;  %v5982_v14 = vpack.c.bf16 %v676_v4, %v673_v2  ;;  %v5999_v28 = vpack.c.bf16 %v682_v20, %v679_v17  ;;  %v636_v30 = vld [vmem:[#allocation10 + $0x60] sm:$0xff]  ;;  %v688_v35 = vld [vmem:[#allocation11 + $0x78] sm:$0xff]  ;;  %v646_v37 = vld [vmem:[#allocation10 + $0xb0] sm:$0xff] }
  0x8b   :  { %432 = vmatprep.mubr.f32.mxu1 %v6964_v0  ;;  %4452 = vmatprep.subr.bf16.mxu0 %v4451_v6  ;;  %v5973_v6 = vpack.c.bf16 %v677_v59, %v674_v58  ;;  %v692_v38 = vld [vmem:[#allocation11 + $0x98] sm:$0xff]  ;;  %v695_v39 = vld [vmem:[#allocation11 + $0xb0] sm:$0xff]  ;;  %v694_v51 = vld [vmem:[#allocation11 + $0xa8] sm:$0xff] }
  0x8c   :  { %320 = vmatmul.mubr.f32.gmra.mrb[6].mxu0 %v5922_v11  ;;  %4512 = vmatprep.subr.bf16.mxu1 %v6966_v48  ;;  %v642_v47 = vld [vmem:[#allocation10 + $0x90] sm:$0xff]  ;;  %v6020_v50 = vpack.c.bf16 %v695_v39, %v692_v38  ;;  %v649_v52 = vld [vmem:[#allocation10 + $0xc8] sm:$0xff]  ;;  %v652_v53 = vld [vmem:[#allocation10 + $0xe0] sm:$0xff] }
  0x8d   :  { %433 = vmatmul.mubr.f32.gmra.mrb[6].mxu1 %v5922_v11  ;;  %4454 = vmatpush1.bf16.msra.mxu0 %v4453_v12  ;;  %7020 = vst [vmem:[#allocation28_spill] sm:$0xff] %v5973_v6  ;;  %v5978_v12 = vld [vmem:[#allocation13] sm:$0xff]  ;;  %v6031_v62 = vpack.c.bf16 %v652_v53, %v649_v52  ;;  %v651_v4 = vld [vmem:[#allocation10 + $0xd8] sm:$0xff]  ;;  %v658_v9 = vld [vmem:[#allocation10 + $0x110] sm:$0xff] }
  0x8e   :  { %4514 = vmatpush3.bf16.msra.mxu1 %v5926_v13  ;;  %325 = vmatprep.mubr.f32.mxu0 %v6964_v0  ;;  %v701_v58 = vld [vmem:[#allocation11 + $0xe0] sm:$0xff]  ;;  %v700_v7 = vld [vmem:[#allocation11 + $0xd8] sm:$0xff]  ;;  %v670_v53 = vld [vmem:[#allocation10 + $0x170] sm:$0xff] }
  0x8f   :  { %438 = vmatprep.mubr.f32.mxu1 %v6964_v0  ;;  %4456 = vmatprep.subr.bf16.mxu0 %v4455_v16  ;;  %v633_v16 = vld [vmem:[#allocation10 + $0x48] sm:$0xff]  ;;  %7024 = vst [vmem:[#allocation32_spill] sm:$0xff] %v6031_v62  ;;  %v648_v2 = vld [vmem:[#allocation10 + $0xc0] sm:$0xff]  ;;  %v655_v8 = vld [vmem:[#allocation10 + $0xf8] sm:$0xff] }
  0x90   :  { %326 = vmatmul.mubr.f32.gmra.mrb[8].mxu0 %v5932_v21  ;;  %4515 = vmatprep.subr.bf16.mxu1 %v6966_v48  ;;  %v5995_v27 = vpack.c.bf16 %v633_v16, %v630_v15  ;;  %v697_v5 = vld [vmem:[#allocation11 + $0xc0] sm:$0xff]  ;;  %v704_v15 = vld [vmem:[#allocation11 + $0xf8] sm:$0xff]  ;;  %v707_v16 = vld [vmem:[#allocation11 + $0x110] sm:$0xff]  ;;  %v6039_v17 = vpack.c.bf16 %v651_v4, %v648_v2 }
  0x91   :  { %439 = vmatmul.mubr.f32.gmra.mrb[8].mxu1 %v5932_v21  ;;  %4458 = vmatpush1.bf16.msra.mxu0 %v4457_v22  ;;  %v637_v22 = vld [vmem:[#allocation10 + $0x68] sm:$0xff]  ;;  %v6043_v20 = vpack.c.bf16 %v700_v7, %v697_v5  ;;  %v667_v52 = vld [vmem:[#allocation10 + $0x158] sm:$0xff]  ;;  %v666_v7 = vld [vmem:[#allocation10 + $0x150] sm:$0xff] }
  0x92   :  { %4517 = vmatpush3.bf16.msra.mxu1 %v5936_v23  ;;  %331 = vmatprep.mubr.f32.mxu0 %v6964_v0  ;;  %v6001_v29 = vpack.c.bf16 %v640_v24, %v637_v22  ;;  %7025 = vst [vmem:[#allocation33_spill] sm:$0xff] %v6039_v17  ;;  %v6045_v22 = vpack.c.bf16 %v658_v9, %v655_v8  ;;  %v654_v24 = vld [vmem:[#allocation10 + $0xf0] sm:$0xff]  ;;  %v669_v8 = vld [vmem:[#allocation10 + $0x168] sm:$0xff] }
  0x93   :  { %444 = vmatprep.mubr.f32.mxu1 %v6964_v0  ;;  %4460 = vmatprep.subr.bf16.mxu0 %v4459_v26  ;;  %v689_v26 = vld [vmem:[#allocation11 + $0x80] sm:$0xff]  ;;  %v6073_v5 = vpack.c.bf16 %v670_v53, %v667_v52  ;;  %v715_v9 = vld [vmem:[#allocation11 + $0x150] sm:$0xff]  ;;  %v702_v53 = vld [vmem:[#allocation11 + $0xe8] sm:$0xff] }
  0x94   :  { %332 = vmatmul.mubr.f32.gmra.mrb[10].mxu0 %v5942_v31  ;;  %4518 = vmatprep.subr.bf16.mxu1 %v6966_v48  ;;  %v6005_v34 = vpack.c.bf16 %v689_v26, %v686_v25  ;;  %7026 = vst [vmem:[#allocation34_spill] sm:$0xff] %v6045_v22  ;;  %v657_v25 = vld [vmem:[#allocation10 + $0x108] sm:$0xff]  ;;  %v703_v26 = vld [vmem:[#allocation11 + $0xf0] sm:$0xff] }
  0x95   :  { %445 = vmatmul.mubr.f32.gmra.mrb[10].mxu1 %v5942_v31  ;;  %4462 = vmatpush1.bf16.msra.mxu0 %v4461_v32  ;;  %v685_v32 = vld [vmem:[#allocation11 + $0x60] sm:$0xff]  ;;  %7030 = vst [vmem:[#allocation38_spill] sm:$0xff] %v6073_v5  ;;  %v699_v52 = vld [vmem:[#allocation11 + $0xd0] sm:$0xff] }
  0x96   :  { %4520 = vmatpush3.bf16.msra.mxu1 %v5946_v33  ;;  %337 = vmatprep.mubr.f32.mxu0 %v6964_v0 }
  0x97   :  { %450 = vmatprep.mubr.f32.mxu1 %v6964_v0  ;;  %4464 = vmatprep.subr.bf16.mxu0 %v4463_v36  ;;  %v643_v36 = vld [vmem:[#allocation10 + $0x98] sm:$0xff] }
  0x98   :  { %338 = vmatmul.mubr.f32.gmra.mrb[12].mxu0 %v5952_v41  ;;  %4521 = vmatprep.subr.bf16.mxu1 %v6966_v48  ;;  %v6017_v46 = vpack.c.bf16 %v646_v37, %v643_v36  ;;  %v713_v36 = vld [vmem:[#allocation11 + $0x140] sm:$0xff]  ;;  %v6053_v37 = vpack.c.bf16 %v657_v25, %v654_v24  ;;  %v675_v25 = vld [vmem:[#allocation11 + $0x10] sm:$0xff] }
  0x99   :  { %451 = vmatmul.mubr.f32.gmra.mrb[12].mxu1 %v5952_v41  ;;  %4466 = vmatpush1.bf16.msra.mxu0 %v4465_v42  ;;  %v6015_v42 = vpack.c.bf16 %v688_v35, %v685_v32  ;;  %v664_v32 = vld [vmem:[#allocation10 + $0x140] sm:$0xff]  ;;  %v710_v35 = vld [vmem:[#allocation11 + $0x128] sm:$0xff] }
  0x9a   :  { %4523 = vmatpush3.bf16.msra.mxu1 %v5956_v44  ;;  %343 = vmatprep.mubr.f32.mxu0 %v6964_v0  ;;  %7022 = vst [vmem:[#allocation30_spill] sm:$0xff] %v6017_v46  ;;  %7027 = vst [vmem:[#allocation35_spill] sm:$0xff] %v6053_v37 }
  0x9b   :  { %456 = vmatprep.mubr.f32.mxu1 %v6964_v0  ;;  %4468 = vmatprep.subr.bf16.mxu0 %v4467_v49  ;;  %v691_v49 = vld [vmem:[#allocation11 + $0x90] sm:$0xff] }
  0x9c   :  { %344 = vmatmul.mubr.f32.gmra.mrb[14].mxu0 %v5962_v55  ;;  %4524 = vmatprep.subr.bf16.mxu1 %v6966_v48  ;;  %v6029_v61 = vpack.c.bf16 %v694_v51, %v691_v49  ;;  %v709_v49 = vld [vmem:[#allocation11 + $0x120] sm:$0xff]  ;;  %v712_v51 = vld [vmem:[#allocation11 + $0x138] sm:$0xff] }
  0x9d   :  { %457 = vmatmul.mubr.f32.gmra.mrb[14].mxu1 %v5962_v55  ;;  %4470 = vmatpush1.bf16.msra.mxu0 %v4469_v57  ;;  %v698_v57 = vld [vmem:[#allocation11 + $0xc8] sm:$0xff]  ;;  %v6071_v4 = vpack.c.bf16 %v712_v51, %v709_v49  ;;  %v696_v49 = vld [vmem:[#allocation11 + $0xb8] sm:$0xff] }
  0x9e   :  { %4526 = vmatpush3.bf16.msra.mxu1 %v5966_v60  ;;  %527 = vmatprep.mubr.f32.mxu0 %v6964_v0 }
  0x9f   :  { %4472 = vmatprep.subr.bf16.mxu0 %v5969_v63  ;;  %3847 = vmatprep.mubr.msk.f32.mxu1 %vm5768_vm0, %v6964_v0 }
  0xa0   :  { %528 = vmatmul.mubr.f32.vlgmr.msra.gmra.mrb[16].mxu0 %v5895_v43  ;;  %4528 = vmatprep.subr.bf16.mxu1 %v5973_v6  ;;  %v639_v43 = vld [vmem:[#allocation10 + $0x78] sm:$0xff] }
  0xa1   :  { %4474 = vmatpush1.bf16.msra.mxu0 %v5976_v10  ;;  %3848 = vmatmul.mubr.f32.vlgmr.msra.gmra.mrb[16].mxu1 %v5978_v12  ;;  %v6011_v40 = vpack.c.bf16 %v639_v43, %v636_v30  ;;  %v706_v30 = vld [vmem:[#allocation11 + $0x108] sm:$0xff] }
  0xa2   :  { %4530 = vmatpush1.bf16.msra.mxu1 %v5982_v14  ;;  %533 = vmatprep.mubr.f32.mxu0 %v6964_v0  ;;  %v661_v43 = vld [vmem:[#allocation10 + $0x128] sm:$0xff]  ;;  %v6057_v38 = vpack.c.bf16 %v706_v30, %v703_v26 }
  0xa3   :  { %4476 = vmatprep.subr.bf16.mxu0 %v5987_v18  ;;  %4532 = vmatprep.subr.bf16.mxu1 %v5989_v19  ;;  %7021 = vst [vmem:[#allocation29_spill] sm:$0xff] %v6011_v40  ;;  %v6059_v39 = vpack.c.bf16 %v664_v32, %v661_v43  ;;  %v678_v26 = vld [vmem:[#allocation11 + $0x28] sm:$0xff]  ;;  %v681_v43 = vld [vmem:[#allocation11 + $0x40] sm:$0xff]  ;;  %v684_v32 = vld [vmem:[#allocation11 + $0x58] sm:$0xff] }
  0xa4   :  { %534 = vmatmul.mubr.f32.gmra.mrb[18].mxu0 %v5902_v54  ;;  %990 = vmatprep.mubr.f32.mxu1 %v6964_v0  ;;  %v645_v54 = vld [vmem:[#allocation10 + $0xa8] sm:$0xff] }
  0xa5   :  { %4478 = vmatpush1.bf16.msra.mxu0 %v5995_v27  ;;  %539 = vmatprep.mubr.f32.mxu0 %v6964_v0  ;;  %v6025_v59 = vpack.c.bf16 %v645_v54, %v642_v47  ;;  %7028 = vst [vmem:[#allocation36_spill] sm:$0xff] %v6059_v39  ;;  %v660_v47 = vld [vmem:[#allocation10 + $0x120] sm:$0xff]  ;;  %v663_v54 = vld [vmem:[#allocation10 + $0x138] sm:$0xff]  ;;  %v6094_v30 = vld [vmem:[#allocation13 + $0x8] sm:$0xff] }
  0xa6   :  { %4534 = vmatpush1.bf16.msra.mxu1 %v5999_v28  ;;  %4480 = vmatprep.subr.bf16.mxu0 %v6001_v29  ;;  %v6067_v2 = vpack.c.bf16 %v663_v54, %v660_v47  ;;  %v693_v54 = vld [vmem:[#allocation11 + $0xa0] sm:$0xff] }
  0xa7   :  { %4536 = vmatprep.subr.bf16.mxu1 %v6005_v34  ;;  %7023 = vst [vmem:[#allocation31_spill] sm:$0xff] %v6025_v59  ;;  %v6117_v51 = vpack.c.bf16 %v696_v49, %v693_v54  ;;  %v6174_v49 = vld [vmem:[%s6956_s2] sm:$0x3f] }
  0xa8   :  { %540 = vmatmul.mubr.f32.gmra.mrb[20].mxu0 %v5912_v1  ;;  %v6034_v1 = vpack.c.bf16 %v701_v58, %v698_v57  ;;  %v716_v57 = vld [vmem:[#allocation11 + $0x158] sm:$0xff]  ;;  %v719_v58 = vld [vmem:[#allocation11 + $0x170] sm:$0xff]  ;;  %7029 = vst [vmem:[#allocation37_spill] sm:$0xff] %v6067_v2 }
  0xa9   :  { %4482 = vmatpush1.bf16.msra.mxu0 %v6011_v40  ;;  %545 = vmatprep.mubr.f32.mxu0 %v6964_v0 }
  0xaa   :  { %4538 = vmatpush1.bf16.msra.mxu1 %v6015_v42  ;;  %4484 = vmatprep.subr.bf16.mxu0 %v6017_v46 }
  0xab   :  { %4540 = vmatprep.subr.bf16.mxu1 %v6020_v50 }
  0xac   :  { %546 = vmatmul.mubr.f32.gmra.mrb[22].mxu0 %v5922_v11  ;;  %v6048_v11 = vpack.c.bf16 %v707_v16, %v704_v15  ;;  %v718_v15 = vld [vmem:[#allocation11 + $0x168] sm:$0xff]  ;;  %v6081_v16 = vpack.c.bf16 %v669_v8, %v666_v7  ;;  %v708_v7 = vld [vmem:[#allocation11 + $0x118] sm:$0xff] }
  0xad   :  { %4486 = vmatpush1.bf16.msra.mxu0 %v6025_v59  ;;  %551 = vmatprep.mubr.f32.mxu0 %v6964_v0  ;;  %v6085_v24 = vpack.c.bf16 %v718_v15, %v715_v9  ;;  %v711_v9 = vld [vmem:[#allocation11 + $0x130] sm:$0xff]  ;;  %v714_v15 = vld [vmem:[#allocation11 + $0x148] sm:$0xff] }
  0xae   :  { %4542 = vmatpush1.bf16.msra.mxu1 %v6029_v61  ;;  %4488 = vmatprep.subr.bf16.mxu0 %v6031_v62  ;;  %7031 = vst [vmem:[#allocation39_spill] sm:$0xff] %v6081_v16 }
  0xaf   :  { %4544 = vmatprep.subr.bf16.mxu1 %v6034_v1 }
  0xb0   :  { %552 = vmatmul.mubr.f32.gmra.mrb[24].mxu0 %v5932_v21  ;;  %v6062_v21 = vpack.c.bf16 %v713_v36, %v710_v35  ;;  %v687_v35 = vld [vmem:[#allocation11 + $0x70] sm:$0xff]  ;;  %v690_v36 = vld [vmem:[#allocation11 + $0x88] sm:$0xff] }
  0xb1   :  { %4490 = vmatpush1.bf16.msra.mxu0 %v6039_v17  ;;  %557 = vmatprep.mubr.f32.mxu0 %v6964_v0  ;;  %v6111_v47 = vpack.c.bf16 %v690_v36, %v687_v35  ;;  %v207_v35 = vlaneseq }
  0xb2   :  { %4546 = vmatpush1.bf16.msra.mxu1 %v6043_v20  ;;  %4492 = vmatprep.subr.bf16.mxu0 %v6045_v22 }
  0xb3   :  { %4548 = vmatprep.subr.bf16.mxu1 %v6048_v11  ;;  %v6168_v36 = vshrl.u32 %v207_v35, 7 }
  0xb4   :  { %558 = vmatmul.mubr.f32.gmra.mrb[26].mxu0 %v5942_v31  ;;  %v6076_v31 = vpack.c.bf16 %v719_v58, %v716_v57  ;;  %v6123_v57 = vpack.c.bf16 %v702_v53, %v699_v52  ;;  %v705_v58 = vld [vmem:[#allocation11 + $0x100] sm:$0xff] }
  0xb5   :  { %4494 = vmatpush1.bf16.msra.mxu0 %v6053_v37  ;;  %563 = vmatprep.mubr.f32.mxu0 %v6964_v0  ;;  %v6129_v8 = vpack.c.bf16 %v708_v7, %v705_v58  ;;  %v221_v54 = vsub.s32 3, %v6168_v36  ;;  %v6180_v53 = vsub.s32 2, %v6168_v36 }
  0xb6   :  { %4550 = vmatpush1.bf16.msra.mxu1 %v6057_v38  ;;  %4496 = vmatprep.subr.bf16.mxu0 %v6059_v39 }
  0xb7   :  { %4552 = vmatprep.subr.bf16.mxu1 %v6062_v21  ;;  %v6177_v52 = vrot.slane %v6174_v49, %v221_v54 }
  0xb8   :  { %564 = vmatmul.mubr.f32.gmra.mrb[28].mxu0 %v5952_v41  ;;  %v6091_v41 = vpack.c.bf16 %v678_v26, %v675_v25  ;;  %v6135_v25 = vpack.c.bf16 %v714_v15, %v711_v9  ;;  %v717_v26 = vld [vmem:[#allocation11 + $0x160] sm:$0xff]  ;;  %v6189_v15 = vrot.slane %v6174_v49, %v6180_v53 }
  0xb9   :  { %4498 = vmatpush1.bf16.msra.mxu0 %v6067_v2  ;;  %569 = vmatprep.mubr.f32.mxu0 %v6964_v0 }
  0xba   :  { %4554 = vmatpush1.bf16.msra.mxu1 %v6071_v4  ;;  %4500 = vmatprep.subr.bf16.mxu0 %v6073_v5 }
  0xbb   :  { %4556 = vmatprep.subr.bf16.mxu1 %v6076_v31 }
  0xbc   :  { %570 = vmatmul.mubr.f32.gmra.mrb[30].mxu0 %v5962_v55  ;;  %v6101_v55 = vpack.c.bf16 %v684_v32, %v681_v43  ;;  %v720_v43 = vld [vmem:[#allocation11 + $0x178] sm:$0xff] }
  0xbd   :  { %4502 = vmatpush1.bf16.msra.mxu0 %v6081_v16  ;;  %808 = vmatprep.mubr.f32.mxu0 %v6964_v0  ;;  %v6141_v32 = vpack.c.bf16 %v720_v43, %v717_v26 }
  0xbe   :  { %4558 = vmatpush1.bf16.msra.mxu1 %v6085_v24  ;;  %4559 = vmatprep.subr.bf16.mxu0 %v6966_v48 }
  0xbf   :  { %4615 = vmatprep.subr.bf16.mxu1 %v6966_v48 }
  0xc0   :  { %809 = vmatmul.mubr.f32.vlgmr.msra.gmra.mrb[0].mxu0 %v5978_v12 }
  0xc1   :  { %991 = vmatmul.mubr.f32.vlgmr.msra.gmra.mrb[18].mxu1 %v6094_v30  ;;  %4561 = vmatpush3.bf16.msra.mxu0 %v6091_v41 }
  0xc2   :  { %4562 = vmatprep.subr.bf16.mxu0 %v6966_v48  ;;  %3882 = vmatprep.mubr.msk.f32.mxu0 %vm5768_vm0, %v6964_v0 }
  0xc3   :  { %4617 = vmatpush3.bf16.msra.mxu1 %v5897_v45  ;;  %3917 = vmatprep.mubr.msk.f32.mxu1 %vm5768_vm0, %v6964_v0 }
  0xc4   :  { %4618 = vmatprep.subr.bf16.mxu1 %v6966_v48 }
  0xc5   :  { %4564 = vmatpush3.bf16.msra.mxu0 %v6101_v55 }
  0xc6   :  { %4565 = vmatprep.subr.bf16.mxu0 %v6966_v48 }
  0xc7   :  { %4620 = vmatpush3.bf16.msra.mxu1 %v5906_v56 }
  0xc8   :  { %4621 = vmatprep.subr.bf16.mxu1 %v6966_v48 }
  0xc9   :  { %4567 = vmatpush3.bf16.msra.mxu0 %v6111_v47 }
  0xca   :  { %4568 = vmatprep.subr.bf16.mxu0 %v6966_v48 }
  0xcb   :  { %4623 = vmatpush3.bf16.msra.mxu1 %v5916_v3 }
  0xcc   :  { %4624 = vmatprep.subr.bf16.mxu1 %v6966_v48 }
  0xcd   :  { %4570 = vmatpush3.bf16.msra.mxu0 %v6117_v51 }
  0xce   :  { %4571 = vmatprep.subr.bf16.mxu0 %v6966_v48 }
  0xcf   :  { %4626 = vmatpush3.bf16.msra.mxu1 %v5926_v13 }
  0xd0   :  { %4627 = vmatprep.subr.bf16.mxu1 %v6966_v48 }
  0xd1   :  { %4573 = vmatpush3.bf16.msra.mxu0 %v6123_v57 }
  0xd2   :  { %4574 = vmatprep.subr.bf16.mxu0 %v6966_v48 }
  0xd3   :  { %4629 = vmatpush3.bf16.msra.mxu1 %v5936_v23 }
  0xd4   :  { %4630 = vmatprep.subr.bf16.mxu1 %v6966_v48 }
  0xd5   :  { %4576 = vmatpush3.bf16.msra.mxu0 %v6129_v8 }
  0xd6   :  { %4577 = vmatprep.subr.bf16.mxu0 %v6966_v48 }
  0xd7   :  { %4632 = vmatpush3.bf16.msra.mxu1 %v5946_v33 }
  0xd8   :  { %4633 = vmatprep.subr.bf16.mxu1 %v6966_v48 }
  0xd9   :  { %4579 = vmatpush3.bf16.msra.mxu0 %v6135_v25 }
  0xda   :  { %4580 = vmatprep.subr.bf16.mxu0 %v6966_v48 }
  0xdb   :  { %4635 = vmatpush3.bf16.msra.mxu1 %v5956_v44 }
  0xdc   :  { %4636 = vmatprep.subr.bf16.mxu1 %v6966_v48 }
  0xdd   :  { %4582 = vmatpush3.bf16.msra.mxu0 %v6141_v32 }
  0xde   :  { %4584 = vmatprep.subr.bf16.mxu0 %v5969_v63 }
  0xdf   :  { %4638 = vmatpush3.bf16.msra.mxu1 %v5966_v60 }
  0xe0   :  { %3883 = vmatmul.mubr.f32.vlgmr.msra.gmra.mrb[32].mxu0 %v6094_v30  ;;  %4640 = vmatprep.subr.bf16.mxu1 %v5973_v6 }
  0xe1   :  { %4586 = vmatpush1.bf16.msra.mxu0 %v5976_v10  ;;  %1159 = vmatprep.mubr.f32.mxu0 %v6964_v0 }
  0xe2   :  { %4588 = vmatprep.subr.bf16.mxu0 %v5987_v18 }
  0xe5   :  { %4590 = vmatpush1.bf16.msra.mxu0 %v5995_v27 }
  0xe6   :  { %4592 = vmatprep.subr.bf16.mxu0 %v6001_v29 }
  0xe9   :  { %4594 = vmatpush1.bf16.msra.mxu0 %v6011_v40 }
  0xea   :  { %4596 = vmatprep.subr.bf16.mxu0 %v6017_v46 }
  0xed   :  { %4598 = vmatpush1.bf16.msra.mxu0 %v6025_v59 }
  0xee   :  { %4600 = vmatprep.subr.bf16.mxu0 %v6031_v62 }
  0xf1   :  { %4602 = vmatpush1.bf16.msra.mxu0 %v6039_v17 }
  0xf2   :  { %4604 = vmatprep.subr.bf16.mxu0 %v6045_v22 }
  0xf5   :  { %4606 = vmatpush1.bf16.msra.mxu0 %v6053_v37 }
  0xf6   :  { %4608 = vmatprep.subr.bf16.mxu0 %v6059_v39 }
  0xf9   :  { %4610 = vmatpush1.bf16.msra.mxu0 %v6067_v2 }
  0xfa   :  { %4612 = vmatprep.subr.bf16.mxu0 %v6073_v5 }
  0xfd   :  { %4614 = vmatpush1.bf16.msra.mxu0 %v6081_v16 }
  0xfe   :  { %4671 = vmatprep.subr.bf16.mxu0 %v6966_v48 }
 0x154   :  { %v6182_v58 = vpop.f32.mrb[0].mxu1 }
 0x155   :  { %v418_v7 = vpop.f32.mrb[1].mxu1 }
 0x156   :  { %v6185_v9 = vadd.f32 %v418_v7, %v6177_v52 }
 0x158   :  { %7032 = vst [vmem:[#allocation40_spill] sm:$0xff] %v6185_v9  ;;  %v422_v26 = vpop.f32.mrb[2].mxu1 }
 0x159   :  { %v6192_v43 = vadd.f32 %v422_v26, %v6189_v15  ;;  %v424_v35 = vpop.f32.mrb[3].mxu1 }
 0x15a   :  { %v6195_v54 = vadd.f32 %v424_v35, %v6177_v52 }
 0x15b   :  { %7033 = vst [vmem:[#allocation41_spill] sm:$0xff] %v6192_v43 }
 0x15c   :  { %7034 = vst [vmem:[#allocation42_spill] sm:$0xff] %v6195_v54  ;;  %v428_v0 = vpop.f32.mrb[4].mxu1 }
 0x15d   :  { %v6198_v48 = vadd.f32 %v428_v0, %v6189_v15  ;;  %v430_v6 = vpop.f32.mrb[5].mxu1 }
 0x15e   :  { %v6201_v7 = vadd.f32 %v430_v6, %v6177_v52 }
 0x15f   :  { %7035 = vst [vmem:[#allocation43_spill] sm:$0xff] %v6198_v48 }
 0x160   :  { %7036 = vst [vmem:[#allocation44_spill] sm:$0xff] %v6201_v7  ;;  %v434_v9 = vpop.f32.mrb[6].mxu1 }
 0x161   :  { %v6204_v60 = vadd.f32 %v434_v9, %v6189_v15  ;;  %v436_v16 = vpop.f32.mrb[7].mxu1 }
 0x162   :  { %v6207_v26 = vadd.f32 %v436_v16, %v6177_v52 }
 0x163   :  { %7037 = vst [vmem:[#allocation45_spill] sm:$0xff] %v6204_v60  ;;  %v225_v60 = vsub.s32 4, %v6168_v36 }
 0x164   :  { %7038 = vst [vmem:[#allocation46_spill] sm:$0xff] %v6207_v26  ;;  %v440_v43 = vpop.f32.mrb[8].mxu1  ;;  %v229_v26 = vsub.s32 5, %v6168_v36 }
 0x165   :  { %v6210_v35 = vadd.f32 %v440_v43, %v6189_v15  ;;  %v442_v54 = vpop.f32.mrb[9].mxu1 }
 0x166   :  { %v6213_v0 = vadd.f32 %v442_v54, %v6177_v52 }
 0x167   :  { %7039 = vst [vmem:[#allocation47_spill] sm:$0xff] %v6210_v35 }
 0x168   :  { %7040 = vst [vmem:[#allocation48_spill] sm:$0xff] %v6213_v0  ;;  %v446_v48 = vpop.f32.mrb[10].mxu1  ;;  %v226_v0 = vrot.slane %v6174_v49, %v225_v60 }
 0x169   :  { %v6216_v6 = vadd.f32 %v446_v48, %v6189_v15  ;;  %v448_v7 = vpop.f32.mrb[11].mxu1 }
 0x16a   :  { %v6219_v9 = vadd.f32 %v448_v7, %v6177_v52 }
 0x16b   :  { %7041 = vst [vmem:[#allocation49_spill] sm:$0xff] %v6216_v6  ;;  %v6231_v6 = vrot.slane %v6174_v49, %v229_v26 }
 0x16c   :  { %7042 = vst [vmem:[#allocation50_spill] sm:$0xff] %v6219_v9  ;;  %v452_v16 = vpop.f32.mrb[12].mxu1 }
 0x16d   :  { %v6224_v43 = vadd.f32 %v452_v16, %v6189_v15  ;;  %v454_v35 = vpop.f32.mrb[13].mxu1 }
 0x16e   :  { %v6227_v54 = vadd.f32 %v454_v35, %v6177_v52 }
 0x16f   :  { %7043 = vst [vmem:[#allocation51_spill] sm:$0xff] %v6224_v43 }
 0x170   :  { %7044 = vst [vmem:[#allocation52_spill] sm:$0xff] %v6227_v54  ;;  %v458_v48 = vpop.f32.mrb[14].mxu1 }
 0x171   :  { %v6234_v7 = vadd.f32 %v458_v48, %v6189_v15  ;;  %v460_v9 = vpop.f32.mrb[15].mxu1 }
 0x172   :  { %v461_v13 = vadd.f32 %v460_v9, %v6177_v52 }
 0x173   :  { %7045 = vst [vmem:[#allocation53_spill] sm:$0xff] %v6234_v7  ;;  %v529_v5 = vpop.f32.mrb[16].mxu0 }
 0x174   :  { %v6236_v44 = vadd.f32 %v529_v5, %v226_v0  ;;  %v531_v2 = vpop.f32.mrb[17].mxu0  ;;  %v6238_v16 = vpop.f32.mrb[16].mxu1 }
 0x175   :  { %v6241_v43 = vadd.f32 %v531_v2, %v6231_v6  ;;  %v3849_v35 = vpop.f32.mrb[17].mxu1 }
 0x176   :  { %7046 = vst [vmem:[#allocation54_spill] sm:$0xff] %v6236_v44 }
 0x177   :  { %7047 = vst [vmem:[#allocation55_spill] sm:$0xff] %v6241_v43  ;;  %v535_v54 = vpop.f32.mrb[18].mxu0 }
 0x178   :  { %v6243_v60 = vadd.f32 %v535_v54, %v226_v0  ;;  %v537_v39 = vpop.f32.mrb[19].mxu0 }
 0x179   :  { %v6246_v26 = vadd.f32 %v537_v39, %v6231_v6 }
 0x17a   :  { %7048 = vst [vmem:[#allocation56_spill] sm:$0xff] %v6243_v60 }
 0x17b   :  { %7049 = vst [vmem:[#allocation57_spill] sm:$0xff] %v6246_v26  ;;  %v541_v48 = vpop.f32.mrb[20].mxu0 }
 0x17c   :  { %v6248_v7 = vadd.f32 %v541_v48, %v226_v0  ;;  %v543_v33 = vpop.f32.mrb[21].mxu0 }
 0x17d   :  { %v6251_v5 = vadd.f32 %v543_v33, %v6231_v6  ;;  %v209_v33 = vsub.s32 0, %v6168_v36 }
 0x17e   :  { %7050 = vst [vmem:[#allocation58_spill] sm:$0xff] %v6248_v7 }
 0x17f   :  { %7051 = vst [vmem:[#allocation59_spill] sm:$0xff] %v6251_v5  ;;  %v547_v44 = vpop.f32.mrb[22].mxu0 }
 0x180   :  { %v6253_v37 = vadd.f32 %v547_v44, %v226_v0  ;;  %v549_v2 = vpop.f32.mrb[23].mxu0 }
 0x181   :  { %v6256_v35 = vadd.f32 %v549_v2, %v6231_v6  ;;  %v672_v2 = vld [vmem:[%s6958_s4] sm:$0x7]  ;;  %s5769_s4 = smov [#allocation15]  }
 0x182   :  { %7052 = vst [vmem:[#allocation60_spill] sm:$0xff] %v6253_v37  ;;  %v210_v37 = vrot.slane %v6174_v49, %v209_v33 }
 0x183   :  { %7053 = vst [vmem:[#allocation61_spill] sm:$0xff] %v6256_v35  ;;  %v553_v54 = vpop.f32.mrb[24].mxu0 }
 0x184   :  { %v6258_v43 = vadd.f32 %v553_v54, %v226_v0  ;;  %v555_v60 = vpop.f32.mrb[25].mxu0  ;;  %v213_v54 = vsub.s32 1, %v6168_v36 }
 0x185   :  { %v6261_v39 = vadd.f32 %v555_v60, %v6231_v6 }
 0x186   :  { %7054 = vst [vmem:[#allocation62_spill] sm:$0xff] %v6258_v43 }
 0x187   :  { %7055 = vst [vmem:[#allocation63_spill] sm:$0xff] %v6261_v39  ;;  %v559_v48 = vpop.f32.mrb[26].mxu0 }
 0x188   :  { %v6263_v26 = vadd.f32 %v559_v48, %v226_v0  ;;  %v561_v7 = vpop.f32.mrb[27].mxu0  ;;  %v732_v48 = vrot.slane %v672_v2, %v209_v33 }
 0x189   :  { %v6267_v44 = vadd.f32 %v561_v7, %v6231_v6  ;;  %v721_v7 = vld [vmem:[%s6960_s6] sm:$0x7]  ;;  %s3493_s6 = sshll.u32 %s5769_s4, 4  ;;  %s3494_s6 = int_to_ptr.vmem [resolvable:$true] %s3493_s6 }
 0x18a   :  { %7056 = vst [vmem:[#allocation64_spill] sm:$0xff] %v6263_v26  ;;  %v736_v26 = vrot.slane %v672_v2, %v213_v54  ;;  %v6283_v23 = vadd.f32 %v732_v48, %v210_v37  ;;  %v6285_v36 = vrot.slane %v721_v7, %v209_v33  ;;  %s5701_s16 = scalar_lea.vmem %s3494_s6, 256  ;;  %p5706_p13 = scmp.lt.s32.totalorder %s3494_s6, %s3494_s6 }
 0x18b   :  { %7057 = vst [vmem:[#allocation65_spill] sm:$0xff] %v6267_v44  ;;  %v565_v5 = vpop.f32.mrb[28].mxu0  ;;  %v214_v44 = vrot.slane %v6174_v49, %v213_v54  ;;  %p5702_p12 = scmp.ne.s32.totalorder %s3494_s6, %s5701_s16  ;;  %p5707_p0 = scmp.lt.s32.totalorder %s5701_s16, %s5701_s16 }
 0x18c   :  { %v6273_v35 = vadd.f32 %v565_v5, %v226_v0  ;;  %v567_v60 = vpop.f32.mrb[29].mxu0  ;;  %7060 = vst [vmem:[#allocation68_spill] sm:$0xff] %v6283_v23  ;;  %v6287_v5 = vrot.slane %v721_v7, %v213_v54 }
 0x18d   :  { %v6277_v39 = vadd.f32 %v567_v60, %v6231_v6  ;;  %v6289_v17 = vadd.f32 %v736_v26, %v214_v44  ;;  %p5708_p1 = por %p5707_p0, %p5706_p13 }
 0x18e   :  { %7058 = vst [vmem:[#allocation66_spill] sm:$0xff] %v6273_v35 }
 0x18f   :  { %7059 = vst [vmem:[#allocation67_spill] sm:$0xff] %v6277_v39  ;;  %v571_v43 = vpop.f32.mrb[30].mxu0  ;;  %7061 = vst [vmem:[#allocation69_spill] sm:$0xff] %v6289_v17  ;;  %p5709_p2 = pnand %p5708_p1, %p5702_p12 }
 0x190   :  { %v573_v22 = vpop.f32.mrb[31].mxu0  ;;  %v572_v46 = vadd.f32 %v571_v43, %v226_v0  ;;  %v6297_v43 = vrot.slane %v672_v2, %v6180_v53 }
 0x192   :  { %7062 = vst [vmem:[#allocation70_spill] sm:$0xff] %v6297_v43 }
 0x193   :  { %v810_v35 = vpop.f32.mrb[0].mxu0 }
 0x194   :  { %v5368_v60 = vadd.f32 %v6283_v23, %v810_v35  ;;  %v992_v39 = vpop.f32.mrb[18].mxu1  ;;  %v812_v62 = vpop.f32.mrb[1].mxu0 }
 0x195   :  { %v993_v59 = vadd.f32 %v992_v39, %v6285_v36  ;;  %v994_v49 = vpop.f32.mrb[19].mxu1  ;;  %v5370_v54 = vadd.f32 %v6289_v17, %v812_v62  ;;  %v417_v62 = vadd.f32 %v6182_v58, %v6189_v15 }
 0x196   :  { %v3511_v3 = vmul.f32 -1.442695, %v5368_v60  ;;  %v995_v37 = vadd.f32 %v994_v49, %v6287_v5 }
 0x197   :  { %v1067_v33 = vadd.f32 %v993_v59, %v461_v13  ;;  %v3512_v44 = vmul.f32 -1.442695, %v5370_v54  ;;  %v574_v54 = vadd.f32 %v573_v22, %v6231_v6 }
 0x198   :  { %5431 = vpow2.f32 %v3511_v3  ;;  %v1074_v48 = vadd.f32 %v995_v37, %v572_v46  ;;  %v882_v3 = vadd.f32 %v6238_v16, %v6297_v43 }
 0x199   :  { %v3513_v26 = vmul.f32 -1.442695, %v1067_v33 }
 0x19a   :  { %v3514_v35 = vmul.f32 -1.442695, %v1074_v48 }
 0x19b   :  { %5433 = vpow2.f32 %v3513_v26 }
 0x19c   :  { %5435 = vpow2.f32 %v3512_v44 }
 0x19d   :  { %5437 = vpow2.f32 %v3514_v35 }
 0x1a2   :  { %v5432_v23 = vpop.eup %5431 }
 0x1a3   :  { %v889_v40 = vadd.f32 1.0, %v5432_v23  ;;  %v6304_v23 = vrot.slane %v721_v7, %v6180_v53 }
 0x1a5   :  { %v5434_v52 = vpop.eup %5433  ;;  %5439 = vrcp.f32 %v889_v40 }
 0x1a6   :  { %v1071_v9 = vadd.f32 1.0, %v5434_v52  ;;  %v5436_v0 = vpop.eup %5435  ;;  %v7063_v52 = vmov 0.0|0.0  }
 0x1a7   :  { %v896_v13 = vadd.f32 1.0, %v5436_v0  ;;  %v5438_v59 = vpop.eup %5437  ;;  %v7064_v0 = vmov 0.0  }
 0x1a8   :  { %5441 = vrcp.f32 %v1071_v9  ;;  %v1078_v60 = vadd.f32 1.0, %v5438_v59  ;;  %v7067_v59 = vld [vmem:[#allocation22_spill] sm:$0xff] }
 0x1a9   :  { %5443 = vrcp.f32 %v896_v13 }
 0x1af   :  { %v5440_v46 = vpop.eup %5439 }
 0x1b0   :  { %v899_v39 = vmul.f32 %v5440_v46, %v882_v3  ;;  %v7068_v3 = vld [vmem:[#allocation30_spill] sm:$0xff]  ;;  %v7069_v46 = vld [vmem:[#allocation31_spill] sm:$0xff] }
 0x1b2   :  { %v900_v40 = vadd.f32 %v899_v39, %v417_v62  ;;  %v5442_v33 = vpop.eup %5441  ;;  %v7070_v62 = vld [vmem:[#allocation23_spill] sm:$0xff]  ;;  %v7071_v39 = vld [vmem:[#allocation32_spill] sm:$0xff] }
 0x1b3   :  { %v1063_v49 = vpop.f32.mrb[32].mxu0  ;;  %v5444_v26 = vpop.eup %5443 }
 0x1b4   :  { %5445 = vtanh.f32 %v900_v40  ;;  %v1064_v2 = vadd.f32 %v1063_v49, %v6304_v23  ;;  %v3884_v37 = vpop.f32.mrb[33].mxu0  ;;  %v902_v58 = vsub.f32 1.0, %v5444_v26  ;;  %v904_v53 = vmul.f32 %v5444_v26, %v5978_v12  ;;  %v7072_v40 = vld [vmem:[#allocation33_spill] sm:$0xff]  ;;  %v7074_v49 = vld [vmem:[#allocation34_spill] sm:$0xff]  ;;  %v7081_v26 = vld [vmem:[#allocation39_spill] sm:$0xff] }
 0x1b5   :  { %5447 = vrcp.f32 %v1078_v60  ;;  %v7073_v60 = vld [vmem:[#allocation24_spill] sm:$0xff]  ;;  %v7076_v37 = vld [vmem:[#allocation25_spill] sm:$0xff] }
 0x1b6   :  { %v1081_v16 = vmul.f32 %v5442_v33, %v1064_v2  ;;  %v7075_v2 = vld [vmem:[#allocation35_spill] sm:$0xff]  ;;  %v7077_v33 = vld [vmem:[#allocation36_spill] sm:$0xff] }
 0x1b8   :  { %v1082_v48 = vadd.f32 %v1081_v16, %v574_v54  ;;  %v7078_v54 = vld [vmem:[#allocation37_spill] sm:$0xff]  ;;  %v7079_v16 = vld [vmem:[#allocation26_spill] sm:$0xff] }
 0x1ba   :  { %5449 = vtanh.f32 %v1082_v48  ;;  %v7080_v48 = vld [vmem:[#allocation38_spill] sm:$0xff] }
 0x1be   :  { %v5446_v15 = vpop.eup %5445 }
 0x1bf   :  { %v903_v44 = vmul.f32 %v5446_v15, %v902_v58  ;;  %v5448_v7 = vpop.eup %5447  ;;  %v7082_v58 = vld [vmem:[#allocation27_spill] sm:$0xff]  ;;  %v7083_v15 = vld [vmem:[#allocation28_spill] sm:$0xff] }
 0x1c0   :  { %v1084_v22 = vsub.f32 1.0, %v5448_v7  ;;  %v1086_v9 = vmul.f32 %v5448_v7, %v6094_v30  ;;  %v7066_v30 = vld [vmem:[#allocation29_spill] sm:$0xff]  ;;  %v7084_v7 = vld [vmem:[#allocation68_spill] sm:$0xff] }
 0x1c1   :  { %v6309_v35 = vadd.f32 %v904_v53, %v903_v44 }
 0x1c3   :  { %1088 = vst [vmem:[#allocation14] sm:$0xff] %v6309_v35  ;;  %1160 = vmatmul.mubr.f32.vlgmr.msra.gmra.mrb[2].mxu0 %v6309_v35  ;;  %3918 = vmatmul.mubr.f32.vlgmr.msra.gmra.mrb[20].mxu1 %v6309_v35 }
 0x1c4   :  { %v5450_v6 = vpop.eup %5449  ;;  %4642 = vmatpush1.bf16.msra.mxu1 %v5982_v14  ;;  %4673 = vmatpush3.bf16.msra.mxu0 %v6091_v41 }
 0x1c5   :  { %4644 = vmatprep.subr.bf16.mxu1 %v5989_v19  ;;  %4674 = vmatprep.subr.bf16.mxu0 %v7063_v52  ;;  %v1085_v12 = vmul.f32 %v5450_v6, %v1084_v22 }
 0x1c6   :  { %1325 = vmatprep.mubr.f32.mxu1 %v7064_v0  ;;  %3952 = vmatprep.mubr.msk.f32.mxu0 %vm5768_vm0, %v7064_v0 }
 0x1c7   :  { %v6322_v13 = vadd.f32 %v1086_v9, %v1085_v12 }
 0x1c8   :  { %4646 = vmatpush1.bf16.msra.mxu1 %v5999_v28  ;;  %4676 = vmatpush3.bf16.msra.mxu0 %v6101_v55 }
 0x1c9   :  { %7065 = vst [vmem:[#allocation71_spill] sm:$0xff] %v6322_v13  ;;  %4648 = vmatprep.subr.bf16.mxu1 %v6005_v34  ;;  %4677 = vmatprep.subr.bf16.mxu0 %v7063_v52 }
 0x1cc   :  { %4650 = vmatpush1.bf16.msra.mxu1 %v6015_v42  ;;  %4679 = vmatpush3.bf16.msra.mxu0 %v6111_v47 }
 0x1cd   :  { %4652 = vmatprep.subr.bf16.mxu1 %v6020_v50  ;;  %4680 = vmatprep.subr.bf16.mxu0 %v7063_v52 }
 0x1d0   :  { %4654 = vmatpush1.bf16.msra.mxu1 %v6029_v61  ;;  %4682 = vmatpush3.bf16.msra.mxu0 %v6117_v51 }
 0x1d1   :  { %4656 = vmatprep.subr.bf16.mxu1 %v6034_v1  ;;  %4683 = vmatprep.subr.bf16.mxu0 %v7063_v52 }
 0x1d4   :  { %4658 = vmatpush1.bf16.msra.mxu1 %v6043_v20  ;;  %4685 = vmatpush3.bf16.msra.mxu0 %v6123_v57 }
 0x1d5   :  { %4660 = vmatprep.subr.bf16.mxu1 %v6048_v11  ;;  %4686 = vmatprep.subr.bf16.mxu0 %v7063_v52 }
 0x1d8   :  { %4662 = vmatpush1.bf16.msra.mxu1 %v6057_v38  ;;  %4688 = vmatpush3.bf16.msra.mxu0 %v6129_v8 }
 0x1d9   :  { %4664 = vmatprep.subr.bf16.mxu1 %v6062_v21  ;;  %4689 = vmatprep.subr.bf16.mxu0 %v7063_v52 }
 0x1dc   :  { %4666 = vmatpush1.bf16.msra.mxu1 %v6071_v4  ;;  %4691 = vmatpush3.bf16.msra.mxu0 %v6135_v25 }
 0x1dd   :  { %4668 = vmatprep.subr.bf16.mxu1 %v6076_v31  ;;  %4692 = vmatprep.subr.bf16.mxu0 %v7063_v52 }
 0x1e0   :  { %4670 = vmatpush1.bf16.msra.mxu1 %v6085_v24  ;;  %4694 = vmatpush3.bf16.msra.mxu0 %v6141_v32 }
 0x1e1   :  { %4696 = vmatprep.subr.bf16.mxu0 %v5969_v63  ;;  %4727 = vmatprep.subr.bf16.mxu1 %v7063_v52 }
 0x1e3   :  { %1326 = vmatmul.mubr.f32.vlgmr.msra.gmra.mrb[22].mxu1 %v6322_v13  ;;  %3953 = vmatmul.mubr.f32.vlgmr.msra.gmra.mrb[34].mxu0 %v6322_v13 }
 0x1e4   :  { %4698 = vmatpush1.bf16.msra.mxu0 %v5976_v10  ;;  %4729 = vmatpush3.bf16.msra.mxu1 %v5897_v45 }
 0x1e5   :  { %4700 = vmatprep.subr.bf16.mxu0 %v5987_v18  ;;  %4730 = vmatprep.subr.bf16.mxu1 %v7063_v52 }
 0x1e6   :  { %1495 = vmatprep.mubr.f32.mxu0 %v7064_v0  ;;  %3987 = vmatprep.mubr.msk.f32.mxu1 %vm5768_vm0, %v7064_v0 }
 0x1e8   :  { %4702 = vmatpush1.bf16.msra.mxu0 %v5995_v27  ;;  %4732 = vmatpush3.bf16.msra.mxu1 %v5906_v56 }
 0x1e9   :  { %4704 = vmatprep.subr.bf16.mxu0 %v6001_v29  ;;  %4733 = vmatprep.subr.bf16.mxu1 %v7063_v52 }
 0x1ec   :  { %4706 = vmatpush1.bf16.msra.mxu0 %v7066_v30  ;;  %4735 = vmatpush3.bf16.msra.mxu1 %v7067_v59 }
 0x1ed   :  { %4708 = vmatprep.subr.bf16.mxu0 %v7068_v3  ;;  %4736 = vmatprep.subr.bf16.mxu1 %v7063_v52 }
 0x1f0   :  { %4710 = vmatpush1.bf16.msra.mxu0 %v7069_v46  ;;  %4738 = vmatpush3.bf16.msra.mxu1 %v7070_v62 }
 0x1f1   :  { %4712 = vmatprep.subr.bf16.mxu0 %v7071_v39  ;;  %4739 = vmatprep.subr.bf16.mxu1 %v7063_v52 }
 0x1f4   :  { %4714 = vmatpush1.bf16.msra.mxu0 %v7072_v40  ;;  %4741 = vmatpush3.bf16.msra.mxu1 %v7073_v60 }
 0x1f5   :  { %4716 = vmatprep.subr.bf16.mxu0 %v7074_v49  ;;  %4742 = vmatprep.subr.bf16.mxu1 %v7063_v52  ;;  %v7085_v49 = vld [vmem:[#allocation41_spill] sm:$0xff] }
 0x1f8   :  { %4718 = vmatpush1.bf16.msra.mxu0 %v7075_v2  ;;  %4744 = vmatpush3.bf16.msra.mxu1 %v7076_v37 }
 0x1f9   :  { %4720 = vmatprep.subr.bf16.mxu0 %v7077_v33  ;;  %4745 = vmatprep.subr.bf16.mxu1 %v7063_v52 }
 0x1fc   :  { %4722 = vmatpush1.bf16.msra.mxu0 %v7078_v54  ;;  %4747 = vmatpush3.bf16.msra.mxu1 %v7079_v16 }
 0x1fd   :  { %4724 = vmatprep.subr.bf16.mxu0 %v7080_v48  ;;  %4748 = vmatprep.subr.bf16.mxu1 %v7063_v52 }
 0x200   :  { %4726 = vmatpush1.bf16.msra.mxu0 %v7081_v26  ;;  %4750 = vmatpush3.bf16.msra.mxu1 %v7082_v58 }
 0x201   :  { %4752 = vmatprep.subr.bf16.mxu1 %v7083_v15  ;;  %4783 = vmatprep.subr.bf16.mxu0 %v7063_v52 }
 0x296   :  { %v1161_v44 = vpop.f32.mrb[2].mxu0  ;;  %v1232_v53 = vpop.f32.mrb[20].mxu1 }
 0x297   :  { %v5372_v22 = vadd.f32 %v7084_v7, %v1161_v44  ;;  %v1163_v6 = vpop.f32.mrb[3].mxu0  ;;  %v3919_v12 = vpop.f32.mrb[21].mxu1  ;;  %v1233_v15 = vadd.f32 %v1232_v53, %v6297_v43 }
 0x298   :  { %v5374_v16 = vadd.f32 %v6289_v17, %v1163_v6 }
 0x299   :  { %v3515_v9 = vmul.f32 -1.442695, %v5372_v22 }
 0x29a   :  { %v3516_v48 = vmul.f32 -1.442695, %v5374_v16 }
 0x29b   :  { %5451 = vpow2.f32 %v3515_v9  ;;  %v7087_v9 = vld [vmem:[#allocation66_spill] sm:$0xff] }
 0x29c   :  { %5453 = vpow2.f32 %v3516_v48 }
 0x2a5   :  { %v5452_v54 = vpop.eup %5451 }
 0x2a6   :  { %v1240_v26 = vadd.f32 1.0, %v5452_v54  ;;  %v5454_v58 = vpop.eup %5453  ;;  %v7086_v54 = vld [vmem:[#allocation52_spill] sm:$0xff] }
 0x2a7   :  { %v1247_v33 = vadd.f32 1.0, %v5454_v58 }
 0x2a8   :  { %5455 = vrcp.f32 %v1240_v26 }
 0x2a9   :  { %5457 = vrcp.f32 %v1247_v33 }
 0x2b2   :  { %v5456_v37 = vpop.eup %5455 }
 0x2b3   :  { %v1250_v2 = vmul.f32 %v5456_v37, %v1233_v15  ;;  %v5458_v53 = vpop.eup %5457 }
 0x2b4   :  { %v1253_v33 = vsub.f32 1.0, %v5458_v53 }
 0x2b5   :  { %v1251_v44 = vadd.f32 %v1250_v2, %v7085_v49  ;;  %v1255_v2 = vmul.f32 %v5458_v53, %v6309_v35 }
 0x2b6   :  { %v1327_v7 = vpop.f32.mrb[22].mxu1  ;;  %v1398_v12 = vpop.f32.mrb[34].mxu0 }
 0x2b7   :  { %5459 = vtanh.f32 %v1251_v44  ;;  %v1328_v22 = vadd.f32 %v1327_v7, %v6285_v36  ;;  %v1329_v6 = vpop.f32.mrb[23].mxu1  ;;  %v3954_v16 = vpop.f32.mrb[35].mxu0 }
 0x2b8   :  { %v1330_v48 = vadd.f32 %v1329_v6, %v6287_v5  ;;  %v1399_v6 = vadd.f32 %v1398_v12, %v6304_v23 }
 0x2b9   :  { %v1402_v26 = vadd.f32 %v1328_v22, %v7086_v54  ;;  %v7088_v54 = vld [vmem:[#allocation67_spill] sm:$0xff] }
 0x2ba   :  { %v1409_v58 = vadd.f32 %v1330_v48, %v7087_v9 }
 0x2bb   :  { %v3517_v17 = vmul.f32 -1.442695, %v1402_v26 }
 0x2bc   :  { %v3518_v37 = vmul.f32 -1.442695, %v1409_v58 }
 0x2bd   :  { %5461 = vpow2.f32 %v3517_v17 }
 0x2be   :  { %5463 = vpow2.f32 %v3518_v37 }
 0x2c1   :  { %v5460_v15 = vpop.eup %5459 }
 0x2c2   :  { %v1254_v49 = vmul.f32 %v5460_v15, %v1253_v33  ;;  %v7090_v15 = vld [vmem:[#allocation34_spill] sm:$0xff] }
 0x2c4   :  { %v6398_v44 = vadd.f32 %v1255_v2, %v1254_v49  ;;  %v7091_v49 = vld [vmem:[#allocation35_spill] sm:$0xff]  ;;  %v7092_v2 = vld [vmem:[#allocation25_spill] sm:$0xff] }
 0x2c6   :  { %1424 = vst [vmem:[#allocation14 + $0x8] sm:$0xff] %v6398_v44  ;;  %1496 = vmatmul.mubr.f32.vlgmr.msra.gmra.mrb[4].mxu0 %v6398_v44  ;;  %3988 = vmatmul.mubr.f32.vlgmr.msra.gmra.mrb[24].mxu1 %v6398_v44 }
 0x2c7   :  { %v5462_v7 = vpop.eup %5461  ;;  %4754 = vmatpush1.bf16.msra.mxu1 %v5982_v14  ;;  %4785 = vmatpush3.bf16.msra.mxu0 %v6091_v41 }
 0x2c8   :  { %v1406_v17 = vadd.f32 1.0, %v5462_v7  ;;  %4756 = vmatprep.subr.bf16.mxu1 %v5989_v19  ;;  %4786 = vmatprep.subr.bf16.mxu0 %v7063_v52  ;;  %v5464_v35 = vpop.eup %5463  ;;  %v7093_v7 = vld [vmem:[#allocation36_spill] sm:$0xff] }
 0x2c9   :  { %1661 = vmatprep.mubr.f32.mxu1 %v7064_v0  ;;  %4022 = vmatprep.mubr.msk.f32.mxu0 %vm5768_vm0, %v7064_v0  ;;  %v1413_v22 = vadd.f32 1.0, %v5464_v35  ;;  %v7095_v35 = vld [vmem:[#allocation26_spill] sm:$0xff] }
 0x2ca   :  { %5465 = vrcp.f32 %v1406_v17  ;;  %v7094_v17 = vld [vmem:[#allocation37_spill] sm:$0xff] }
 0x2cb   :  { %4758 = vmatpush1.bf16.msra.mxu1 %v5999_v28  ;;  %4788 = vmatpush3.bf16.msra.mxu0 %v6101_v55  ;;  %5467 = vrcp.f32 %v1413_v22  ;;  %v7096_v22 = vld [vmem:[#allocation38_spill] sm:$0xff] }
 0x2cc   :  { %4760 = vmatprep.subr.bf16.mxu1 %v6005_v34  ;;  %4789 = vmatprep.subr.bf16.mxu0 %v7063_v52 }
 0x2cf   :  { %4762 = vmatpush1.bf16.msra.mxu1 %v6015_v42  ;;  %4791 = vmatpush3.bf16.msra.mxu0 %v6111_v47 }
 0x2d0   :  { %4764 = vmatprep.subr.bf16.mxu1 %v6020_v50  ;;  %4792 = vmatprep.subr.bf16.mxu0 %v7063_v52 }
 0x2d3   :  { %4766 = vmatpush1.bf16.msra.mxu1 %v6029_v61  ;;  %4794 = vmatpush3.bf16.msra.mxu0 %v6117_v51 }
 0x2d4   :  { %v5466_v16 = vpop.eup %5465  ;;  %4768 = vmatprep.subr.bf16.mxu1 %v6034_v1  ;;  %4795 = vmatprep.subr.bf16.mxu0 %v7063_v52 }
 0x2d5   :  { %v1416_v48 = vmul.f32 %v5466_v16, %v1399_v6  ;;  %v5468_v12 = vpop.eup %5467  ;;  %v7097_v6 = vld [vmem:[#allocation39_spill] sm:$0xff] }
 0x2d6   :  { %v1419_v9 = vsub.f32 1.0, %v5468_v12  ;;  %v1421_v37 = vmul.f32 %v5468_v12, %v6322_v13  ;;  %v7098_v16 = vld [vmem:[#allocation27_spill] sm:$0xff]  ;;  %v7100_v12 = vld [vmem:[#allocation68_spill] sm:$0xff]  ;;  %v7101_v13 = vld [vmem:[#allocation69_spill] sm:$0xff] }
 0x2d7   :  { %v1417_v26 = vadd.f32 %v1416_v48, %v7088_v54  ;;  %4770 = vmatpush1.bf16.msra.mxu1 %v6043_v20  ;;  %4797 = vmatpush3.bf16.msra.mxu0 %v6123_v57  ;;  %v7099_v48 = vld [vmem:[#allocation28_spill] sm:$0xff] }
 0x2d8   :  { %4772 = vmatprep.subr.bf16.mxu1 %v6048_v11  ;;  %4798 = vmatprep.subr.bf16.mxu0 %v7063_v52 }
 0x2d9   :  { %5469 = vtanh.f32 %v1417_v26 }
 0x2db   :  { %4774 = vmatpush1.bf16.msra.mxu1 %v6057_v38  ;;  %4800 = vmatpush3.bf16.msra.mxu0 %v6129_v8 }
 0x2dc   :  { %4776 = vmatprep.subr.bf16.mxu1 %v6062_v21  ;;  %4801 = vmatprep.subr.bf16.mxu0 %v7063_v52 }
 0x2df   :  { %4778 = vmatpush1.bf16.msra.mxu1 %v6071_v4  ;;  %4803 = vmatpush3.bf16.msra.mxu0 %v6135_v25 }
 0x2e0   :  { %4780 = vmatprep.subr.bf16.mxu1 %v6076_v31  ;;  %4804 = vmatprep.subr.bf16.mxu0 %v7063_v52 }
 0x2e3   :  { %v5470_v58 = vpop.eup %5469  ;;  %4782 = vmatpush1.bf16.msra.mxu1 %v6085_v24  ;;  %4806 = vmatpush3.bf16.msra.mxu0 %v6141_v32 }
 0x2e4   :  { %v1420_v53 = vmul.f32 %v5470_v58, %v1419_v9  ;;  %4808 = vmatprep.subr.bf16.mxu0 %v5969_v63  ;;  %4839 = vmatprep.subr.bf16.mxu1 %v7063_v52 }
 0x2e6   :  { %v6441_v33 = vadd.f32 %v1421_v37, %v1420_v53 }
 0x2e8   :  { %7089 = vst [vmem:[#allocation29_spill] sm:$0xff] %v6441_v33  ;;  %1662 = vmatmul.mubr.f32.vlgmr.msra.gmra.mrb[26].mxu1 %v6441_v33  ;;  %4023 = vmatmul.mubr.f32.vlgmr.msra.gmra.mrb[36].mxu0 %v6441_v33 }
 0x2e9   :  { %4810 = vmatpush1.bf16.msra.mxu0 %v5976_v10  ;;  %4841 = vmatpush3.bf16.msra.mxu1 %v5897_v45 }
 0x2ea   :  { %4812 = vmatprep.subr.bf16.mxu0 %v5987_v18  ;;  %4842 = vmatprep.subr.bf16.mxu1 %v7063_v52 }
 0x2eb   :  { %1831 = vmatprep.mubr.f32.mxu0 %v7064_v0  ;;  %4057 = vmatprep.mubr.msk.f32.mxu1 %vm5768_vm0, %v7064_v0 }
 0x2ed   :  { %4814 = vmatpush1.bf16.msra.mxu0 %v5995_v27  ;;  %4844 = vmatpush3.bf16.msra.mxu1 %v5906_v56 }
 0x2ee   :  { %4816 = vmatprep.subr.bf16.mxu0 %v6001_v29  ;;  %4845 = vmatprep.subr.bf16.mxu1 %v7063_v52 }
 0x2f1   :  { %4818 = vmatpush1.bf16.msra.mxu0 %v7066_v30  ;;  %4847 = vmatpush3.bf16.msra.mxu1 %v7067_v59 }
 0x2f2   :  { %4820 = vmatprep.subr.bf16.mxu0 %v7068_v3  ;;  %4848 = vmatprep.subr.bf16.mxu1 %v7063_v52 }
 0x2f5   :  { %4822 = vmatpush1.bf16.msra.mxu0 %v7069_v46  ;;  %4850 = vmatpush3.bf16.msra.mxu1 %v7070_v62 }
 0x2f6   :  { %4824 = vmatprep.subr.bf16.mxu0 %v7071_v39  ;;  %4851 = vmatprep.subr.bf16.mxu1 %v7063_v52 }
 0x2f9   :  { %4826 = vmatpush1.bf16.msra.mxu0 %v7072_v40  ;;  %4853 = vmatpush3.bf16.msra.mxu1 %v7073_v60 }
 0x2fa   :  { %4828 = vmatprep.subr.bf16.mxu0 %v7090_v15  ;;  %4854 = vmatprep.subr.bf16.mxu1 %v7063_v52  ;;  %v7102_v15 = vld [vmem:[#allocation43_spill] sm:$0xff] }
 0x2fd   :  { %4830 = vmatpush1.bf16.msra.mxu0 %v7091_v49  ;;  %4856 = vmatpush3.bf16.msra.mxu1 %v7092_v2 }
 0x2fe   :  { %4832 = vmatprep.subr.bf16.mxu0 %v7093_v7  ;;  %4857 = vmatprep.subr.bf16.mxu1 %v7063_v52 }
 0x301   :  { %4834 = vmatpush1.bf16.msra.mxu0 %v7094_v17  ;;  %4859 = vmatpush3.bf16.msra.mxu1 %v7095_v35 }
 0x302   :  { %4836 = vmatprep.subr.bf16.mxu0 %v7096_v22  ;;  %4860 = vmatprep.subr.bf16.mxu1 %v7063_v52 }
 0x305   :  { %4838 = vmatpush1.bf16.msra.mxu0 %v7097_v6  ;;  %4862 = vmatpush3.bf16.msra.mxu1 %v7098_v16 }
 0x306   :  { %4864 = vmatprep.subr.bf16.mxu1 %v7099_v48  ;;  %4895 = vmatprep.subr.bf16.mxu0 %v7063_v52 }
 0x399   :  { %v1497_v54 = vpop.f32.mrb[4].mxu0  ;;  %v1568_v26 = vpop.f32.mrb[24].mxu1 }
 0x39a   :  { %v5376_v9 = vadd.f32 %v7100_v12, %v1497_v54  ;;  %v1499_v58 = vpop.f32.mrb[5].mxu0  ;;  %v3989_v53 = vpop.f32.mrb[25].mxu1  ;;  %v1569_v48 = vadd.f32 %v1568_v26, %v6297_v43 }
 0x39b   :  { %v5378_v35 = vadd.f32 %v7101_v13, %v1499_v58  ;;  %v7104_v13 = vld [vmem:[#allocation64_spill] sm:$0xff] }
 0x39c   :  { %v3519_v37 = vmul.f32 -1.442695, %v5376_v9 }
 0x39d   :  { %v3520_v22 = vmul.f32 -1.442695, %v5378_v35 }
 0x39e   :  { %5471 = vpow2.f32 %v3519_v37 }
 0x39f   :  { %5473 = vpow2.f32 %v3520_v22 }
 0x3a8   :  { %v5472_v17 = vpop.eup %5471 }
 0x3a9   :  { %v1576_v6 = vadd.f32 1.0, %v5472_v17  ;;  %v5474_v16 = vpop.eup %5473  ;;  %v7103_v17 = vld [vmem:[#allocation50_spill] sm:$0xff] }
 0x3aa   :  { %v1583_v7 = vadd.f32 1.0, %v5474_v16 }
 0x3ab   :  { %5475 = vrcp.f32 %v1576_v6 }
 0x3ac   :  { %5477 = vrcp.f32 %v1583_v7 }
 0x3b5   :  { %v5476_v2 = vpop.eup %5475 }
 0x3b6   :  { %v1586_v49 = vmul.f32 %v5476_v2, %v1569_v48  ;;  %v5478_v12 = vpop.eup %5477 }
 0x3b7   :  { %v1589_v2 = vsub.f32 1.0, %v5478_v12 }
 0x3b8   :  { %v1587_v54 = vadd.f32 %v1586_v49, %v7102_v15  ;;  %v1591_v49 = vmul.f32 %v5478_v12, %v6398_v44 }
 0x3ba   :  { %5479 = vtanh.f32 %v1587_v54 }
 0x3bb   :  { %v1663_v53 = vpop.f32.mrb[26].mxu1  ;;  %v1734_v9 = vpop.f32.mrb[36].mxu0 }
 0x3bc   :  { %v1664_v58 = vadd.f32 %v1663_v53, %v6285_v36  ;;  %v1665_v37 = vpop.f32.mrb[27].mxu1  ;;  %v4024_v35 = vpop.f32.mrb[37].mxu0 }
 0x3bd   :  { %v1666_v22 = vadd.f32 %v1665_v37, %v6287_v5 }
 0x3be   :  { %v1738_v6 = vadd.f32 %v1664_v58, %v7103_v17  ;;  %v1735_v58 = vadd.f32 %v1734_v9, %v6304_v23 }
 0x3bf   :  { %v1745_v16 = vadd.f32 %v1666_v22, %v7104_v13  ;;  %v7106_v22 = vld [vmem:[#allocation65_spill] sm:$0xff] }
 0x3c0   :  { %v3521_v26 = vmul.f32 -1.442695, %v1738_v6 }
 0x3c1   :  { %v3522_v48 = vmul.f32 -1.442695, %v1745_v16 }
 0x3c2   :  { %5481 = vpow2.f32 %v3521_v26 }
 0x3c3   :  { %5483 = vpow2.f32 %v3522_v48  ;;  %v7108_v48 = vld [vmem:[#allocation34_spill] sm:$0xff] }
 0x3c4   :  { %v5480_v7 = vpop.eup %5479 }
 0x3c5   :  { %v1590_v15 = vmul.f32 %v5480_v7, %v1589_v2 }
 0x3c7   :  { %v6489_v54 = vadd.f32 %v1591_v49, %v1590_v15  ;;  %v7109_v15 = vld [vmem:[#allocation35_spill] sm:$0xff]  ;;  %v7110_v49 = vld [vmem:[#allocation25_spill] sm:$0xff] }
 0x3c9   :  { %7105 = vst [vmem:[#allocation22_spill] sm:$0xff] %v6489_v54  ;;  %1832 = vmatmul.mubr.f32.vlgmr.msra.gmra.mrb[6].mxu0 %v6489_v54  ;;  %4058 = vmatmul.mubr.f32.vlgmr.msra.gmra.mrb[28].mxu1 %v6489_v54 }
 0x3ca   :  { %4866 = vmatpush1.bf16.msra.mxu1 %v5982_v14  ;;  %4897 = vmatpush3.bf16.msra.mxu0 %v6091_v41 }
 0x3cb   :  { %4868 = vmatprep.subr.bf16.mxu1 %v5989_v19  ;;  %4898 = vmatprep.subr.bf16.mxu0 %v7063_v52 }
 0x3cc   :  { %v5482_v13 = vpop.eup %5481  ;;  %1997 = vmatprep.mubr.f32.mxu1 %v7064_v0  ;;  %4092 = vmatprep.mubr.msk.f32.mxu0 %vm5768_vm0, %v7064_v0 }
 0x3cd   :  { %v1742_v44 = vadd.f32 1.0, %v5482_v13  ;;  %v5484_v12 = vpop.eup %5483  ;;  %v7111_v13 = vld [vmem:[#allocation36_spill] sm:$0xff] }
 0x3ce   :  { %4870 = vmatpush1.bf16.msra.mxu1 %v5999_v28  ;;  %4900 = vmatpush3.bf16.msra.mxu0 %v6101_v55  ;;  %v1749_v53 = vadd.f32 1.0, %v5484_v12  ;;  %v7113_v12 = vld [vmem:[#allocation26_spill] sm:$0xff] }
 0x3cf   :  { %5485 = vrcp.f32 %v1742_v44  ;;  %4872 = vmatprep.subr.bf16.mxu1 %v6005_v34  ;;  %4901 = vmatprep.subr.bf16.mxu0 %v7063_v52  ;;  %v7112_v44 = vld [vmem:[#allocation37_spill] sm:$0xff] }
 0x3d0   :  { %5487 = vrcp.f32 %v1749_v53  ;;  %v7114_v53 = vld [vmem:[#allocation38_spill] sm:$0xff] }
 0x3d2   :  { %4874 = vmatpush1.bf16.msra.mxu1 %v6015_v42  ;;  %4903 = vmatpush3.bf16.msra.mxu0 %v6111_v47 }
 0x3d3   :  { %4876 = vmatprep.subr.bf16.mxu1 %v6020_v50  ;;  %4904 = vmatprep.subr.bf16.mxu0 %v7063_v52 }
 0x3d6   :  { %4878 = vmatpush1.bf16.msra.mxu1 %v6029_v61  ;;  %4906 = vmatpush3.bf16.msra.mxu0 %v6117_v51 }
 0x3d7   :  { %4880 = vmatprep.subr.bf16.mxu1 %v6034_v1  ;;  %4907 = vmatprep.subr.bf16.mxu0 %v7063_v52 }
 0x3d9   :  { %v5486_v37 = vpop.eup %5485 }
 0x3da   :  { %v1752_v35 = vmul.f32 %v5486_v37, %v1735_v58  ;;  %4882 = vmatpush1.bf16.msra.mxu1 %v6043_v20  ;;  %4909 = vmatpush3.bf16.msra.mxu0 %v6123_v57  ;;  %v5488_v9 = vpop.eup %5487  ;;  %v7115_v58 = vld [vmem:[#allocation39_spill] sm:$0xff] }
 0x3db   :  { %4884 = vmatprep.subr.bf16.mxu1 %v6048_v11  ;;  %4910 = vmatprep.subr.bf16.mxu0 %v7063_v52  ;;  %v1755_v6 = vsub.f32 1.0, %v5488_v9  ;;  %v1757_v2 = vmul.f32 %v5488_v9, %v6441_v33  ;;  %v7116_v37 = vld [vmem:[#allocation27_spill] sm:$0xff]  ;;  %v7118_v9 = vld [vmem:[#allocation68_spill] sm:$0xff]  ;;  %v7119_v33 = vld [vmem:[#allocation69_spill] sm:$0xff] }
 0x3dc   :  { %v1753_v17 = vadd.f32 %v1752_v35, %v7106_v22  ;;  %v7117_v35 = vld [vmem:[#allocation28_spill] sm:$0xff] }
 0x3de   :  { %5489 = vtanh.f32 %v1753_v17  ;;  %4886 = vmatpush1.bf16.msra.mxu1 %v6057_v38  ;;  %4912 = vmatpush3.bf16.msra.mxu0 %v6129_v8 }
 0x3df   :  { %4888 = vmatprep.subr.bf16.mxu1 %v6062_v21  ;;  %4913 = vmatprep.subr.bf16.mxu0 %v7063_v52 }
 0x3e2   :  { %4890 = vmatpush1.bf16.msra.mxu1 %v6071_v4  ;;  %4915 = vmatpush3.bf16.msra.mxu0 %v6135_v25 }
 0x3e3   :  { %4892 = vmatprep.subr.bf16.mxu1 %v6076_v31  ;;  %4916 = vmatprep.subr.bf16.mxu0 %v7063_v52 }
 0x3e6   :  { %4894 = vmatpush1.bf16.msra.mxu1 %v6085_v24  ;;  %4918 = vmatpush3.bf16.msra.mxu0 %v6141_v32 }
 0x3e7   :  { %4920 = vmatprep.subr.bf16.mxu0 %v5969_v63  ;;  %4951 = vmatprep.subr.bf16.mxu1 %v7063_v52 }
 0x3e8   :  { %v5490_v16 = vpop.eup %5489 }
 0x3e9   :  { %v1756_v26 = vmul.f32 %v5490_v16, %v1755_v6 }
 0x3eb   :  { %v6531_v7 = vadd.f32 %v1757_v2, %v1756_v26 }
 0x3ed   :  { %7107 = vst [vmem:[#allocation30_spill] sm:$0xff] %v6531_v7  ;;  %1998 = vmatmul.mubr.f32.vlgmr.msra.gmra.mrb[30].mxu1 %v6531_v7  ;;  %4093 = vmatmul.mubr.f32.vlgmr.msra.gmra.mrb[38].mxu0 %v6531_v7 }
 0x3ee   :  { %4922 = vmatpush1.bf16.msra.mxu0 %v5976_v10  ;;  %4953 = vmatpush3.bf16.msra.mxu1 %v5897_v45 }
 0x3ef   :  { %4924 = vmatprep.subr.bf16.mxu0 %v5987_v18  ;;  %4954 = vmatprep.subr.bf16.mxu1 %v7063_v52 }
 0x3f0   :  { %2167 = vmatprep.mubr.f32.mxu0 %v7064_v0  ;;  %4127 = vmatprep.mubr.msk.f32.mxu1 %vm5768_vm0, %v7064_v0 }
 0x3f2   :  { %4926 = vmatpush1.bf16.msra.mxu0 %v5995_v27  ;;  %4956 = vmatpush3.bf16.msra.mxu1 %v5906_v56 }
 0x3f3   :  { %4928 = vmatprep.subr.bf16.mxu0 %v6001_v29  ;;  %4957 = vmatprep.subr.bf16.mxu1 %v7063_v52 }
 0x3f6   :  { %4930 = vmatpush1.bf16.msra.mxu0 %v7066_v30  ;;  %4959 = vmatpush3.bf16.msra.mxu1 %v7067_v59 }
 0x3f7   :  { %4932 = vmatprep.subr.bf16.mxu0 %v7068_v3  ;;  %4960 = vmatprep.subr.bf16.mxu1 %v7063_v52 }
 0x3fa   :  { %4934 = vmatpush1.bf16.msra.mxu0 %v7069_v46  ;;  %4962 = vmatpush3.bf16.msra.mxu1 %v7070_v62 }
 0x3fb   :  { %4936 = vmatprep.subr.bf16.mxu0 %v7071_v39  ;;  %4963 = vmatprep.subr.bf16.mxu1 %v7063_v52 }
 0x3fe   :  { %4938 = vmatpush1.bf16.msra.mxu0 %v7072_v40  ;;  %4965 = vmatpush3.bf16.msra.mxu1 %v7073_v60 }
 0x3ff   :  { %4940 = vmatprep.subr.bf16.mxu0 %v7108_v48  ;;  %4966 = vmatprep.subr.bf16.mxu1 %v7063_v52  ;;  %v7120_v48 = vld [vmem:[#allocation45_spill] sm:$0xff] }
 0x402   :  { %4942 = vmatpush1.bf16.msra.mxu0 %v7109_v15  ;;  %4968 = vmatpush3.bf16.msra.mxu1 %v7110_v49 }
 0x403   :  { %4944 = vmatprep.subr.bf16.mxu0 %v7111_v13  ;;  %4969 = vmatprep.subr.bf16.mxu1 %v7063_v52 }
 0x406   :  { %4946 = vmatpush1.bf16.msra.mxu0 %v7112_v44  ;;  %4971 = vmatpush3.bf16.msra.mxu1 %v7113_v12 }
 0x407   :  { %4948 = vmatprep.subr.bf16.mxu0 %v7114_v53  ;;  %4972 = vmatprep.subr.bf16.mxu1 %v7063_v52 }
 0x40a   :  { %4950 = vmatpush1.bf16.msra.mxu0 %v7115_v58  ;;  %4974 = vmatpush3.bf16.msra.mxu1 %v7116_v37 }
 0x40b   :  { %4976 = vmatprep.subr.bf16.mxu1 %v7117_v35  ;;  %5007 = vmatprep.subr.bf16.mxu0 %v7063_v52 }
 0x49c   :  { %v1833_v22 = vpop.f32.mrb[6].mxu0  ;;  %v1904_v17 = vpop.f32.mrb[28].mxu1 }
 0x49d   :  { %v5380_v6 = vadd.f32 %v7118_v9, %v1833_v22  ;;  %v1835_v16 = vpop.f32.mrb[7].mxu0  ;;  %v4059_v26 = vpop.f32.mrb[29].mxu1  ;;  %v1905_v35 = vadd.f32 %v1904_v17, %v6297_v43 }
 0x49e   :  { %v5382_v12 = vadd.f32 %v7119_v33, %v1835_v16 }
 0x49f   :  { %v3523_v2 = vmul.f32 -1.442695, %v5380_v6 }
 0x4a0   :  { %v3524_v53 = vmul.f32 -1.442695, %v5382_v12 }
 0x4a1   :  { %5491 = vpow2.f32 %v3523_v2 }
 0x4a2   :  { %5493 = vpow2.f32 %v3524_v53 }
 0x4ab   :  { %v5492_v44 = vpop.eup %5491 }
 0x4ac   :  { %v1912_v58 = vadd.f32 1.0, %v5492_v44  ;;  %v5494_v37 = vpop.eup %5493 }
 0x4ad   :  { %v1919_v13 = vadd.f32 1.0, %v5494_v37  ;;  %v7122_v37 = vld [vmem:[#allocation62_spill] sm:$0xff] }
 0x4ae   :  { %5495 = vrcp.f32 %v1912_v58  ;;  %v7121_v58 = vld [vmem:[#allocation48_spill] sm:$0xff] }
 0x4af   :  { %5497 = vrcp.f32 %v1919_v13 }
 0x4b8   :  { %v5496_v49 = vpop.eup %5495 }
 0x4b9   :  { %v1922_v15 = vmul.f32 %v5496_v49, %v1905_v35  ;;  %v5498_v44 = vpop.eup %5497 }
 0x4ba   :  { %v1925_v43 = vsub.f32 1.0, %v5498_v44 }
 0x4bb   :  { %v1923_v22 = vadd.f32 %v1922_v15, %v7120_v48  ;;  %v1927_v48 = vmul.f32 %v5498_v44, %v6489_v54  ;;  %v7135_v54 = vld [vmem:[#allocation69_spill] sm:$0xff] }
 0x4bd   :  { %5499 = vtanh.f32 %v1923_v22 }
 0x4c0   :  { %v1999_v26 = vpop.f32.mrb[30].mxu1  ;;  %v2070_v6 = vpop.f32.mrb[38].mxu0 }
 0x4c1   :  { %v2000_v16 = vadd.f32 %v1999_v26, %v6285_v36  ;;  %v2001_v2 = vpop.f32.mrb[31].mxu1  ;;  %v4094_v12 = vpop.f32.mrb[39].mxu0  ;;  %v2071_v26 = vadd.f32 %v2070_v6, %v6304_v23 }
 0x4c2   :  { %v2002_v53 = vadd.f32 %v2001_v2, %v6287_v5  ;;  %v7123_v12 = vld [vmem:[#allocation63_spill] sm:$0xff] }
 0x4c3   :  { %v2074_v33 = vadd.f32 %v2000_v16, %v7121_v58 }
 0x4c4   :  { %v2081_v9 = vadd.f32 %v2002_v53, %v7122_v37 }
 0x4c5   :  { %v3525_v17 = vmul.f32 -1.442695, %v2074_v33 }
 0x4c6   :  { %v3526_v15 = vmul.f32 -1.442695, %v2081_v9 }
 0x4c7   :  { %v5500_v49 = vpop.eup %5499  ;;  %5501 = vpow2.f32 %v3525_v17 }
 0x4c8   :  { %v1926_v13 = vmul.f32 %v5500_v49, %v1925_v43  ;;  %5503 = vpow2.f32 %v3526_v15  ;;  %v7126_v15 = vld [vmem:[#allocation25_spill] sm:$0xff] }
 0x4ca   :  { %v6579_v35 = vadd.f32 %v1927_v48, %v1926_v13  ;;  %v7124_v13 = vld [vmem:[#allocation34_spill] sm:$0xff]  ;;  %v7125_v48 = vld [vmem:[#allocation35_spill] sm:$0xff] }
 0x4cc   :  { %2168 = vmatmul.mubr.f32.vlgmr.msra.gmra.mrb[8].mxu0 %v6579_v35  ;;  %4128 = vmatmul.mubr.f32.vlgmr.msra.gmra.mrb[32].mxu1 %v6579_v35 }
 0x4cd   :  { %4978 = vmatpush1.bf16.msra.mxu1 %v5982_v14  ;;  %5009 = vmatpush3.bf16.msra.mxu0 %v6091_v41 }
 0x4ce   :  { %4980 = vmatprep.subr.bf16.mxu1 %v5989_v19  ;;  %5010 = vmatprep.subr.bf16.mxu0 %v7063_v52 }
 0x4cf   :  { %2333 = vmatprep.mubr.f32.mxu1 %v7064_v0  ;;  %4162 = vmatprep.mubr.msk.f32.mxu0 %vm5768_vm0, %v7064_v0 }
 0x4d1   :  { %v5502_v43 = vpop.eup %5501  ;;  %4982 = vmatpush1.bf16.msra.mxu1 %v5999_v28  ;;  %5012 = vmatpush3.bf16.msra.mxu0 %v6101_v55 }
 0x4d2   :  { %v2078_v33 = vadd.f32 1.0, %v5502_v43  ;;  %4984 = vmatprep.subr.bf16.mxu1 %v6005_v34  ;;  %5013 = vmatprep.subr.bf16.mxu0 %v7063_v52  ;;  %v5504_v9 = vpop.eup %5503  ;;  %v7127_v43 = vld [vmem:[#allocation36_spill] sm:$0xff] }
 0x4d3   :  { %v2085_v22 = vadd.f32 1.0, %v5504_v9  ;;  %v7129_v9 = vld [vmem:[#allocation26_spill] sm:$0xff] }
 0x4d4   :  { %5505 = vrcp.f32 %v2078_v33  ;;  %v7128_v33 = vld [vmem:[#allocation37_spill] sm:$0xff] }
 0x4d5   :  { %4986 = vmatpush1.bf16.msra.mxu1 %v6015_v42  ;;  %5015 = vmatpush3.bf16.msra.mxu0 %v6111_v47  ;;  %5507 = vrcp.f32 %v2085_v22  ;;  %v7130_v22 = vld [vmem:[#allocation38_spill] sm:$0xff] }
 0x4d6   :  { %4988 = vmatprep.subr.bf16.mxu1 %v6020_v50  ;;  %5016 = vmatprep.subr.bf16.mxu0 %v7063_v52 }
 0x4d9   :  { %4990 = vmatpush1.bf16.msra.mxu1 %v6029_v61  ;;  %5018 = vmatpush3.bf16.msra.mxu0 %v6117_v51 }
 0x4da   :  { %4992 = vmatprep.subr.bf16.mxu1 %v6034_v1  ;;  %5019 = vmatprep.subr.bf16.mxu0 %v7063_v52 }
 0x4dd   :  { %4994 = vmatpush1.bf16.msra.mxu1 %v6043_v20  ;;  %5021 = vmatpush3.bf16.msra.mxu0 %v6123_v57 }
 0x4de   :  { %v5506_v16 = vpop.eup %5505  ;;  %4996 = vmatprep.subr.bf16.mxu1 %v6048_v11  ;;  %5022 = vmatprep.subr.bf16.mxu0 %v7063_v52 }
 0x4df   :  { %v2088_v2 = vmul.f32 %v5506_v16, %v2071_v26  ;;  %v5508_v6 = vpop.eup %5507  ;;  %v7131_v26 = vld [vmem:[#allocation39_spill] sm:$0xff] }
 0x4e0   :  { %v2091_v44 = vsub.f32 1.0, %v5508_v6  ;;  %v2093_v17 = vmul.f32 %v5508_v6, %v6531_v7  ;;  %v7132_v16 = vld [vmem:[#allocation27_spill] sm:$0xff]  ;;  %v7134_v6 = vld [vmem:[#allocation68_spill] sm:$0xff] }
 0x4e1   :  { %v2089_v53 = vadd.f32 %v2088_v2, %v7123_v12  ;;  %4998 = vmatpush1.bf16.msra.mxu1 %v6057_v38  ;;  %5024 = vmatpush3.bf16.msra.mxu0 %v6129_v8  ;;  %v7133_v2 = vld [vmem:[#allocation28_spill] sm:$0xff] }
 0x4e2   :  { %5000 = vmatprep.subr.bf16.mxu1 %v6062_v21  ;;  %5025 = vmatprep.subr.bf16.mxu0 %v7063_v52 }
 0x4e3   :  { %5509 = vtanh.f32 %v2089_v53 }
 0x4e5   :  { %5002 = vmatpush1.bf16.msra.mxu1 %v6071_v4  ;;  %5027 = vmatpush3.bf16.msra.mxu0 %v6135_v25 }
 0x4e6   :  { %5004 = vmatprep.subr.bf16.mxu1 %v6076_v31  ;;  %5028 = vmatprep.subr.bf16.mxu0 %v7063_v52 }
 0x4e9   :  { %5006 = vmatpush1.bf16.msra.mxu1 %v6085_v24  ;;  %5030 = vmatpush3.bf16.msra.mxu0 %v6141_v32 }
 0x4ea   :  { %5032 = vmatprep.subr.bf16.mxu0 %v5969_v63  ;;  %5063 = vmatprep.subr.bf16.mxu1 %v7063_v52 }
 0x4ed   :  { %v5510_v58 = vpop.eup %5509 }
 0x4ee   :  { %v2092_v37 = vmul.f32 %v5510_v58, %v2091_v44 }
 0x4f0   :  { %v6621_v49 = vadd.f32 %v2093_v17, %v2092_v37 }
 0x4f2   :  { %2334 = vmatmul.mubr.f32.vlgmr.msra.gmra.mrb[34].mxu1 %v6621_v49  ;;  %4163 = vmatmul.mubr.f32.vlgmr.msra.gmra.mrb[40].mxu0 %v6621_v49 }
 0x4f3   :  { %5034 = vmatpush1.bf16.msra.mxu0 %v5976_v10  ;;  %5065 = vmatpush3.bf16.msra.mxu1 %v5897_v45 }
 0x4f4   :  { %5036 = vmatprep.subr.bf16.mxu0 %v5987_v18  ;;  %5066 = vmatprep.subr.bf16.mxu1 %v7063_v52 }
 0x4f5   :  { %2503 = vmatprep.mubr.f32.mxu0 %v7064_v0  ;;  %4197 = vmatprep.mubr.msk.f32.mxu1 %vm5768_vm0, %v7064_v0 }
 0x4f7   :  { %5038 = vmatpush1.bf16.msra.mxu0 %v5995_v27  ;;  %5068 = vmatpush3.bf16.msra.mxu1 %v5906_v56 }
 0x4f8   :  { %5040 = vmatprep.subr.bf16.mxu0 %v6001_v29  ;;  %5069 = vmatprep.subr.bf16.mxu1 %v7063_v52 }
 0x4fb   :  { %5042 = vmatpush1.bf16.msra.mxu0 %v7066_v30  ;;  %5071 = vmatpush3.bf16.msra.mxu1 %v7067_v59 }
 0x4fc   :  { %5044 = vmatprep.subr.bf16.mxu0 %v7068_v3  ;;  %5072 = vmatprep.subr.bf16.mxu1 %v7063_v52 }
 0x4ff   :  { %5046 = vmatpush1.bf16.msra.mxu0 %v7069_v46  ;;  %5074 = vmatpush3.bf16.msra.mxu1 %v7070_v62 }
 0x500   :  { %5048 = vmatprep.subr.bf16.mxu0 %v7071_v39  ;;  %5075 = vmatprep.subr.bf16.mxu1 %v7063_v52 }
 0x503   :  { %5050 = vmatpush1.bf16.msra.mxu0 %v7072_v40  ;;  %5077 = vmatpush3.bf16.msra.mxu1 %v7073_v60 }
 0x504   :  { %5052 = vmatprep.subr.bf16.mxu0 %v7124_v13  ;;  %5078 = vmatprep.subr.bf16.mxu1 %v7063_v52  ;;  %v7137_v13 = vld [vmem:[#allocation47_spill] sm:$0xff] }
 0x507   :  { %5054 = vmatpush1.bf16.msra.mxu0 %v7125_v48  ;;  %5080 = vmatpush3.bf16.msra.mxu1 %v7126_v15 }
 0x508   :  { %5056 = vmatprep.subr.bf16.mxu0 %v7127_v43  ;;  %5081 = vmatprep.subr.bf16.mxu1 %v7063_v52 }
 0x50b   :  { %5058 = vmatpush1.bf16.msra.mxu0 %v7128_v33  ;;  %5083 = vmatpush3.bf16.msra.mxu1 %v7129_v9 }
 0x50c   :  { %5060 = vmatprep.subr.bf16.mxu0 %v7130_v22  ;;  %5084 = vmatprep.subr.bf16.mxu1 %v7063_v52 }
 0x50f   :  { %5062 = vmatpush1.bf16.msra.mxu0 %v7131_v26  ;;  %5086 = vmatpush3.bf16.msra.mxu1 %v7132_v16 }
 0x510   :  { %5088 = vmatprep.subr.bf16.mxu1 %v7133_v2  ;;  %5119 = vmatprep.subr.bf16.mxu0 %v7063_v52  ;;  %v7136_v2 = vld [vmem:[#allocation70_spill] sm:$0xff] }
 0x59f   :  { %v2169_v12 = vpop.f32.mrb[8].mxu0  ;;  %v2240_v53 = vpop.f32.mrb[32].mxu1 }
 0x5a0   :  { %v5384_v44 = vadd.f32 %v7134_v6, %v2169_v12  ;;  %v2171_v58 = vpop.f32.mrb[9].mxu0  ;;  %v4129_v37 = vpop.f32.mrb[33].mxu1  ;;  %v2241_v43 = vadd.f32 %v2240_v53, %v7136_v2 }
 0x5a1   :  { %v5386_v7 = vadd.f32 %v7135_v54, %v2171_v58 }
 0x5a2   :  { %v3527_v17 = vmul.f32 -1.442695, %v5384_v44 }
 0x5a3   :  { %v3528_v22 = vmul.f32 -1.442695, %v5386_v7 }
 0x5a4   :  { %5511 = vpow2.f32 %v3527_v17 }
 0x5a5   :  { %5513 = vpow2.f32 %v3528_v22 }
 0x5ae   :  { %v5512_v9 = vpop.eup %5511 }
 0x5af   :  { %v2248_v26 = vadd.f32 1.0, %v5512_v9  ;;  %v5514_v16 = vpop.eup %5513 }
 0x5b0   :  { %v2255_v33 = vadd.f32 1.0, %v5514_v16  ;;  %v7139_v16 = vld [vmem:[#allocation60_spill] sm:$0xff] }
 0x5b1   :  { %5515 = vrcp.f32 %v2248_v26  ;;  %v7138_v26 = vld [vmem:[#allocation46_spill] sm:$0xff] }
 0x5b2   :  { %5517 = vrcp.f32 %v2255_v33 }
 0x5bb   :  { %v5516_v15 = vpop.eup %5515 }
 0x5bc   :  { %v2258_v48 = vmul.f32 %v5516_v15, %v2241_v43  ;;  %v5518_v6 = vpop.eup %5517 }
 0x5bd   :  { %v2261_v53 = vsub.f32 1.0, %v5518_v6 }
 0x5be   :  { %v2259_v12 = vadd.f32 %v2258_v48, %v7137_v13  ;;  %v2263_v13 = vmul.f32 %v5518_v6, %v6579_v35 }
 0x5c0   :  { %5519 = vtanh.f32 %v2259_v12 }
 0x5c5   :  { %v2335_v37 = vpop.f32.mrb[34].mxu1  ;;  %v2406_v44 = vpop.f32.mrb[40].mxu0 }
 0x5c6   :  { %v2336_v58 = vadd.f32 %v2335_v37, %v6285_v36  ;;  %v2337_v7 = vpop.f32.mrb[35].mxu1  ;;  %v4164_v22 = vpop.f32.mrb[41].mxu0 }
 0x5c7   :  { %v2338_v9 = vadd.f32 %v2337_v7, %v6287_v5 }
 0x5c8   :  { %v2410_v17 = vadd.f32 %v2336_v58, %v7138_v26  ;;  %v2407_v58 = vadd.f32 %v2406_v44, %v6304_v23 }
 0x5c9   :  { %v2417_v54 = vadd.f32 %v2338_v9, %v7139_v16  ;;  %v7140_v9 = vld [vmem:[#allocation61_spill] sm:$0xff] }
 0x5ca   :  { %v5520_v2 = vpop.eup %5519  ;;  %v3529_v15 = vmul.f32 -1.442695, %v2410_v17 }
 0x5cb   :  { %v2262_v43 = vmul.f32 %v5520_v2, %v2261_v53  ;;  %v3530_v33 = vmul.f32 -1.442695, %v2417_v54 }
 0x5cc   :  { %5521 = vpow2.f32 %v3529_v15 }
 0x5cd   :  { %v6669_v48 = vadd.f32 %v2263_v13, %v2262_v43  ;;  %5523 = vpow2.f32 %v3530_v33  ;;  %v7143_v33 = vld [vmem:[#allocation25_spill] sm:$0xff] }
 0x5cf   :  { %2504 = vmatmul.mubr.f32.vlgmr.msra.gmra.mrb[10].mxu0 %v6669_v48  ;;  %v3464_v12 = vadd.f32 %v6669_v48, %v6621_v49  ;;  %4198 = vmatmul.mubr.f32.vlgmr.msra.gmra.mrb[36].mxu1 %v6669_v48 }
 0x5d0   :  { %5090 = vmatpush1.bf16.msra.mxu1 %v5982_v14  ;;  %5121 = vmatpush3.bf16.msra.mxu0 %v6091_v41 }
 0x5d1   :  { %3472 = vst [vmem:[#allocation14 + $0x20] sm:$0xff] %v3464_v12  ;;  %5092 = vmatprep.subr.bf16.mxu1 %v5989_v19  ;;  %5122 = vmatprep.subr.bf16.mxu0 %v7063_v52  ;;  %v7144_v12 = vld [vmem:[#allocation36_spill] sm:$0xff] }
 0x5d2   :  { %2669 = vmatprep.mubr.f32.mxu1 %v7064_v0  ;;  %4232 = vmatprep.mubr.msk.f32.mxu0 %vm5768_vm0, %v7064_v0 }
 0x5d4   :  { %5094 = vmatpush1.bf16.msra.mxu1 %v5999_v28  ;;  %5124 = vmatpush3.bf16.msra.mxu0 %v6101_v55 }
 0x5d5   :  { %5096 = vmatprep.subr.bf16.mxu1 %v6005_v34  ;;  %5125 = vmatprep.subr.bf16.mxu0 %v7063_v52 }
 0x5d6   :  { %v5522_v54 = vpop.eup %5521 }
 0x5d7   :  { %v2414_v2 = vadd.f32 1.0, %v5522_v54  ;;  %v5524_v6 = vpop.eup %5523  ;;  %v7145_v54 = vld [vmem:[#allocation37_spill] sm:$0xff] }
 0x5d8   :  { %5098 = vmatpush1.bf16.msra.mxu1 %v6015_v42  ;;  %5127 = vmatpush3.bf16.msra.mxu0 %v6111_v47  ;;  %v2421_v37 = vadd.f32 1.0, %v5524_v6  ;;  %v7147_v6 = vld [vmem:[#allocation38_spill] sm:$0xff] }
 0x5d9   :  { %5525 = vrcp.f32 %v2414_v2  ;;  %5100 = vmatprep.subr.bf16.mxu1 %v6020_v50  ;;  %5128 = vmatprep.subr.bf16.mxu0 %v7063_v52  ;;  %v7146_v2 = vld [vmem:[#allocation26_spill] sm:$0xff] }
 0x5da   :  { %5527 = vrcp.f32 %v2421_v37  ;;  %v7148_v37 = vld [vmem:[#allocation39_spill] sm:$0xff] }
 0x5dc   :  { %5102 = vmatpush1.bf16.msra.mxu1 %v6029_v61  ;;  %5130 = vmatpush3.bf16.msra.mxu0 %v6117_v51 }
 0x5dd   :  { %5104 = vmatprep.subr.bf16.mxu1 %v6034_v1  ;;  %5131 = vmatprep.subr.bf16.mxu0 %v7063_v52 }
 0x5e0   :  { %5106 = vmatpush1.bf16.msra.mxu1 %v6043_v20  ;;  %5133 = vmatpush3.bf16.msra.mxu0 %v6123_v57 }
 0x5e1   :  { %5108 = vmatprep.subr.bf16.mxu1 %v6048_v11  ;;  %5134 = vmatprep.subr.bf16.mxu0 %v7063_v52 }
 0x5e3   :  { %v5526_v7 = vpop.eup %5525 }
 0x5e4   :  { %v2424_v22 = vmul.f32 %v5526_v7, %v2407_v58  ;;  %5110 = vmatpush1.bf16.msra.mxu1 %v6057_v38  ;;  %5136 = vmatpush3.bf16.msra.mxu0 %v6129_v8  ;;  %v5528_v44 = vpop.eup %5527  ;;  %v7149_v58 = vld [vmem:[#allocation27_spill] sm:$0xff]  ;;  %v7150_v7 = vld [vmem:[#allocation28_spill] sm:$0xff] }
 0x5e5   :  { %5112 = vmatprep.subr.bf16.mxu1 %v6062_v21  ;;  %5137 = vmatprep.subr.bf16.mxu0 %v7063_v52  ;;  %v2427_v17 = vsub.f32 1.0, %v5528_v44  ;;  %v2429_v15 = vmul.f32 %v5528_v44, %v6621_v49  ;;  %v7142_v49 = vld [vmem:[#allocation35_spill] sm:$0xff] }
 0x5e6   :  { %v2425_v26 = vadd.f32 %v2424_v22, %v7140_v9 }
 0x5e8   :  { %5529 = vtanh.f32 %v2425_v26  ;;  %5114 = vmatpush1.bf16.msra.mxu1 %v6071_v4  ;;  %5139 = vmatpush3.bf16.msra.mxu0 %v6135_v25  ;;  %v7151_v26 = vld [vmem:[#allocation68_spill] sm:$0xff] }
 0x5e9   :  { %5116 = vmatprep.subr.bf16.mxu1 %v6076_v31  ;;  %5140 = vmatprep.subr.bf16.mxu0 %v7063_v52 }
 0x5ec   :  { %5118 = vmatpush1.bf16.msra.mxu1 %v6085_v24  ;;  %5142 = vmatpush3.bf16.msra.mxu0 %v6141_v32 }
 0x5ed   :  { %5144 = vmatprep.subr.bf16.mxu0 %v5969_v63  ;;  %5175 = vmatprep.subr.bf16.mxu1 %v7063_v52 }
 0x5f2   :  { %v5530_v16 = vpop.eup %5529 }
 0x5f3   :  { %v2428_v53 = vmul.f32 %v5530_v16, %v2427_v17 }
 0x5f5   :  { %v6713_v43 = vadd.f32 %v2429_v15, %v2428_v53  ;;  %v7152_v15 = vld [vmem:[#allocation69_spill] sm:$0xff] }
 0x5f7   :  { %2670 = vmatmul.mubr.f32.vlgmr.msra.gmra.mrb[38].mxu1 %v6713_v43  ;;  %v3463_v13 = vadd.f32 %v6713_v43, %v6579_v35  ;;  %4233 = vmatmul.mubr.f32.vlgmr.msra.gmra.mrb[42].mxu0 %v6713_v43  ;;  %v7141_v35 = vld [vmem:[#allocation34_spill] sm:$0xff] }
 0x5f8   :  { %5146 = vmatpush1.bf16.msra.mxu0 %v5976_v10  ;;  %5177 = vmatpush3.bf16.msra.mxu1 %v5897_v45 }
 0x5f9   :  { %3471 = vst [vmem:[#allocation14 + $0x18] sm:$0xff] %v3463_v13  ;;  %5148 = vmatprep.subr.bf16.mxu0 %v5987_v18  ;;  %5178 = vmatprep.subr.bf16.mxu1 %v7063_v52 }
 0x5fa   :  { %2839 = vmatprep.mubr.f32.mxu0 %v7064_v0  ;;  %4267 = vmatprep.mubr.msk.f32.mxu1 %vm5768_vm0, %v7064_v0 }
 0x5fc   :  { %5150 = vmatpush1.bf16.msra.mxu0 %v5995_v27  ;;  %5180 = vmatpush3.bf16.msra.mxu1 %v5906_v56 }
 0x5fd   :  { %5152 = vmatprep.subr.bf16.mxu0 %v6001_v29  ;;  %5181 = vmatprep.subr.bf16.mxu1 %v7063_v52 }
 0x600   :  { %5154 = vmatpush1.bf16.msra.mxu0 %v7066_v30  ;;  %5183 = vmatpush3.bf16.msra.mxu1 %v7067_v59 }
 0x601   :  { %5156 = vmatprep.subr.bf16.mxu0 %v7068_v3  ;;  %5184 = vmatprep.subr.bf16.mxu1 %v7063_v52 }
 0x604   :  { %5158 = vmatpush1.bf16.msra.mxu0 %v7069_v46  ;;  %5186 = vmatpush3.bf16.msra.mxu1 %v7070_v62 }
 0x605   :  { %5160 = vmatprep.subr.bf16.mxu0 %v7071_v39  ;;  %5187 = vmatprep.subr.bf16.mxu1 %v7063_v52 }
 0x608   :  { %5162 = vmatpush1.bf16.msra.mxu0 %v7072_v40  ;;  %5189 = vmatpush3.bf16.msra.mxu1 %v7073_v60 }
 0x609   :  { %5164 = vmatprep.subr.bf16.mxu0 %v7141_v35  ;;  %5190 = vmatprep.subr.bf16.mxu1 %v7063_v52  ;;  %v7154_v35 = vld [vmem:[#allocation49_spill] sm:$0xff] }
 0x60c   :  { %5166 = vmatpush1.bf16.msra.mxu0 %v7142_v49  ;;  %5192 = vmatpush3.bf16.msra.mxu1 %v7143_v33 }
 0x60d   :  { %5168 = vmatprep.subr.bf16.mxu0 %v7144_v12  ;;  %5193 = vmatprep.subr.bf16.mxu1 %v7063_v52 }
 0x610   :  { %5170 = vmatpush1.bf16.msra.mxu0 %v7145_v54  ;;  %5195 = vmatpush3.bf16.msra.mxu1 %v7146_v2 }
 0x611   :  { %5172 = vmatprep.subr.bf16.mxu0 %v7147_v6  ;;  %5196 = vmatprep.subr.bf16.mxu1 %v7063_v52 }
 0x614   :  { %5174 = vmatpush1.bf16.msra.mxu0 %v7148_v37  ;;  %5198 = vmatpush3.bf16.msra.mxu1 %v7149_v58 }
 0x615   :  { %5200 = vmatprep.subr.bf16.mxu1 %v7150_v7  ;;  %5231 = vmatprep.subr.bf16.mxu0 %v7063_v52  ;;  %v7153_v7 = vld [vmem:[#allocation70_spill] sm:$0xff] }
 0x6a2   :  { %v2505_v22 = vpop.f32.mrb[10].mxu0  ;;  %v2576_v9 = vpop.f32.mrb[36].mxu1 }
 0x6a3   :  { %v5388_v44 = vadd.f32 %v7151_v26, %v2505_v22  ;;  %v2507_v17 = vpop.f32.mrb[11].mxu0  ;;  %v4199_v16 = vpop.f32.mrb[37].mxu1  ;;  %v2577_v12 = vadd.f32 %v2576_v9, %v7153_v7  ;;  %v7156_v9 = vld [vmem:[#allocation58_spill] sm:$0xff] }
 0x6a4   :  { %v5390_v13 = vadd.f32 %v7152_v15, %v2507_v17 }
 0x6a5   :  { %v3531_v53 = vmul.f32 -1.442695, %v5388_v44 }
 0x6a6   :  { %v3532_v6 = vmul.f32 -1.442695, %v5390_v13 }
 0x6a7   :  { %5531 = vpow2.f32 %v3531_v53 }
 0x6a8   :  { %5533 = vpow2.f32 %v3532_v6 }
 0x6b1   :  { %v5532_v2 = vpop.eup %5531 }
 0x6b2   :  { %v2584_v37 = vadd.f32 1.0, %v5532_v2  ;;  %v5534_v58 = vpop.eup %5533 }
 0x6b3   :  { %v2591_v54 = vadd.f32 1.0, %v5534_v58  ;;  %v7155_v58 = vld [vmem:[#allocation44_spill] sm:$0xff] }
 0x6b4   :  { %5535 = vrcp.f32 %v2584_v37 }
 0x6b5   :  { %5537 = vrcp.f32 %v2591_v54  ;;  %v7157_v54 = vld [vmem:[#allocation30_spill] sm:$0xff] }
 0x6be   :  { %v5536_v33 = vpop.eup %5535 }
 0x6bf   :  { %v2594_v49 = vmul.f32 %v5536_v33, %v2577_v12  ;;  %v5538_v16 = vpop.eup %5537 }
 0x6c0   :  { %v2597_v37 = vsub.f32 1.0, %v5538_v16  ;;  %v2599_v12 = vmul.f32 %v5538_v16, %v6669_v48 }
 0x6c1   :  { %v2595_v22 = vadd.f32 %v2594_v49, %v7154_v35 }
 0x6c3   :  { %5539 = vtanh.f32 %v2595_v22 }
 0x6ca   :  { %v2671_v44 = vpop.f32.mrb[38].mxu1  ;;  %v2742_v26 = vpop.f32.mrb[42].mxu0 }
 0x6cb   :  { %v2672_v17 = vadd.f32 %v2671_v44, %v6285_v36  ;;  %v2673_v53 = vpop.f32.mrb[39].mxu1  ;;  %v4234_v6 = vpop.f32.mrb[43].mxu0 }
 0x6cc   :  { %v2674_v2 = vadd.f32 %v2673_v53, %v6287_v5 }
 0x6cd   :  { %v5540_v13 = vpop.eup %5539  ;;  %v2746_v15 = vadd.f32 %v2672_v17, %v7155_v58  ;;  %v2743_v17 = vadd.f32 %v2742_v26, %v6304_v23 }
 0x6ce   :  { %v2753_v7 = vadd.f32 %v2674_v2, %v7156_v9  ;;  %v2598_v33 = vmul.f32 %v5540_v13, %v2597_v37  ;;  %v7158_v2 = vld [vmem:[#allocation59_spill] sm:$0xff] }
 0x6cf   :  { %v3533_v35 = vmul.f32 -1.442695, %v2746_v15 }
 0x6d0   :  { %v6763_v49 = vadd.f32 %v2599_v12, %v2598_v33  ;;  %v3534_v44 = vmul.f32 -1.442695, %v2753_v7 }
 0x6d1   :  { %5541 = vpow2.f32 %v3533_v35  ;;  %v7159_v35 = vld [vmem:[#allocation22_spill] sm:$0xff] }
 0x6d2   :  { %2840 = vmatmul.mubr.f32.vlgmr.msra.gmra.mrb[12].mxu0 %v6763_v49  ;;  %v3465_v22 = vadd.f32 %v6763_v49, %v7157_v54  ;;  %4268 = vmatmul.mubr.f32.vlgmr.msra.gmra.mrb[40].mxu1 %v6763_v49  ;;  %5543 = vpow2.f32 %v3534_v44  ;;  %v7171_v44 = vld [vmem:[#allocation69_spill] sm:$0xff] }
 0x6d3   :  { %5202 = vmatpush1.bf16.msra.mxu1 %v5982_v14  ;;  %5233 = vmatpush3.bf16.msra.mxu0 %v6091_v41 }
 0x6d4   :  { %3473 = vst [vmem:[#allocation14 + $0x28] sm:$0xff] %v3465_v22  ;;  %5204 = vmatprep.subr.bf16.mxu1 %v5989_v19  ;;  %5234 = vmatprep.subr.bf16.mxu0 %v7063_v52 }
 0x6d5   :  { %3005 = vmatprep.mubr.f32.mxu1 %v7064_v0  ;;  %4302 = vmatprep.mubr.msk.f32.mxu0 %vm5768_vm0, %v7064_v0 }
 0x6d7   :  { %5206 = vmatpush1.bf16.msra.mxu1 %v5999_v28  ;;  %5236 = vmatpush3.bf16.msra.mxu0 %v6101_v55 }
 0x6d8   :  { %5208 = vmatprep.subr.bf16.mxu1 %v6005_v34  ;;  %5237 = vmatprep.subr.bf16.mxu0 %v7063_v52 }
 0x6db   :  { %v5542_v48 = vpop.eup %5541  ;;  %5210 = vmatpush1.bf16.msra.mxu1 %v6015_v42  ;;  %5239 = vmatpush3.bf16.msra.mxu0 %v6111_v47 }
 0x6dc   :  { %v2750_v7 = vadd.f32 1.0, %v5542_v48  ;;  %5212 = vmatprep.subr.bf16.mxu1 %v6020_v50  ;;  %5240 = vmatprep.subr.bf16.mxu0 %v7063_v52  ;;  %v5544_v15 = vpop.eup %5543 }
 0x6dd   :  { %v2757_v16 = vadd.f32 1.0, %v5544_v15 }
 0x6de   :  { %5545 = vrcp.f32 %v2750_v7 }
 0x6df   :  { %5214 = vmatpush1.bf16.msra.mxu1 %v6029_v61  ;;  %5242 = vmatpush3.bf16.msra.mxu0 %v6117_v51  ;;  %5547 = vrcp.f32 %v2757_v16 }
 0x6e0   :  { %5216 = vmatprep.subr.bf16.mxu1 %v6034_v1  ;;  %5243 = vmatprep.subr.bf16.mxu0 %v7063_v52 }
 0x6e3   :  { %5218 = vmatpush1.bf16.msra.mxu1 %v6043_v20  ;;  %5245 = vmatpush3.bf16.msra.mxu0 %v6123_v57 }
 0x6e4   :  { %5220 = vmatprep.subr.bf16.mxu1 %v6048_v11  ;;  %5246 = vmatprep.subr.bf16.mxu0 %v7063_v52 }
 0x6e7   :  { %5222 = vmatpush1.bf16.msra.mxu1 %v6057_v38  ;;  %5248 = vmatpush3.bf16.msra.mxu0 %v6129_v8 }
 0x6e8   :  { %v5546_v53 = vpop.eup %5545  ;;  %5224 = vmatprep.subr.bf16.mxu1 %v6062_v21  ;;  %5249 = vmatprep.subr.bf16.mxu0 %v7063_v52 }
 0x6e9   :  { %v2760_v6 = vmul.f32 %v5546_v53, %v2743_v17  ;;  %v5548_v26 = vpop.eup %5547 }
 0x6ea   :  { %v2763_v13 = vsub.f32 1.0, %v5548_v26  ;;  %v2765_v33 = vmul.f32 %v5548_v26, %v6713_v43 }
 0x6eb   :  { %v2761_v37 = vadd.f32 %v2760_v6, %v7158_v2  ;;  %5226 = vmatpush1.bf16.msra.mxu1 %v6071_v4  ;;  %5251 = vmatpush3.bf16.msra.mxu0 %v6135_v25  ;;  %v7172_v6 = vld [vmem:[#allocation70_spill] sm:$0xff] }
 0x6ec   :  { %5228 = vmatprep.subr.bf16.mxu1 %v6076_v31  ;;  %5252 = vmatprep.subr.bf16.mxu0 %v7063_v52 }
 0x6ed   :  { %5549 = vtanh.f32 %v2761_v37 }
 0x6ef   :  { %5230 = vmatpush1.bf16.msra.mxu1 %v6085_v24  ;;  %5254 = vmatpush3.bf16.msra.mxu0 %v6141_v32 }
 0x6f0   :  { %5256 = vmatprep.subr.bf16.mxu0 %v5969_v63  ;;  %5287 = vmatprep.subr.bf16.mxu1 %v7063_v52  ;;  %v7162_v63 = vld [vmem:[#allocation25_spill] sm:$0xff] }
 0x6f7   :  { %v5550_v58 = vpop.eup %5549 }
 0x6f8   :  { %v2764_v9 = vmul.f32 %v5550_v58, %v2763_v13  ;;  %v7173_v13 = vld [vmem:[#allocation51_spill] sm:$0xff] }
 0x6fa   :  { %v6807_v12 = vadd.f32 %v2765_v33, %v2764_v9 }
 0x6fc   :  { %3006 = vmatmul.mubr.f32.vlgmr.msra.gmra.mrb[42].mxu1 %v6807_v12  ;;  %v3462_v54 = vadd.f32 %v6807_v12, %v7159_v35  ;;  %4303 = vmatmul.mubr.f32.vlgmr.msra.gmra.mrb[44].mxu0 %v6807_v12 }
 0x6fd   :  { %5258 = vmatpush1.bf16.msra.mxu0 %v5976_v10  ;;  %5289 = vmatpush3.bf16.msra.mxu1 %v5897_v45  ;;  %v7160_v45 = vld [vmem:[#allocation34_spill] sm:$0xff]  ;;  %v7163_v10 = vld [vmem:[#allocation36_spill] sm:$0xff] }
 0x6fe   :  { %3470 = vst [vmem:[#allocation14 + $0x10] sm:$0xff] %v3462_v54  ;;  %5260 = vmatprep.subr.bf16.mxu0 %v5987_v18  ;;  %5290 = vmatprep.subr.bf16.mxu1 %v7063_v52  ;;  %v7164_v18 = vld [vmem:[#allocation37_spill] sm:$0xff] }
 0x6ff   :  { %3175 = vmatprep.mubr.f32.mxu0 %v7064_v0  ;;  %4337 = vmatprep.mubr.msk.f32.mxu1 %vm5768_vm0, %v7064_v0 }
 0x701   :  { %5262 = vmatpush1.bf16.msra.mxu0 %v5995_v27  ;;  %5292 = vmatpush3.bf16.msra.mxu1 %v5906_v56  ;;  %v7161_v56 = vld [vmem:[#allocation35_spill] sm:$0xff]  ;;  %v7165_v27 = vld [vmem:[#allocation26_spill] sm:$0xff] }
 0x702   :  { %5264 = vmatprep.subr.bf16.mxu0 %v6001_v29  ;;  %5293 = vmatprep.subr.bf16.mxu1 %v7063_v52  ;;  %v7166_v29 = vld [vmem:[#allocation38_spill] sm:$0xff] }
 0x705   :  { %5266 = vmatpush1.bf16.msra.mxu0 %v7066_v30  ;;  %5295 = vmatpush3.bf16.msra.mxu1 %v7067_v59  ;;  %v7167_v30 = vld [vmem:[#allocation39_spill] sm:$0xff] }
 0x706   :  { %5268 = vmatprep.subr.bf16.mxu0 %v7068_v3  ;;  %5296 = vmatprep.subr.bf16.mxu1 %v7063_v52  ;;  %v7168_v59 = vld [vmem:[#allocation27_spill] sm:$0xff]  ;;  %v7169_v3 = vld [vmem:[#allocation28_spill] sm:$0xff] }
 0x709   :  { %5270 = vmatpush1.bf16.msra.mxu0 %v7069_v46  ;;  %5298 = vmatpush3.bf16.msra.mxu1 %v7070_v62 }
 0x70a   :  { %5272 = vmatprep.subr.bf16.mxu0 %v7071_v39  ;;  %5299 = vmatprep.subr.bf16.mxu1 %v7063_v52  ;;  %v7170_v39 = vld [vmem:[#allocation68_spill] sm:$0xff] }
 0x70d   :  { %5274 = vmatpush1.bf16.msra.mxu0 %v7072_v40  ;;  %5301 = vmatpush3.bf16.msra.mxu1 %v7073_v60 }
 0x70e   :  { %5276 = vmatprep.subr.bf16.mxu0 %v7160_v45  ;;  %5302 = vmatprep.subr.bf16.mxu1 %v7063_v52 }
 0x711   :  { %5278 = vmatpush1.bf16.msra.mxu0 %v7161_v56  ;;  %5304 = vmatpush3.bf16.msra.mxu1 %v7162_v63 }
 0x712   :  { %5280 = vmatprep.subr.bf16.mxu0 %v7163_v10  ;;  %5305 = vmatprep.subr.bf16.mxu1 %v7063_v52 }
 0x715   :  { %5282 = vmatpush1.bf16.msra.mxu0 %v7164_v18  ;;  %5307 = vmatpush3.bf16.msra.mxu1 %v7165_v27 }
 0x716   :  { %5284 = vmatprep.subr.bf16.mxu0 %v7166_v29  ;;  %5308 = vmatprep.subr.bf16.mxu1 %v7063_v52 }
 0x719   :  { %5286 = vmatpush1.bf16.msra.mxu0 %v7167_v30  ;;  %5310 = vmatpush3.bf16.msra.mxu1 %v7168_v59  ;;  %v7174_v30 = vld [vmem:[#allocation42_spill] sm:$0xff] }
 0x71a   :  { %5312 = vmatprep.subr.bf16.mxu1 %v7169_v3  ;;  %5343 = vmatprep.subr.bf16.mxu0 %v7063_v52  ;;  %v7175_v3 = vld [vmem:[#allocation56_spill] sm:$0xff] }
 0x7a5   :  { %v2841_v46 = vpop.f32.mrb[12].mxu0  ;;  %v2912_v62 = vpop.f32.mrb[40].mxu1 }
 0x7a6   :  { %v5392_v40 = vadd.f32 %v7170_v39, %v2841_v46  ;;  %v2843_v60 = vpop.f32.mrb[13].mxu0  ;;  %v4269_v43 = vpop.f32.mrb[41].mxu1  ;;  %v2913_v2 = vadd.f32 %v2912_v62, %v7172_v6 }
 0x7a7   :  { %v5394_v48 = vadd.f32 %v7171_v44, %v2843_v60  ;;  %v7176_v60 = vld [vmem:[#allocation29_spill] sm:$0xff] }
 0x7a8   :  { %v3535_v22 = vmul.f32 -1.442695, %v5392_v40 }
 0x7a9   :  { %v3536_v7 = vmul.f32 -1.442695, %v5394_v48 }
 0x7aa   :  { %5551 = vpow2.f32 %v3535_v22 }
 0x7ab   :  { %5553 = vpow2.f32 %v3536_v7 }
 0x7b4   :  { %v5552_v15 = vpop.eup %5551 }
 0x7b5   :  { %v2920_v16 = vadd.f32 1.0, %v5552_v15  ;;  %v5554_v17 = vpop.eup %5553 }
 0x7b6   :  { %v2927_v53 = vadd.f32 1.0, %v5554_v17 }
 0x7b7   :  { %5555 = vrcp.f32 %v2920_v16 }
 0x7b8   :  { %5557 = vrcp.f32 %v2927_v53  ;;  %v7178_v53 = vld [vmem:[#allocation53_spill] sm:$0xff] }
 0x7c1   :  { %v5556_v37 = vpop.eup %5555 }
 0x7c2   :  { %v2930_v26 = vmul.f32 %v5556_v37, %v2913_v2  ;;  %v5558_v9 = vpop.eup %5557 }
 0x7c3   :  { %v2933_v54 = vsub.f32 1.0, %v5558_v9  ;;  %v2935_v29 = vmul.f32 %v5558_v9, %v6763_v49 }
 0x7c4   :  { %v2931_v58 = vadd.f32 %v2930_v26, %v7173_v13 }
 0x7c6   :  { %5559 = vtanh.f32 %v2931_v58 }
 0x7cf   :  { %v3007_v33 = vpop.f32.mrb[42].mxu1  ;;  %v3078_v35 = vpop.f32.mrb[44].mxu0 }
 0x7d0   :  { %v5560_v45 = vpop.eup %5559  ;;  %v3008_v56 = vadd.f32 %v3007_v33, %v6285_v36  ;;  %v3009_v63 = vpop.f32.mrb[43].mxu1 }
 0x7d1   :  { %v4304_v10 = vpop.f32.mrb[45].mxu0  ;;  %v3010_v18 = vadd.f32 %v3009_v63, %v6287_v5  ;;  %v2934_v27 = vmul.f32 %v5560_v45, %v2933_v54 }
 0x7d2   :  { %v3082_v59 = vadd.f32 %v3008_v56, %v7174_v30  ;;  %v7179_v56 = vld [vmem:[#allocation40_spill] sm:$0xff]  ;;  %v7180_v10 = vld [vmem:[#allocation71_spill] sm:$0xff] }
 0x7d3   :  { %v3089_v46 = vadd.f32 %v3010_v18, %v7175_v3  ;;  %v6857_v62 = vadd.f32 %v2935_v29, %v2934_v27  ;;  %v7181_v27 = vld [vmem:[#allocation54_spill] sm:$0xff] }
 0x7d4   :  { %v3537_v40 = vmul.f32 -1.442695, %v3082_v59 }
 0x7d5   :  { %3176 = vmatmul.mubr.f32.vlgmr.msra.gmra.mrb[14].mxu0 %v6857_v62  ;;  %v3466_v43 = vadd.f32 %v6857_v62, %v7176_v60  ;;  %4338 = vmatmul.mubr.f32.vlgmr.msra.gmra.mrb[44].mxu1 %v6857_v62  ;;  %v3538_v49 = vmul.f32 -1.442695, %v3089_v46 }
 0x7d6   :  { %5561 = vpow2.f32 %v3537_v40  ;;  %5314 = vmatpush1.bf16.msra.mxu1 %v5982_v14  ;;  %5345 = vmatpush3.bf16.msra.mxu0 %v6091_v41 }
 0x7d7   :  { %3474 = vst [vmem:[#allocation14 + $0x30] sm:$0xff] %v3466_v43  ;;  %5316 = vmatprep.subr.bf16.mxu1 %v5989_v19  ;;  %5346 = vmatprep.subr.bf16.mxu0 %v7063_v52  ;;  %5563 = vpow2.f32 %v3538_v49  ;;  %v7182_v43 = vld [vmem:[#allocation55_spill] sm:$0xff] }
 0x7d8   :  { %3340 = vmatprep.mubr.f32.mxu1 %v7064_v0  ;;  %4372 = vmatprep.mubr.msk.f32.mxu0 %vm5768_vm0, %v7064_v0 }
 0x7da   :  { %5318 = vmatpush1.bf16.msra.mxu1 %v5999_v28  ;;  %5348 = vmatpush3.bf16.msra.mxu0 %v6101_v55 }
 0x7db   :  { %5320 = vmatprep.subr.bf16.mxu1 %v6005_v34  ;;  %5349 = vmatprep.subr.bf16.mxu0 %v7063_v52 }
 0x7de   :  { %5322 = vmatpush1.bf16.msra.mxu1 %v6015_v42  ;;  %5351 = vmatpush3.bf16.msra.mxu0 %v6111_v47  ;;  %v3079_v42 = vadd.f32 %v3078_v35, %v6304_v23  ;;  %v3445_v47 = vld [vmem:[#allocation14 + $0x8] sm:$0xff] }
 0x7df   :  { %5324 = vmatprep.subr.bf16.mxu1 %v6020_v50  ;;  %5352 = vmatprep.subr.bf16.mxu0 %v7063_v52 }
 0x7e0   :  { %v5562_v14 = vpop.eup %5561 }
 0x7e1   :  { %v3086_v19 = vadd.f32 1.0, %v5562_v14  ;;  %v5564_v28 = vpop.eup %5563 }
 0x7e2   :  { %5326 = vmatpush1.bf16.msra.mxu1 %v6029_v61  ;;  %5354 = vmatpush3.bf16.msra.mxu0 %v6117_v51  ;;  %v3093_v34 = vadd.f32 1.0, %v5564_v28 }
 0x7e3   :  { %5565 = vrcp.f32 %v3086_v19  ;;  %5328 = vmatprep.subr.bf16.mxu1 %v6034_v1  ;;  %5355 = vmatprep.subr.bf16.mxu0 %v7063_v52  ;;  %v7177_v1 = vld [vmem:[#allocation57_spill] sm:$0xff] }
 0x7e4   :  { %5567 = vrcp.f32 %v3093_v34 }
 0x7e6   :  { %5330 = vmatpush1.bf16.msra.mxu1 %v6043_v20  ;;  %5357 = vmatpush3.bf16.msra.mxu0 %v6123_v57 }
 0x7e7   :  { %5332 = vmatprep.subr.bf16.mxu1 %v6048_v11  ;;  %5358 = vmatprep.subr.bf16.mxu0 %v7063_v52 }
 0x7ea   :  { %5334 = vmatpush1.bf16.msra.mxu1 %v6057_v38  ;;  %5360 = vmatpush3.bf16.msra.mxu0 %v6129_v8 }
 0x7eb   :  { %5336 = vmatprep.subr.bf16.mxu1 %v6062_v21  ;;  %5361 = vmatprep.subr.bf16.mxu0 %v7063_v52 }
 0x7ed   :  { %v5566_v50 = vpop.eup %5565 }
 0x7ee   :  { %v3096_v61 = vmul.f32 %v5566_v50, %v3079_v42  ;;  %5338 = vmatpush1.bf16.msra.mxu1 %v6071_v4  ;;  %5363 = vmatpush3.bf16.msra.mxu0 %v6135_v25  ;;  %v5568_v11 = vpop.eup %5567 }
 0x7ef   :  { %5340 = vmatprep.subr.bf16.mxu1 %v6076_v31  ;;  %5364 = vmatprep.subr.bf16.mxu0 %v7063_v52  ;;  %v3099_v38 = vsub.f32 1.0, %v5568_v11  ;;  %v3101_v55 = vmul.f32 %v5568_v11, %v6807_v12 }
 0x7f0   :  { %v3097_v20 = vadd.f32 %v3096_v61, %v7177_v1  ;;  %v3444_v61 = vld [vmem:[#allocation14] sm:$0xff] }
 0x7f2   :  { %5569 = vtanh.f32 %v3097_v20  ;;  %5342 = vmatpush1.bf16.msra.mxu1 %v6085_v24  ;;  %5366 = vmatpush3.bf16.msra.mxu0 %v6141_v32 }
 0x7fc   :  { %v5570_v21 = vpop.eup %5569 }
 0x7fd   :  { %v3100_v41 = vmul.f32 %v5570_v21, %v3099_v38 }
 0x7ff   :  { %v6899_v4 = vadd.f32 %v3101_v55, %v3100_v41 }
 0x801   :  { %3341 = vmatmul.mubr.f32.vlgmr.msra.gmra.mrb[46].mxu1 %v6899_v4  ;;  %v3461_v31 = vadd.f32 %v3445_v47, %v6899_v4  ;;  %4373 = vmatmul.mubr.f32.vlgmr.msra.gmra.mrb[46].mxu0 %v6899_v4 }
 0x803   :  { %3469 = vst [vmem:[#allocation14 + $0x8] sm:$0xff] %v3461_v31 }
 0x8a8   :  { %v3177_v51 = vpop.f32.mrb[14].mxu0  ;;  %v3248_v24 = vpop.f32.mrb[44].mxu1 }
 0x8a9   :  { %v5396_v57 = vadd.f32 %v7170_v39, %v3177_v51  ;;  %v3179_v8 = vpop.f32.mrb[15].mxu0  ;;  %v4339_v25 = vpop.f32.mrb[45].mxu1  ;;  %v3249_v15 = vadd.f32 %v3248_v24, %v7172_v6 }
 0x8aa   :  { %v5398_v52 = vadd.f32 %v7171_v44, %v3179_v8 }
 0x8ab   :  { %v3539_v32 = vmul.f32 -1.442695, %v5396_v57 }
 0x8ac   :  { %v3540_v0 = vmul.f32 -1.442695, %v5398_v52 }
 0x8ad   :  { %5571 = vpow2.f32 %v3539_v32 }
 0x8ae   :  { %5573 = vpow2.f32 %v3540_v0 }
 0x8b7   :  { %v5572_v12 = vpop.eup %5571 }
 0x8b8   :  { %v3256_v22 = vadd.f32 1.0, %v5572_v12  ;;  %v5574_v48 = vpop.eup %5573 }
 0x8b9   :  { %v3263_v7 = vadd.f32 1.0, %v5574_v48 }
 0x8ba   :  { %5575 = vrcp.f32 %v3256_v22 }
 0x8bb   :  { %5577 = vrcp.f32 %v3263_v7 }
 0x8c4   :  { %v5576_v16 = vpop.eup %5575 }
 0x8c5   :  { %v3266_v17 = vmul.f32 %v5576_v16, %v3249_v15  ;;  %v5578_v2 = vpop.eup %5577 }
 0x8c6   :  { %v3269_v37 = vsub.f32 1.0, %v5578_v2  ;;  %v3271_v13 = vmul.f32 %v5578_v2, %v6857_v62 }
 0x8c7   :  { %v3267_v39 = vadd.f32 %v3266_v17, %v7178_v53 }
 0x8c9   :  { %5579 = vtanh.f32 %v3267_v39 }
 0x8d3   :  { %v5580_v26 = vpop.eup %5579 }
 0x8d4   :  { %v3270_v44 = vmul.f32 %v5580_v26, %v3269_v37  ;;  %v3342_v58 = vpop.f32.mrb[46].mxu1  ;;  %v3413_v9 = vpop.f32.mrb[46].mxu0 }
 0x8d5   :  { %v3343_v33 = vadd.f32 %v3342_v58, %v6285_v36  ;;  %v3344_v35 = vpop.f32.mrb[47].mxu1  ;;  %v4374_v54 = vpop.f32.mrb[47].mxu0  ;;  %v3414_v40 = vadd.f32 %v3413_v9, %v6304_v23 }
 0x8d6   :  { %v3272_v45 = vadd.f32 %v3271_v13, %v3270_v44  ;;  %v3345_v6 = vadd.f32 %v3344_v35, %v6287_v5 }
 0x8d7   :  { %v3417_v63 = vadd.f32 %v3343_v33, %v7179_v56 }
 0x8d8   :  { %v3467_v18 = vadd.f32 %v3272_v45, %v7180_v10  ;;  %3441 = vst [vmem:[#allocation15] sm:$0xff] %v3272_v45  ;;  %v3424_v29 = vadd.f32 %v3345_v6, %v7181_v27 }
 0x8d9   :  { %v3541_v30 = vmul.f32 -1.442695, %v3417_v63 }
 0x8da   :  { %3475 = vst [vmem:[#allocation14 + $0x38] sm:$0xff] %v3467_v18  ;;  %v3542_v59 = vmul.f32 -1.442695, %v3424_v29 }
 0x8db   :  { %5581 = vpow2.f32 %v3541_v30 }
 0x8dc   :  { %5583 = vpow2.f32 %v3542_v59 }
 0x8e5   :  { %v5582_v3 = vpop.eup %5581 }
 0x8e6   :  { %v3421_v46 = vadd.f32 1.0, %v5582_v3  ;;  %v5584_v36 = vpop.eup %5583 }
 0x8e7   :  { %v3428_v62 = vadd.f32 1.0, %v5584_v36 }
 0x8e8   :  { %5585 = vrcp.f32 %v3421_v46 }
 0x8e9   :  { %5587 = vrcp.f32 %v3428_v62 }
 0x8f2   :  { %v5586_v5 = vpop.eup %5585 }
 0x8f3   :  { %v3431_v60 = vmul.f32 %v5586_v5, %v3414_v40  ;;  %v5588_v14 = vpop.eup %5587 }
 0x8f4   :  { %v3434_v19 = vsub.f32 1.0, %v5588_v14  ;;  %v3436_v42 = vmul.f32 %v5588_v14, %v6899_v4 }
 0x8f5   :  { %v3432_v49 = vadd.f32 %v3431_v60, %v7182_v43 }
 0x8f7   :  { %5589 = vtanh.f32 %v3432_v49 }
 0x901   :  { %v5590_v28 = vpop.eup %5589 }
 0x902   :  { %v3435_v34 = vmul.f32 %v5590_v28, %v3434_v19 }
 0x904   :  { %v3437_v50 = vadd.f32 %v3436_v42, %v3435_v34 }
 0x906   :  { %v3460_v23 = vadd.f32 %v3444_v61, %v3437_v50  ;;  %3443 = vst [vmem:[#allocation15 + $0x8] sm:$0xff] %v3437_v50 }
 0x907   :  { %5712 = shalt.err (!%p5709_p2)
}
 0x908   :  { %s5713_s19 = scalar_lea.hbm %s6963_s9, 256 }
 0x909   :  { %p5714_p3 = scmp.ne.s32.totalorder %s6963_s9, %s5713_s19  ;;  %p5717_p4 = scmp.lt.u32.totalorder %s5713_s19, %s6963_s9 }
 0x90b   :  { %p5719_p5 = pnand %p5717_p4, %p5714_p3 }
 0x90d   :  { %5722 = shalt.err (!%p5719_p5)
}
 0x90e   :  { %3499 = dma.vmem_to_hbm [thread:$0]  %s3494_s6, 256, %s6963_s9, [#allocation16], %s5762_s5, %s5762_s5, %s5763_s24   ;;  %3468 = vst [vmem:[#allocation14] sm:$0xff] %v3460_v23 }
 0x90f   :  { %s5723_s25 = scalar_lea.vmem %s6917_s15, 1024  ;;  %p5728_p7 = scmp.lt.s32.totalorder %s6917_s15, %s6917_s15 }
 0x910   :  { %p5724_p6 = scmp.ne.s32.totalorder %s6917_s15, %s5723_s25  ;;  %p5729_p8 = scmp.lt.s32.totalorder %s5723_s25, %s5723_s25 }
 0x912   :  { %p5730_p9 = por %p5729_p8, %p5728_p7 }
 0x914   :  { %p5731_p10 = pnand %p5730_p9, %p5724_p6 }
 0x916   :  { %5734 = shalt.err (!%p5731_p10)
}
 0x917   :  { %s5735_s29 = scalar_lea.hbm %s6962_s8, 1024 }
 0x918   :  { %p5736_p11 = scmp.ne.s32.totalorder %s6962_s8, %s5735_s29  ;;  %p5739_p12 = scmp.lt.u32.totalorder %s5735_s29, %s6962_s8 }
 0x91a   :  { %p5741_p13 = pnand %p5739_p12, %p5736_p11 }
 0x91c   :  { %5744 = shalt.err (!%p5741_p13)
}
 0x91d   :  { %3487 = dma.vmem_to_hbm [thread:$0]  %s6917_s15, 1024, %s6962_s8, [#allocation7], %s5762_s5, %s5762_s5, %s5763_s24  }
 0x91e   :  { %5751 = dma.done.wait [#allocation7], 1024  }
 0x91f   :  { %5752 = vsyncadd [#allocation7], 4294966272 }
 0x920   :  { %5753 = dma.done.wait [#allocation16], 256  }
 0x921   :  { %5754 = vsyncadd [#allocation16], 4294967040 }
 0x922   :  { %3506 = vsyncpa [#allocation6], 1 }
 0x923   :  { %3507 = vsyncpa [#allocation9], 1 }
 0x924   :  { %3508 = vsyncpa [#allocation12], 1 }
 0x925   :  { %3509 = vsyncpa [#allocation7], 1 }
 0x926   :  { %3510 = vsyncpa [#allocation16], 1 }

</bundles_post_ra>
